<compile_context>
chip_gen: v7x
topology: tpu7x:2x2x1
jax: 0.10.0
libtpu: 0.0.40
codegen_flags: <defaults>
</compile_context>

<pallas_src>
import functools

import jax
import jax.numpy as jnp
from jax.experimental import pallas as pl
from jax.experimental.pallas import tpu as pltpu


# bf16 GEMM operands (f32 accumulate).  Set to jnp.float32 to reproduce the
# PyTorch reference bit-for-bit (at the cost of MXU rate and 2x input DMA).
_MXU_INPUT_DTYPE = jnp.bfloat16


# ----------------------------------------------------------------------------
# Fused ConvNormAct kernel.
#   grid = (2, N):  axis 0 = pass (0: stats, 1: normalize+write), axis 1 = image
#   acc  = sum_t W[t] @ x[:, off_t : off_t + span]     (MXU, f32 accumulate)
#   pass 0: sum += sum_M(acc*mask); sumsq += sum_M(acc^2*mask); finalize at end
#   pass 1: out = relu(acc*scale + bias) [+ residual]
# ----------------------------------------------------------------------------

def _cna_common(w_ref, x_ref, g_ref, b_ref, mask_ref, r_ref, o_ref,
                sum_ref, ssq_ref, scale_ref, bias_ref,
                tap_offsets, span, count, eps):
    p = pl.program_id(0)           # pass
    n = pl.program_id(1)           # image tile
    cout = o_ref.shape[1]

    # Tap-accumulated matmul (1 tap for 1x1, 9 taps for 3x3).  Static unroll;
    # windows are static in-VMEM slices of the guard-padded flat activation.
    xv = x_ref[0]                                               # (Cin, L) bf16
    acc = jnp.zeros((cout, span), jnp.float32)
    for t, off in enumerate(tap_offsets):
        acc = acc + jnp.dot(w_ref[t], xv[:, off:off + span],
                            preferred_element_type=jnp.float32)

    @pl.when((p == 0) & (n == 0))
    def _init():
        sum_ref[...] = jnp.zeros_like(sum_ref)
        ssq_ref[...] = jnp.zeros_like(ssq_ref)

    @pl.when(p == 0)
    def _stats():
        # Single-pass sum / sum-of-squares (f32 accumulators); mask removes
        # padded / non-strided positions from the batch statistics.
        m = mask_ref[...]                                       # (1, span)
        am = acc * m
        sum_ref[...] = sum_ref[...] + jnp.sum(am, axis=-1, keepdims=True)
        ssq_ref[...] = ssq_ref[...] + jnp.sum(acc * am, axis=-1, keepdims=True)

    @pl.when((p == 0) & (n == pl.num_programs(1) - 1))
    def _finalize():
        inv = 1.0 / count
        mean = sum_ref[...] * inv
        var = ssq_ref[...] * inv - mean * mean                  # biased var
        s = g_ref[...] * jax.lax.rsqrt(var + eps)
        scale_ref[...] = s
        bias_ref[...] = b_ref[...] - mean * s

    @pl.when(p == 1)
    def _write():
        y = jnp.maximum(acc * scale_ref[...] + bias_ref[...], 0.0)
        if r_ref is not None:
            # Bottleneck adds the shortcut AFTER the ReLU (no act on the sum).
            y = y + r_ref[0]
        o_ref[0] = y


def _cna_kernel(w_ref, x_ref, g_ref, b_ref, mask_ref, o_ref,
                sum_ref, ssq_ref, scale_ref, bias_ref,
                *, tap_offsets, span, count, eps):
    _cna_common(w_ref, x_ref, g_ref, b_ref, mask_ref, None, o_ref,
                sum_ref, ssq_ref, scale_ref, bias_ref,
                tap_offsets, span, count, eps)


def _cna_res_kernel(w_ref, x_ref, g_ref, b_ref, mask_ref, r_ref, o_ref,
                    sum_ref, ssq_ref, scale_ref, bias_ref,
                    *, tap_offsets, span, count, eps):
    _cna_common(w_ref, x_ref, g_ref, b_ref, mask_ref, r_ref, o_ref,
                sum_ref, ssq_ref, scale_ref, bias_ref,
                tap_offsets, span, count, eps)


# ----------------------------------------------------------------------------
# pallas_call wrapper
# ----------------------------------------------------------------------------

def _fused_conv_norm_act(w_taps, x_img, gamma, beta, mask, *,
                         tap_offsets, span, count, eps, residual=None):
    """w_taps: (T, Cout, Cin) bf16; x_img: (N, Cin, L) bf16; mask: (1, span) f32;
    residual: (N, Cout, span) f32 or None.  Returns (N, Cout, span) f32."""
    N, cin, L = x_img.shape
    T, cout, cin2 = w_taps.shape
    assert cin == cin2

    g2 = gamma.reshape(cout, 1).astype(jnp.float32)
    b2 = beta.reshape(cout, 1).astype(jnp.float32)

    args = [w_taps, x_img, g2, b2, mask]
    in_specs = [
        pl.BlockSpec((T, cout, cin), lambda p, n: (0, 0, 0)),   # weights, resident
        pl.BlockSpec((1, cin, L), lambda p, n: (n, 0, 0)),      # per-image activation
        pl.BlockSpec((cout, 1), lambda p, n: (0, 0)),           # gamma
        pl.BlockSpec((cout, 1), lambda p, n: (0, 0)),           # beta
        pl.BlockSpec((1, span), lambda p, n: (0, 0)),           # valid-position mask
    ]
    kern_kw = dict(tap_offsets=tuple(tap_offsets), span=span,
                   count=float(count), eps=eps)
    if residual is None:
        kernel = functools.partial(_cna_kernel, **kern_kw)
    else:
        kernel = functools.partial(_cna_res_kernel, **kern_kw)
        args.append(residual.astype(jnp.float32))
        in_specs.append(pl.BlockSpec((1, cout, span), lambda p, n: (n, 0, 0)))

    return pl.pallas_call(
        kernel,
        out_shape=jax.ShapeDtypeStruct((N, cout, span), jnp.float32),
        grid=(2, N),                       # (pass, image); image-tiled, pass-sequential
        in_specs=in_specs,
        out_specs=pl.BlockSpec((1, cout, span), lambda p, n: (n, 0, 0)),
        scratch_shapes=[pltpu.VMEM((cout, 1), jnp.float32)] * 4,   # sum, sumsq, scale, bias
        compiler_params=pltpu.CompilerParams(
            # Both axes sequential: stats accumulate across images and the
            # normalize pass must follow the stats pass.
            dimension_semantics=("arbitrary", "arbitrary"),
        ),
    )(*args)


# ----------------------------------------------------------------------------
# JAX glue: ConvNormAct (1x1 / 3x3, pad=k//2, no bias) + BatchNorm2d(batch
# stats, eps=1e-5) + ReLU, activations carried in plain NCHW.
# ----------------------------------------------------------------------------

def _valid_mask(Hp, Wp, OH, OW, stride):
    ii = jnp.arange(Hp)
    jj = jnp.arange(Wp)
    vi = (ii >= 1) & (ii <= 1 + stride * (OH - 1)) & (((ii - 1) % stride) == 0)
    vj = (jj >= 1) & (jj <= 1 + stride * (OW - 1)) & (((jj - 1) % stride) == 0)
    return (vi[:, None] & vj[None, :]).astype(jnp.float32).reshape(1, Hp * Wp)


def conv_norm_act(x, w, gamma, beta, stride=1, residual=None, eps=1e-5):
    """x: (N, Cin, H, W) f32.  w: (Cout, Cin, k, k) PyTorch layout.
    residual: (N, Cout, OH, OW) f32 or None (added after the ReLU).
    Returns (N, Cout, OH, OW) f32."""
    N, cin, H, W = x.shape
    cout, cin2, kh, kw = w.shape
    assert cin == cin2 and kh == kw
    # TODO(synk): grouped conv (groups > 1) not implemented; module default is groups=1.

    if kh == 1:
        OH, OW = H, W
        span = H * W
        xk = x.reshape(N, cin, span).astype(_MXU_INPUT_DTYPE)
        w_taps = w.reshape(1, cout, cin).astype(_MXU_INPUT_DTYPE)
        offsets = (0,)
        mask = jnp.ones((1, span), jnp.float32)
    else:
        assert kh == 3 and residual is None
        OH = (H + 2 - 3) // stride + 1
        OW = (W + 2 - 3) // stride + 1
        Hp, Wp = H + 2, W + 2
        span = Hp * Wp
        G = Wp + 1                                   # guard so all tap windows stay in-bounds
        xp = jnp.pad(x, ((0, 0), (0, 0), (1, 1), (1, 1))).reshape(N, cin, span)
        xk = jnp.pad(xp, ((0, 0), (0, 0), (G, G))).astype(_MXU_INPUT_DTYPE)
        w_taps = jnp.transpose(w, (2, 3, 0, 1)).reshape(9, cout, cin).astype(_MXU_INPUT_DTYPE)
        # Tap (dy, dx) window starts at G + (dy-1)*Wp + (dx-1) = dy*Wp + dx.
        offsets = tuple(dy * Wp + dx for dy in range(3) for dx in range(3))
        mask = _valid_mask(Hp, Wp, OH, OW, stride)

    count = N * OH * OW                              # valid elements per channel
    res = None if residual is None else residual.reshape(N, cout, OH * OW)

    out = _fused_conv_norm_act(w_taps, xk, gamma, beta, mask,
                               tap_offsets=offsets, span=span, count=count,
                               eps=eps, residual=res)
    if kh == 1:
        return out.reshape(N, cout, OH, OW)
    # Extract the valid (strided) interior of the padded output grid.
    out = out.reshape(N, cout, Hp, Wp)
    return out[:, :, 1::stride, 1::stride][:, :, :OH, :OW]


def bottleneck_forward(p, x):
    """Bottleneck: out = ConvNormAct3(ConvNormAct2(ConvNormAct1(x))) + shortcut(x)."""
    if p["shortcut"] is None:
        shortcut = x
    else:
        sc = p["shortcut"]
        shortcut = conv_norm_act(x, sc["w"], sc["gamma"], sc["beta"], stride=p["stride"])
    c1, c2, c3 = p["conv1"], p["conv2"], p["conv3"]
    h = conv_norm_act(x, c1["w"], c1["gamma"], c1["beta"], stride=1)
    h = conv_norm_act(h, c2["w"], c2["gamma"], c2["beta"], stride=p["stride"])
    # Residual add fused into conv3's kernel (after its ReLU, matching the module).
    return conv_norm_act(h, c3["w"], c3["gamma"], c3["beta"], stride=1, residual=shortcut)


# ----------------------------------------------------------------------------
# Deterministic parameter init (mirrors Bottleneck.__init__, groups=1)
# ----------------------------------------------------------------------------

def _init_cna(key, cin, cout, k):
    w = jax.random.normal(key, (cout, cin, k, k), jnp.float32) * (1.0 / (k * k * cin) ** 0.5)
    return {
        "w": w,
        "gamma": jnp.ones((cout,), jnp.float32),     # BatchNorm2d default affine init
        "beta": jnp.zeros((cout,), jnp.float32),
    }


def init_bottleneck_params(key, in_channels, channels, stride=1, base_width=64, expansion=4):
    hidden = int(channels * (base_width / 64.0))     # groups = 1
    out_channels = channels * expansion
    k1, k2, k3, k4 = jax.random.split(key, 4)
    needs_proj = (in_channels != out_channels) or (stride != 1)
    return {
        "stride": stride,
        "conv1": _init_cna(k1, in_channels, hidden, 1),
        "conv2": _init_cna(k2, hidden, hidden, 3),
        "conv3": _init_cna(k3, hidden, out_channels, 3 // 3),  # 1x1
        "shortcut": _init_cna(k4, in_channels, out_channels, 3) if needs_proj else None,
    }


# ----------------------------------------------------------------------------
# Main
# ----------------------------------------------------------------------------

if __name__ == "__main__":
    N, in_ch, H, W = 2, 8, 16, 16
    channels = 8                       # expansion 4 -> out_channels = 32

    key = jax.random.PRNGKey(0)
    kx, k1, k2 = jax.random.split(key, 3)
    x_nchw = jax.random.normal(kx, (N, in_ch, H, W), jnp.float32)   # NCHW, like PyTorch

    # Block 1: projection shortcut + stride-2 downsampling (shortcut is a 3x3 ConvNormAct).
    p1 = init_bottleneck_params(k1, in_ch, channels, stride=2)
    # Block 2: identity shortcut (in_channels == channels * expansion, stride 1).
    p2 = init_bottleneck_params(k2, channels * 4, channels, stride=1)

    @jax.jit
    def forward(x):
        h = bottleneck_forward(p1, x)
        h = bottleneck_forward(p2, h)
        return h

    out = jax.block_until_ready(forward(x_nchw))

    assert out.shape == (N, channels * 4, H // 2, W // 2), out.shape   # (2, 32, 8, 8)
    assert bool(jnp.all(jnp.isfinite(out)))
    print("KERNEL_OK")
</pallas_src>

<mosaic_0001>
module attributes {stable_mosaic.version = 11 : i64} {
  func.func @_cna_kernel(%arg0: i32, %arg1: i32, %arg2: memref<1x8x8xbf16, #tpu.memory_space<vmem>>, %arg3: memref<1x8x256xbf16, #tpu.memory_space<vmem>>, %arg4: memref<8x1xf32, #tpu.memory_space<vmem>>, %arg5: memref<8x1xf32, #tpu.memory_space<vmem>>, %arg6: memref<1x256xf32, #tpu.memory_space<vmem>>, %arg7: memref<1x8x256xf32, #tpu.memory_space<vmem>>, %arg8: memref<8x1xf32, #tpu.memory_space<vmem>>, %arg9: memref<8x1xf32, #tpu.memory_space<vmem>>, %arg10: memref<8x1xf32, #tpu.memory_space<vmem>>, %arg11: memref<8x1xf32, #tpu.memory_space<vmem>>) attributes {dimension_semantics = [#tpu.dimension_semantics<arbitrary>, #tpu.dimension_semantics<arbitrary>], iteration_bounds = array<i64: 2, 2>, scalar_prefetch = 0 : i64, scratch_operands = 4 : i64, tpu.core_type = #tpu.core_type<tc>, window_params = [{pipeline_mode = #tpu.pipeline_mode<synchronous>, transform_indices = @transform_0, window_bounds = array<i64: 1, 8, 8>}, {transform_indices = @transform_1, window_bounds = array<i64: 1, 8, 256>}, {pipeline_mode = #tpu.pipeline_mode<synchronous>, transform_indices = @transform_2, window_bounds = array<i64: 8, 1>}, {pipeline_mode = #tpu.pipeline_mode<synchronous>, transform_indices = @transform_3, window_bounds = array<i64: 8, 1>}, {pipeline_mode = #tpu.pipeline_mode<synchronous>, transform_indices = @transform_4, window_bounds = array<i64: 1, 256>}, {transform_indices = @transform_5, window_bounds = array<i64: 1, 8, 256>}]} {
    %c0 = arith.constant 0 : index
    %c0_0 = arith.constant 0 : index
    %c0_1 = arith.constant 0 : index
    %0 = vector.load %arg3[%c0, %c0_0, %c0_1] : memref<1x8x256xbf16, #tpu.memory_space<vmem>>, vector<1x8x256xbf16>
    %1 = vector.shape_cast %0 : vector<1x8x256xbf16> to vector<8x256xbf16>
    %cst = arith.constant 0.000000e+00 : f32
    %2 = vector.broadcast %cst : f32 to vector<8x256xf32>
    %c0_2 = arith.constant 0 : index
    %c0_3 = arith.constant 0 : index
    %c0_4 = arith.constant 0 : index
    %3 = vector.load %arg2[%c0_2, %c0_3, %c0_4] : memref<1x8x8xbf16, #tpu.memory_space<vmem>>, vector<1x8x8xbf16>
    %4 = vector.shape_cast %3 : vector<1x8x8xbf16> to vector<8x8xbf16>
    %cst_5 = arith.constant dense<0.000000e+00> : vector<8x256xf32>
    %5 = tpu.matmul %4, %1, %cst_5 {dimension_numbers = #tpu.dot_dimension_numbers<[1], [0], [0], [1], [0, 0, 1, 1], [], []>} : vector<8x8xbf16>, vector<8x256xbf16>, vector<8x256xf32> -> vector<8x256xf32>
    %6 = arith.addf %2, %5 : vector<8x256xf32>
    %c0_i32 = arith.constant 0 : i32
    %7 = arith.cmpi eq, %arg0, %c0_i32 : i32
    %c0_i32_6 = arith.constant 0 : i32
    %8 = arith.cmpi eq, %arg1, %c0_i32_6 : i32
    %9 = arith.andi %7, %8 : i1
    %10 = arith.extui %9 : i1 to i32
    %c0_i32_7 = arith.constant 0 : i32
    %11 = arith.cmpi ne, %10, %c0_i32_7 : i32
    scf.if %11 {
      %cst_14 = arith.constant 0.000000e+00 : f32
      %23 = vector.broadcast %cst_14 : f32 to vector<8x1xf32>
      %c0_15 = arith.constant 0 : index
      %c0_16 = arith.constant 0 : index
      %24 = vector.load %arg8[%c0_15, %c0_16] : memref<8x1xf32, #tpu.memory_space<vmem>>, vector<8x1xf32>
      tpu.vector_store %arg8[%c0_15, %c0_16], %23 {strides = array<i32>} : memref<8x1xf32, #tpu.memory_space<vmem>>, vector<8x1xf32>,
      %cst_17 = arith.constant 0.000000e+00 : f32
      %25 = vector.broadcast %cst_17 : f32 to vector<8x1xf32>
      %c0_18 = arith.constant 0 : index
      %c0_19 = arith.constant 0 : index
      %26 = vector.load %arg9[%c0_18, %c0_19] : memref<8x1xf32, #tpu.memory_space<vmem>>, vector<8x1xf32>
      tpu.vector_store %arg9[%c0_18, %c0_19], %25 {strides = array<i32>} : memref<8x1xf32, #tpu.memory_space<vmem>>, vector<8x1xf32>,
    } else {
    }
    %c0_i32_8 = arith.constant 0 : i32
    %12 = arith.cmpi eq, %arg0, %c0_i32_8 : i32
    %13 = arith.extui %12 : i1 to i32
    %c0_i32_9 = arith.constant 0 : i32
    %14 = arith.cmpi ne, %13, %c0_i32_9 : i32
    scf.if %14 {
      %c0_14 = arith.constant 0 : index
      %c0_15 = arith.constant 0 : index
      %23 = vector.load %arg6[%c0_14, %c0_15] : memref<1x256xf32, #tpu.memory_space<vmem>>, vector<1x256xf32>
      %24 = vector.broadcast %23 : vector<1x256xf32> to vector<8x256xf32>
      %25 = arith.mulf %6, %24 : vector<8x256xf32>
      %c0_16 = arith.constant 0 : index
      %c0_17 = arith.constant 0 : index
      %26 = vector.load %arg8[%c0_16, %c0_17] : memref<8x1xf32, #tpu.memory_space<vmem>>, vector<8x1xf32>
      %cst_18 = arith.constant dense<0.000000e+00> : vector<8xf32>
      %27 = vector.multi_reduction <add>, %25, %cst_18 [1] : vector<8x256xf32> to vector<8xf32>
      %28 = vector.shape_cast %27 : vector<8xf32> to vector<8x1xf32>
      %29 = arith.addf %26, %28 : vector<8x1xf32>
      %c0_19 = arith.constant 0 : index
      %c0_20 = arith.constant 0 : index
      %30 = vector.load %arg8[%c0_19, %c0_20] : memref<8x1xf32, #tpu.memory_space<vmem>>, vector<8x1xf32>
      tpu.vector_store %arg8[%c0_19, %c0_20], %29 {strides = array<i32>} : memref<8x1xf32, #tpu.memory_space<vmem>>, vector<8x1xf32>,
      %c0_21 = arith.constant 0 : index
      %c0_22 = arith.constant 0 : index
      %31 = vector.load %arg9[%c0_21, %c0_22] : memref<8x1xf32, #tpu.memory_space<vmem>>, vector<8x1xf32>
      %32 = arith.mulf %6, %25 : vector<8x256xf32>
      %cst_23 = arith.constant dense<0.000000e+00> : vector<8xf32>
      %33 = vector.multi_reduction <add>, %32, %cst_23 [1] : vector<8x256xf32> to vector<8xf32>
      %34 = vector.shape_cast %33 : vector<8xf32> to vector<8x1xf32>
      %35 = arith.addf %31, %34 : vector<8x1xf32>
      %c0_24 = arith.constant 0 : index
      %c0_25 = arith.constant 0 : index
      %36 = vector.load %arg9[%c0_24, %c0_25] : memref<8x1xf32, #tpu.memory_space<vmem>>, vector<8x1xf32>
      tpu.vector_store %arg9[%c0_24, %c0_25], %35 {strides = array<i32>} : memref<8x1xf32, #tpu.memory_space<vmem>>, vector<8x1xf32>,
    } else {
    }
    %c0_i32_10 = arith.constant 0 : i32
    %15 = arith.cmpi eq, %arg0, %c0_i32_10 : i32
    %c1_i32 = arith.constant 1 : i32
    %16 = arith.cmpi eq, %arg1, %c1_i32 : i32
    %17 = arith.andi %15, %16 : i1
    %18 = arith.extui %17 : i1 to i32
    %c0_i32_11 = arith.constant 0 : i32
    %19 = arith.cmpi ne, %18, %c0_i32_11 : i32
    scf.if %19 {
      %c0_14 = arith.constant 0 : index
      %c0_15 = arith.constant 0 : index
      %23 = vector.load %arg8[%c0_14, %c0_15] : memref<8x1xf32, #tpu.memory_space<vmem>>, vector<8x1xf32>
      %cst_16 = arith.constant 0.001953125 : f32
      %24 = vector.broadcast %cst_16 : f32 to vector<8x1xf32>
      %25 = arith.mulf %23, %24 : vector<8x1xf32>
      %c0_17 = arith.constant 0 : index
      %c0_18 = arith.constant 0 : index
      %26 = vector.load %arg9[%c0_17, %c0_18] : memref<8x1xf32, #tpu.memory_space<vmem>>, vector<8x1xf32>
      %cst_19 = arith.constant 0.001953125 : f32
      %27 = vector.broadcast %cst_19 : f32 to vector<8x1xf32>
      %28 = arith.mulf %26, %27 : vector<8x1xf32>
      %29 = arith.mulf %25, %25 : vector<8x1xf32>
      %30 = arith.subf %28, %29 : vector<8x1xf32>
      %c0_20 = arith.constant 0 : index
      %c0_21 = arith.constant 0 : index
      %31 = vector.load %arg4[%c0_20, %c0_21] : memref<8x1xf32, #tpu.memory_space<vmem>>, vector<8x1xf32>
      %cst_22 = arith.constant 9.99999974E-6 : f32
      %32 = vector.broadcast %cst_22 : f32 to vector<8x1xf32>
      %33 = arith.addf %30, %32 : vector<8x1xf32>
      %34 = math.rsqrt %33 : vector<8x1xf32>
      %35 = arith.mulf %31, %34 : vector<8x1xf32>
      %c0_23 = arith.constant 0 : index
      %c0_24 = arith.constant 0 : index
      %36 = vector.load %arg10[%c0_23, %c0_24] : memref<8x1xf32, #tpu.memory_space<vmem>>, vector<8x1xf32>
      tpu.vector_store %arg10[%c0_23, %c0_24], %35 {strides = array<i32>} : memref<8x1xf32, #tpu.memory_space<vmem>>, vector<8x1xf32>,
      %c0_25 = arith.constant 0 : index
      %c0_26 = arith.constant 0 : index
      %37 = vector.load %arg5[%c0_25, %c0_26] : memref<8x1xf32, #tpu.memory_space<vmem>>, vector<8x1xf32>
      %38 = arith.mulf %25, %35 : vector<8x1xf32>
      %39 = arith.subf %37, %38 : vector<8x1xf32>
      %c0_27 = arith.constant 0 : index
      %c0_28 = arith.constant 0 : index
      %40 = vector.load %arg11[%c0_27, %c0_28] : memref<8x1xf32, #tpu.memory_space<vmem>>, vector<8x1xf32>
      tpu.vector_store %arg11[%c0_27, %c0_28], %39 {strides = array<i32>} : memref<8x1xf32, #tpu.memory_space<vmem>>, vector<8x1xf32>,
    } else {
    }
    %c1_i32_12 = arith.constant 1 : i32
    %20 = arith.cmpi eq, %arg0, %c1_i32_12 : i32
    %21 = arith.extui %20 : i1 to i32
    %c0_i32_13 = arith.constant 0 : i32
    %22 = arith.cmpi ne, %21, %c0_i32_13 : i32
    scf.if %22 {
      %c0_14 = arith.constant 0 : index
      %c0_15 = arith.constant 0 : index
      %23 = vector.load %arg10[%c0_14, %c0_15] : memref<8x1xf32, #tpu.memory_space<vmem>>, vector<8x1xf32>
      %24 = vector.broadcast %23 : vector<8x1xf32> to vector<8x256xf32>
      %25 = arith.mulf %6, %24 : vector<8x256xf32>
      %c0_16 = arith.constant 0 : index
      %c0_17 = arith.constant 0 : index
      %26 = vector.load %arg11[%c0_16, %c0_17] : memref<8x1xf32, #tpu.memory_space<vmem>>, vector<8x1xf32>
      %27 = vector.broadcast %26 : vector<8x1xf32> to vector<8x256xf32>
      %28 = arith.addf %25, %27 : vector<8x256xf32>
      %cst_18 = arith.constant 0.000000e+00 : f32
      %29 = vector.broadcast %cst_18 : f32 to vector<8x256xf32>
      %30 = arith.maximumf %28, %29 : vector<8x256xf32>
      %c0_19 = arith.constant 0 : index
      %c0_20 = arith.constant 0 : index
      %c0_21 = arith.constant 0 : index
      %31 = vector.load %arg7[%c0_19, %c0_20, %c0_21] : memref<1x8x256xf32, #tpu.memory_space<vmem>>, vector<1x8x256xf32>
      %32 = vector.shape_cast %31 : vector<1x8x256xf32> to vector<8x256xf32>
      %33 = vector.shape_cast %30 : vector<8x256xf32> to vector<1x8x256xf32>
      tpu.vector_store %arg7[%c0_19, %c0_20, %c0_21], %33 {strides = array<i32>} : memref<1x8x256xf32, #tpu.memory_space<vmem>>, vector<1x8x256xf32>,
    } else {
    }
    return
  }
  func.func @transform_0(%arg0: i32, %arg1: i32) -> (i32, i32, i32) {
    %c0_i32 = arith.constant 0 : i32
    %c0_i32_0 = arith.constant 0 : i32
    %c0_i32_1 = arith.constant 0 : i32
    %c0_i32_2 = arith.constant 0 : i32
    return %c0_i32, %c0_i32_0, %c0_i32_1 : i32, i32, i32
  }
  func.func @transform_1(%arg0: i32, %arg1: i32) -> (i32, i32, i32) {
    %c0_i32 = arith.constant 0 : i32
    %c0_i32_0 = arith.constant 0 : i32
    %c0_i32_1 = arith.constant 0 : i32
    return %arg1, %c0_i32, %c0_i32_0 : i32, i32, i32
  }
  func.func @transform_2(%arg0: i32, %arg1: i32) -> (i32, i32) {
    %c0_i32 = arith.constant 0 : i32
    %c0_i32_0 = arith.constant 0 : i32
    %c0_i32_1 = arith.constant 0 : i32
    return %c0_i32, %c0_i32_0 : i32, i32
  }
  func.func @transform_3(%arg0: i32, %arg1: i32) -> (i32, i32) {
    %c0_i32 = arith.constant 0 : i32
    %c0_i32_0 = arith.constant 0 : i32
    %c0_i32_1 = arith.constant 0 : i32
    return %c0_i32, %c0_i32_0 : i32, i32
  }
  func.func @transform_4(%arg0: i32, %arg1: i32) -> (i32, i32) {
    %c0_i32 = arith.constant 0 : i32
    %c0_i32_0 = arith.constant 0 : i32
    %c0_i32_1 = arith.constant 0 : i32
    return %c0_i32, %c0_i32_0 : i32, i32
  }
  func.func @transform_5(%arg0: i32, %arg1: i32) -> (i32, i32, i32) {
    %c0_i32 = arith.constant 0 : i32
    %c0_i32_0 = arith.constant 0 : i32
    %c0_i32_1 = arith.constant 0 : i32
    return %arg1, %c0_i32, %c0_i32_0 : i32, i32, i32
  }
}

module attributes {stable_mosaic.version = 11 : i64} {
  func.func @_cna_kernel(%arg0: i32, %arg1: i32, %arg2: memref<9x8x8xbf16, #tpu.memory_space<vmem>>, %arg3: memref<1x8x362xbf16, #tpu.memory_space<vmem>>, %arg4: memref<8x1xf32, #tpu.memory_space<vmem>>, %arg5: memref<8x1xf32, #tpu.memory_space<vmem>>, %arg6: memref<1x324xf32, #tpu.memory_space<vmem>>, %arg7: memref<1x8x324xf32, #tpu.memory_space<vmem>>, %arg8: memref<8x1xf32, #tpu.memory_space<vmem>>, %arg9: memref<8x1xf32, #tpu.memory_space<vmem>>, %arg10: memref<8x1xf32, #tpu.memory_space<vmem>>, %arg11: memref<8x1xf32, #tpu.memory_space<vmem>>) attributes {dimension_semantics = [#tpu.dimension_semantics<arbitrary>, #tpu.dimension_semantics<arbitrary>], iteration_bounds = array<i64: 2, 2>, scalar_prefetch = 0 : i64, scratch_operands = 4 : i64, tpu.core_type = #tpu.core_type<tc>, window_params = [{pipeline_mode = #tpu.pipeline_mode<synchronous>, transform_indices = @transform_0, window_bounds = array<i64: 9, 8, 8>}, {transform_indices = @transform_1, window_bounds = array<i64: 1, 8, 362>}, {pipeline_mode = #tpu.pipeline_mode<synchronous>, transform_indices = @transform_2, window_bounds = array<i64: 8, 1>}, {pipeline_mode = #tpu.pipeline_mode<synchronous>, transform_indices = @transform_3, window_bounds = array<i64: 8, 1>}, {pipeline_mode = #tpu.pipeline_mode<synchronous>, transform_indices = @transform_4, window_bounds = array<i64: 1, 324>}, {transform_indices = @transform_5, window_bounds = array<i64: 1, 8, 324>}]} {
    %c0 = arith.constant 0 : index
    %c0_0 = arith.constant 0 : index
    %c0_1 = arith.constant 0 : index
    %0 = vector.load %arg3[%c0, %c0_0, %c0_1] : memref<1x8x362xbf16, #tpu.memory_space<vmem>>, vector<1x8x362xbf16>
    %1 = vector.shape_cast %0 : vector<1x8x362xbf16> to vector<8x362xbf16>
    %cst = arith.constant 0.000000e+00 : f32
    %2 = vector.broadcast %cst : f32 to vector<8x324xf32>
    %c0_2 = arith.constant 0 : index
    %c0_3 = arith.constant 0 : index
    %c0_4 = arith.constant 0 : index
    %3 = vector.load %arg2[%c0_2, %c0_3, %c0_4] : memref<9x8x8xbf16, #tpu.memory_space<vmem>>, vector<1x8x8xbf16>
    %4 = vector.shape_cast %3 : vector<1x8x8xbf16> to vector<8x8xbf16>
    %5 = vector.extract_strided_slice %1 {offsets = [0, 0], sizes = [8, 324], strides = [1, 1]} : vector<8x362xbf16> to vector<8x324xbf16>
    %cst_5 = arith.constant dense<0.000000e+00> : vector<8x324xf32>
    %6 = tpu.matmul %4, %5, %cst_5 {dimension_numbers = #tpu.dot_dimension_numbers<[1], [0], [0], [1], [0, 0, 1, 1], [], []>} : vector<8x8xbf16>, vector<8x324xbf16>, vector<8x324xf32> -> vector<8x324xf32>
    %7 = arith.addf %2, %6 : vector<8x324xf32>
    %c1 = arith.constant 1 : index
    %c0_6 = arith.constant 0 : index
    %c0_7 = arith.constant 0 : index
    %8 = vector.load %arg2[%c1, %c0_6, %c0_7] : memref<9x8x8xbf16, #tpu.memory_space<vmem>>, vector<1x8x8xbf16>
    %9 = vector.shape_cast %8 : vector<1x8x8xbf16> to vector<8x8xbf16>
    %10 = vector.extract_strided_slice %1 {offsets = [0, 1], sizes = [8, 324], strides = [1, 1]} : vector<8x362xbf16> to vector<8x324xbf16>
    %cst_8 = arith.constant dense<0.000000e+00> : vector<8x324xf32>
    %11 = tpu.matmul %9, %10, %cst_8 {dimension_numbers = #tpu.dot_dimension_numbers<[1], [0], [0], [1], [0, 0, 1, 1], [], []>} : vector<8x8xbf16>, vector<8x324xbf16>, vector<8x324xf32> -> vector<8x324xf32>
    %12 = arith.addf %7, %11 : vector<8x324xf32>
    %c2 = arith.constant 2 : index
    %c0_9 = arith.constant 0 : index
    %c0_10 = arith.constant 0 : index
    %13 = vector.load %arg2[%c2, %c0_9, %c0_10] : memref<9x8x8xbf16, #tpu.memory_space<vmem>>, vector<1x8x8xbf16>
    %14 = vector.shape_cast %13 : vector<1x8x8xbf16> to vector<8x8xbf16>
    %15 = vector.extract_strided_slice %1 {offsets = [0, 2], sizes = [8, 324], strides = [1, 1]} : vector<8x362xbf16> to vector<8x324xbf16>
    %cst_11 = arith.constant dense<0.000000e+00> : vector<8x324xf32>
    %16 = tpu.matmul %14, %15, %cst_11 {dimension_numbers = #tpu.dot_dimension_numbers<[1], [0], [0], [1], [0, 0, 1, 1], [], []>} : vector<8x8xbf16>, vector<8x324xbf16>, vector<8x324xf32> -> vector<8x324xf32>
    %17 = arith.addf %12, %16 : vector<8x324xf32>
    %c3 = arith.constant 3 : index
    %c0_12 = arith.constant 0 : index
    %c0_13 = arith.constant 0 : index
    %18 = vector.load %arg2[%c3, %c0_12, %c0_13] : memref<9x8x8xbf16, #tpu.memory_space<vmem>>, vector<1x8x8xbf16>
    %19 = vector.shape_cast %18 : vector<1x8x8xbf16> to vector<8x8xbf16>
    %20 = vector.extract_strided_slice %1 {offsets = [0, 18], sizes = [8, 324], strides = [1, 1]} : vector<8x362xbf16> to vector<8x324xbf16>
    %cst_14 = arith.constant dense<0.000000e+00> : vector<8x324xf32>
    %21 = tpu.matmul %19, %20, %cst_14 {dimension_numbers = #tpu.dot_dimension_numbers<[1], [0], [0], [1], [0, 0, 1, 1], [], []>} : vector<8x8xbf16>, vector<8x324xbf16>, vector<8x324xf32> -> vector<8x324xf32>
    %22 = arith.addf %17, %21 : vector<8x324xf32>
    %c4 = arith.constant 4 : index
    %c0_15 = arith.constant 0 : index
    %c0_16 = arith.constant 0 : index
    %23 = vector.load %arg2[%c4, %c0_15, %c0_16] : memref<9x8x8xbf16, #tpu.memory_space<vmem>>, vector<1x8x8xbf16>
    %24 = vector.shape_cast %23 : vector<1x8x8xbf16> to vector<8x8xbf16>
    %25 = vector.extract_strided_slice %1 {offsets = [0, 19], sizes = [8, 324], strides = [1, 1]} : vector<8x362xbf16> to vector<8x324xbf16>
    %cst_17 = arith.constant dense<0.000000e+00> : vector<8x324xf32>
    %26 = tpu.matmul %24, %25, %cst_17 {dimension_numbers = #tpu.dot_dimension_numbers<[1], [0], [0], [1], [0, 0, 1, 1], [], []>} : vector<8x8xbf16>, vector<8x324xbf16>, vector<8x324xf32> -> vector<8x324xf32>
    %27 = arith.addf %22, %26 : vector<8x324xf32>
    %c5 = arith.constant 5 : index
    %c0_18 = arith.constant 0 : index
    %c0_19 = arith.constant 0 : index
    %28 = vector.load %arg2[%c5, %c0_18, %c0_19] : memref<9x8x8xbf16, #tpu.memory_space<vmem>>, vector<1x8x8xbf16>
    %29 = vector.shape_cast %28 : vector<1x8x8xbf16> to vector<8x8xbf16>
    %30 = vector.extract_strided_slice %1 {offsets = [0, 20], sizes = [8, 324], strides = [1, 1]} : vector<8x362xbf16> to vector<8x324xbf16>
    %cst_20 = arith.constant dense<0.000000e+00> : vector<8x324xf32>
    %31 = tpu.matmul %29, %30, %cst_20 {dimension_numbers = #tpu.dot_dimension_numbers<[1], [0], [0], [1], [0, 0, 1, 1], [], []>} : vector<8x8xbf16>, vector<8x324xbf16>, vector<8x324xf32> -> vector<8x324xf32>
    %32 = arith.addf %27, %31 : vector<8x324xf32>
    %c6 = arith.constant 6 : index
    %c0_21 = arith.constant 0 : index
    %c0_22 = arith.constant 0 : index
    %33 = vector.load %arg2[%c6, %c0_21, %c0_22] : memref<9x8x8xbf16, #tpu.memory_space<vmem>>, vector<1x8x8xbf16>
    %34 = vector.shape_cast %33 : vector<1x8x8xbf16> to vector<8x8xbf16>
    %35 = vector.extract_strided_slice %1 {offsets = [0, 36], sizes = [8, 324], strides = [1, 1]} : vector<8x362xbf16> to vector<8x324xbf16>
    %cst_23 = arith.constant dense<0.000000e+00> : vector<8x324xf32>
    %36 = tpu.matmul %34, %35, %cst_23 {dimension_numbers = #tpu.dot_dimension_numbers<[1], [0], [0], [1], [0, 0, 1, 1], [], []>} : vector<8x8xbf16>, vector<8x324xbf16>, vector<8x324xf32> -> vector<8x324xf32>
    %37 = arith.addf %32, %36 : vector<8x324xf32>
    %c7 = arith.constant 7 : index
    %c0_24 = arith.constant 0 : index
    %c0_25 = arith.constant 0 : index
    %38 = vector.load %arg2[%c7, %c0_24, %c0_25] : memref<9x8x8xbf16, #tpu.memory_space<vmem>>, vector<1x8x8xbf16>
    %39 = vector.shape_cast %38 : vector<1x8x8xbf16> to vector<8x8xbf16>
    %40 = vector.extract_strided_slice %1 {offsets = [0, 37], sizes = [8, 324], strides = [1, 1]} : vector<8x362xbf16> to vector<8x324xbf16>
    %cst_26 = arith.constant dense<0.000000e+00> : vector<8x324xf32>
    %41 = tpu.matmul %39, %40, %cst_26 {dimension_numbers = #tpu.dot_dimension_numbers<[1], [0], [0], [1], [0, 0, 1, 1], [], []>} : vector<8x8xbf16>, vector<8x324xbf16>, vector<8x324xf32> -> vector<8x324xf32>
    %42 = arith.addf %37, %41 : vector<8x324xf32>
    %c8 = arith.constant 8 : index
    %c0_27 = arith.constant 0 : index
    %c0_28 = arith.constant 0 : index
    %43 = vector.load %arg2[%c8, %c0_27, %c0_28] : memref<9x8x8xbf16, #tpu.memory_space<vmem>>, vector<1x8x8xbf16>
    %44 = vector.shape_cast %43 : vector<1x8x8xbf16> to vector<8x8xbf16>
    %45 = vector.extract_strided_slice %1 {offsets = [0, 38], sizes = [8, 324], strides = [1, 1]} : vector<8x362xbf16> to vector<8x324xbf16>
    %cst_29 = arith.constant dense<0.000000e+00> : vector<8x324xf32>
    %46 = tpu.matmul %44, %45, %cst_29 {dimension_numbers = #tpu.dot_dimension_numbers<[1], [0], [0], [1], [0, 0, 1, 1], [], []>} : vector<8x8xbf16>, vector<8x324xbf16>, vector<8x324xf32> -> vector<8x324xf32>
    %47 = arith.addf %42, %46 : vector<8x324xf32>
    %c0_i32 = arith.constant 0 : i32
    %48 = arith.cmpi eq, %arg0, %c0_i32 : i32
    %c0_i32_30 = arith.constant 0 : i32
    %49 = arith.cmpi eq, %arg1, %c0_i32_30 : i32
    %50 = arith.andi %48, %49 : i1
    %51 = arith.extui %50 : i1 to i32
    %c0_i32_31 = arith.constant 0 : i32
    %52 = arith.cmpi ne, %51, %c0_i32_31 : i32
    scf.if %52 {
      %cst_38 = arith.constant 0.000000e+00 : f32
      %64 = vector.broadcast %cst_38 : f32 to vector<8x1xf32>
      %c0_39 = arith.constant 0 : index
      %c0_40 = arith.constant 0 : index
      %65 = vector.load %arg8[%c0_39, %c0_40] : memref<8x1xf32, #tpu.memory_space<vmem>>, vector<8x1xf32>
      tpu.vector_store %arg8[%c0_39, %c0_40], %64 {strides = array<i32>} : memref<8x1xf32, #tpu.memory_space<vmem>>, vector<8x1xf32>,
      %cst_41 = arith.constant 0.000000e+00 : f32
      %66 = vector.broadcast %cst_41 : f32 to vector<8x1xf32>
      %c0_42 = arith.constant 0 : index
      %c0_43 = arith.constant 0 : index
      %67 = vector.load %arg9[%c0_42, %c0_43] : memref<8x1xf32, #tpu.memory_space<vmem>>, vector<8x1xf32>
      tpu.vector_store %arg9[%c0_42, %c0_43], %66 {strides = array<i32>} : memref<8x1xf32, #tpu.memory_space<vmem>>, vector<8x1xf32>,
    } else {
    }
    %c0_i32_32 = arith.constant 0 : i32
    %53 = arith.cmpi eq, %arg0, %c0_i32_32 : i32
    %54 = arith.extui %53 : i1 to i32
    %c0_i32_33 = arith.constant 0 : i32
    %55 = arith.cmpi ne, %54, %c0_i32_33 : i32
    scf.if %55 {
      %c0_38 = arith.constant 0 : index
      %c0_39 = arith.constant 0 : index
      %64 = vector.load %arg6[%c0_38, %c0_39] : memref<1x324xf32, #tpu.memory_space<vmem>>, vector<1x324xf32>
      %65 = vector.broadcast %64 : vector<1x324xf32> to vector<8x324xf32>
      %66 = arith.mulf %47, %65 : vector<8x324xf32>
      %c0_40 = arith.constant 0 : index
      %c0_41 = arith.constant 0 : index
      %67 = vector.load %arg8[%c0_40, %c0_41] : memref<8x1xf32, #tpu.memory_space<vmem>>, vector<8x1xf32>
      %cst_42 = arith.constant dense<0.000000e+00> : vector<8xf32>
      %68 = vector.multi_reduction <add>, %66, %cst_42 [1] : vector<8x324xf32> to vector<8xf32>
      %69 = vector.shape_cast %68 : vector<8xf32> to vector<8x1xf32>
      %70 = arith.addf %67, %69 : vector<8x1xf32>
      %c0_43 = arith.constant 0 : index
      %c0_44 = arith.constant 0 : index
      %71 = vector.load %arg8[%c0_43, %c0_44] : memref<8x1xf32, #tpu.memory_space<vmem>>, vector<8x1xf32>
      tpu.vector_store %arg8[%c0_43, %c0_44], %70 {strides = array<i32>} : memref<8x1xf32, #tpu.memory_space<vmem>>, vector<8x1xf32>,
      %c0_45 = arith.constant 0 : index
      %c0_46 = arith.constant 0 : index
      %72 = vector.load %arg9[%c0_45, %c0_46] : memref<8x1xf32, #tpu.memory_space<vmem>>, vector<8x1xf32>
      %73 = arith.mulf %47, %66 : vector<8x324xf32>
      %cst_47 = arith.constant dense<0.000000e+00> : vector<8xf32>
      %74 = vector.multi_reduction <add>, %73, %cst_47 [1] : vector<8x324xf32> to vector<8xf32>
      %75 = vector.shape_cast %74 : vector<8xf32> to vector<8x1xf32>
      %76 = arith.addf %72, %75 : vector<8x1xf32>
      %c0_48 = arith.constant 0 : index
      %c0_49 = arith.constant 0 : index
      %77 = vector.load %arg9[%c0_48, %c0_49] : memref<8x1xf32, #tpu.memory_space<vmem>>, vector<8x1xf32>
      tpu.vector_store %arg9[%c0_48, %c0_49], %76 {strides = array<i32>} : memref<8x1xf32, #tpu.memory_space<vmem>>, vector<8x1xf32>,
    } else {
    }
    %c0_i32_34 = arith.constant 0 : i32
    %56 = arith.cmpi eq, %arg0, %c0_i32_34 : i32
    %c1_i32 = arith.constant 1 : i32
    %57 = arith.cmpi eq, %arg1, %c1_i32 : i32
    %58 = arith.andi %56, %57 : i1
    %59 = arith.extui %58 : i1 to i32
    %c0_i32_35 = arith.constant 0 : i32
    %60 = arith.cmpi ne, %59, %c0_i32_35 : i32
    scf.if %60 {
      %c0_38 = arith.constant 0 : index
      %c0_39 = arith.constant 0 : index
      %64 = vector.load %arg8[%c0_38, %c0_39] : memref<8x1xf32, #tpu.memory_space<vmem>>, vector<8x1xf32>
      %cst_40 = arith.constant 7.812500e-03 : f32
      %65 = vector.broadcast %cst_40 : f32 to vector<8x1xf32>
      %66 = arith.mulf %64, %65 : vector<8x1xf32>
      %c0_41 = arith.constant 0 : index
      %c0_42 = arith.constant 0 : index
      %67 = vector.load %arg9[%c0_41, %c0_42] : memref<8x1xf32, #tpu.memory_space<vmem>>, vector<8x1xf32>
      %cst_43 = arith.constant 7.812500e-03 : f32
      %68 = vector.broadcast %cst_43 : f32 to vector<8x1xf32>
      %69 = arith.mulf %67, %68 : vector<8x1xf32>
      %70 = arith.mulf %66, %66 : vector<8x1xf32>
      %71 = arith.subf %69, %70 : vector<8x1xf32>
      %c0_44 = arith.constant 0 : index
      %c0_45 = arith.constant 0 : index
      %72 = vector.load %arg4[%c0_44, %c0_45] : memref<8x1xf32, #tpu.memory_space<vmem>>, vector<8x1xf32>
      %cst_46 = arith.constant 9.99999974E-6 : f32
      %73 = vector.broadcast %cst_46 : f32 to vector<8x1xf32>
      %74 = arith.addf %71, %73 : vector<8x1xf32>
      %75 = math.rsqrt %74 : vector<8x1xf32>
      %76 = arith.mulf %72, %75 : vector<8x1xf32>
      %c0_47 = arith.constant 0 : index
      %c0_48 = arith.constant 0 : index
      %77 = vector.load %arg10[%c0_47, %c0_48] : memref<8x1xf32, #tpu.memory_space<vmem>>, vector<8x1xf32>
      tpu.vector_store %arg10[%c0_47, %c0_48], %76 {strides = array<i32>} : memref<8x1xf32, #tpu.memory_space<vmem>>, vector<8x1xf32>,
      %c0_49 = arith.constant 0 : index
      %c0_50 = arith.constant 0 : index
      %78 = vector.load %arg5[%c0_49, %c0_50] : memref<8x1xf32, #tpu.memory_space<vmem>>, vector<8x1xf32>
      %79 = arith.mulf %66, %76 : vector<8x1xf32>
      %80 = arith.subf %78, %79 : vector<8x1xf32>
      %c0_51 = arith.constant 0 : index
      %c0_52 = arith.constant 0 : index
      %81 = vector.load %arg11[%c0_51, %c0_52] : memref<8x1xf32, #tpu.memory_space<vmem>>, vector<8x1xf32>
      tpu.vector_store %arg11[%c0_51, %c0_52], %80 {strides = array<i32>} : memref<8x1xf32, #tpu.memory_space<vmem>>, vector<8x1xf32>,
    } else {
    }
    %c1_i32_36 = arith.constant 1 : i32
    %61 = arith.cmpi eq, %arg0, %c1_i32_36 : i32
    %62 = arith.extui %61 : i1 to i32
    %c0_i32_37 = arith.constant 0 : i32
    %63 = arith.cmpi ne, %62, %c0_i32_37 : i32
    scf.if %63 {
      %c0_38 = arith.constant 0 : index
      %c0_39 = arith.constant 0 : index
      %64 = vector.load %arg10[%c0_38, %c0_39] : memref<8x1xf32, #tpu.memory_space<vmem>>, vector<8x1xf32>
      %65 = vector.broadcast %64 : vector<8x1xf32> to vector<8x324xf32>
      %66 = arith.mulf %47, %65 : vector<8x324xf32>
      %c0_40 = arith.constant 0 : index
      %c0_41 = arith.constant 0 : index
      %67 = vector.load %arg11[%c0_40, %c0_41] : memref<8x1xf32, #tpu.memory_space<vmem>>, vector<8x1xf32>
      %68 = vector.broadcast %67 : vector<8x1xf32> to vector<8x324xf32>
      %69 = arith.addf %66, %68 : vector<8x324xf32>
      %cst_42 = arith.constant 0.000000e+00 : f32
      %70 = vector.broadcast %cst_42 : f32 to vector<8x324xf32>
      %71 = arith.maximumf %69, %70 : vector<8x324xf32>
      %c0_43 = arith.constant 0 : index
      %c0_44 = arith.constant 0 : index
      %c0_45 = arith.constant 0 : index
      %72 = vector.load %arg7[%c0_43, %c0_44, %c0_45] : memref<1x8x324xf32, #tpu.memory_space<vmem>>, vector<1x8x324xf32>
      %73 = vector.shape_cast %72 : vector<1x8x324xf32> to vector<8x324xf32>
      %74 = vector.shape_cast %71 : vector<8x324xf32> to vector<1x8x324xf32>
      tpu.vector_store %arg7[%c0_43, %c0_44, %c0_45], %74 {strides = array<i32>} : memref<1x8x324xf32, #tpu.memory_space<vmem>>, vector<1x8x324xf32>,
    } else {
    }
    return
  }
  func.func @transform_0(%arg0: i32, %arg1: i32) -> (i32, i32, i32) {
    %c0_i32 = arith.constant 0 : i32
    %c0_i32_0 = arith.constant 0 : i32
    %c0_i32_1 = arith.constant 0 : i32
    %c0_i32_2 = arith.constant 0 : i32
    return %c0_i32, %c0_i32_0, %c0_i32_1 : i32, i32, i32
  }
  func.func @transform_1(%arg0: i32, %arg1: i32) -> (i32, i32, i32) {
    %c0_i32 = arith.constant 0 : i32
    %c0_i32_0 = arith.constant 0 : i32
    %c0_i32_1 = arith.constant 0 : i32
    return %arg1, %c0_i32, %c0_i32_0 : i32, i32, i32
  }
  func.func @transform_2(%arg0: i32, %arg1: i32) -> (i32, i32) {
    %c0_i32 = arith.constant 0 : i32
    %c0_i32_0 = arith.constant 0 : i32
    %c0_i32_1 = arith.constant 0 : i32
    return %c0_i32, %c0_i32_0 : i32, i32
  }
  func.func @transform_3(%arg0: i32, %arg1: i32) -> (i32, i32) {
    %c0_i32 = arith.constant 0 : i32
    %c0_i32_0 = arith.constant 0 : i32
    %c0_i32_1 = arith.constant 0 : i32
    return %c0_i32, %c0_i32_0 : i32, i32
  }
  func.func @transform_4(%arg0: i32, %arg1: i32) -> (i32, i32) {
    %c0_i32 = arith.constant 0 : i32
    %c0_i32_0 = arith.constant 0 : i32
    %c0_i32_1 = arith.constant 0 : i32
    return %c0_i32, %c0_i32_0 : i32, i32
  }
  func.func @transform_5(%arg0: i32, %arg1: i32) -> (i32, i32, i32) {
    %c0_i32 = arith.constant 0 : i32
    %c0_i32_0 = arith.constant 0 : i32
    %c0_i32_1 = arith.constant 0 : i32
    return %arg1, %c0_i32, %c0_i32_0 : i32, i32, i32
  }
}

module attributes {stable_mosaic.version = 11 : i64} {
  func.func @_cna_kernel(%arg0: i32, %arg1: i32, %arg2: memref<9x32x8xbf16, #tpu.memory_space<vmem>>, %arg3: memref<1x8x362xbf16, #tpu.memory_space<vmem>>, %arg4: memref<32x1xf32, #tpu.memory_space<vmem>>, %arg5: memref<32x1xf32, #tpu.memory_space<vmem>>, %arg6: memref<1x324xf32, #tpu.memory_space<vmem>>, %arg7: memref<1x32x324xf32, #tpu.memory_space<vmem>>, %arg8: memref<32x1xf32, #tpu.memory_space<vmem>>, %arg9: memref<32x1xf32, #tpu.memory_space<vmem>>, %arg10: memref<32x1xf32, #tpu.memory_space<vmem>>, %arg11: memref<32x1xf32, #tpu.memory_space<vmem>>) attributes {dimension_semantics = [#tpu.dimension_semantics<arbitrary>, #tpu.dimension_semantics<arbitrary>], iteration_bounds = array<i64: 2, 2>, scalar_prefetch = 0 : i64, scratch_operands = 4 : i64, tpu.core_type = #tpu.core_type<tc>, window_params = [{pipeline_mode = #tpu.pipeline_mode<synchronous>, transform_indices = @transform_0, window_bounds = array<i64: 9, 32, 8>}, {transform_indices = @transform_1, window_bounds = array<i64: 1, 8, 362>}, {pipeline_mode = #tpu.pipeline_mode<synchronous>, transform_indices = @transform_2, window_bounds = array<i64: 32, 1>}, {pipeline_mode = #tpu.pipeline_mode<synchronous>, transform_indices = @transform_3, window_bounds = array<i64: 32, 1>}, {pipeline_mode = #tpu.pipeline_mode<synchronous>, transform_indices = @transform_4, window_bounds = array<i64: 1, 324>}, {transform_indices = @transform_5, window_bounds = array<i64: 1, 32, 324>}]} {
    %c0 = arith.constant 0 : index
    %c0_0 = arith.constant 0 : index
    %c0_1 = arith.constant 0 : index
    %0 = vector.load %arg3[%c0, %c0_0, %c0_1] : memref<1x8x362xbf16, #tpu.memory_space<vmem>>, vector<1x8x362xbf16>
    %1 = vector.shape_cast %0 : vector<1x8x362xbf16> to vector<8x362xbf16>
    %cst = arith.constant 0.000000e+00 : f32
    %2 = vector.broadcast %cst : f32 to vector<32x324xf32>
    %c0_2 = arith.constant 0 : index
    %c0_3 = arith.constant 0 : index
    %c0_4 = arith.constant 0 : index
    %3 = vector.load %arg2[%c0_2, %c0_3, %c0_4] : memref<9x32x8xbf16, #tpu.memory_space<vmem>>, vector<1x32x8xbf16>
    %4 = vector.shape_cast %3 : vector<1x32x8xbf16> to vector<32x8xbf16>
    %5 = vector.extract_strided_slice %1 {offsets = [0, 0], sizes = [8, 324], strides = [1, 1]} : vector<8x362xbf16> to vector<8x324xbf16>
    %cst_5 = arith.constant dense<0.000000e+00> : vector<32x324xf32>
    %6 = tpu.matmul %4, %5, %cst_5 {dimension_numbers = #tpu.dot_dimension_numbers<[1], [0], [0], [1], [0, 0, 1, 1], [], []>} : vector<32x8xbf16>, vector<8x324xbf16>, vector<32x324xf32> -> vector<32x324xf32>
    %7 = arith.addf %2, %6 : vector<32x324xf32>
    %c1 = arith.constant 1 : index
    %c0_6 = arith.constant 0 : index
    %c0_7 = arith.constant 0 : index
    %8 = vector.load %arg2[%c1, %c0_6, %c0_7] : memref<9x32x8xbf16, #tpu.memory_space<vmem>>, vector<1x32x8xbf16>
    %9 = vector.shape_cast %8 : vector<1x32x8xbf16> to vector<32x8xbf16>
    %10 = vector.extract_strided_slice %1 {offsets = [0, 1], sizes = [8, 324], strides = [1, 1]} : vector<8x362xbf16> to vector<8x324xbf16>
    %cst_8 = arith.constant dense<0.000000e+00> : vector<32x324xf32>
    %11 = tpu.matmul %9, %10, %cst_8 {dimension_numbers = #tpu.dot_dimension_numbers<[1], [0], [0], [1], [0, 0, 1, 1], [], []>} : vector<32x8xbf16>, vector<8x324xbf16>, vector<32x324xf32> -> vector<32x324xf32>
    %12 = arith.addf %7, %11 : vector<32x324xf32>
    %c2 = arith.constant 2 : index
    %c0_9 = arith.constant 0 : index
    %c0_10 = arith.constant 0 : index
    %13 = vector.load %arg2[%c2, %c0_9, %c0_10] : memref<9x32x8xbf16, #tpu.memory_space<vmem>>, vector<1x32x8xbf16>
    %14 = vector.shape_cast %13 : vector<1x32x8xbf16> to vector<32x8xbf16>
    %15 = vector.extract_strided_slice %1 {offsets = [0, 2], sizes = [8, 324], strides = [1, 1]} : vector<8x362xbf16> to vector<8x324xbf16>
    %cst_11 = arith.constant dense<0.000000e+00> : vector<32x324xf32>
    %16 = tpu.matmul %14, %15, %cst_11 {dimension_numbers = #tpu.dot_dimension_numbers<[1], [0], [0], [1], [0, 0, 1, 1], [], []>} : vector<32x8xbf16>, vector<8x324xbf16>, vector<32x324xf32> -> vector<32x324xf32>
    %17 = arith.addf %12, %16 : vector<32x324xf32>
    %c3 = arith.constant 3 : index
    %c0_12 = arith.constant 0 : index
    %c0_13 = arith.constant 0 : index
    %18 = vector.load %arg2[%c3, %c0_12, %c0_13] : memref<9x32x8xbf16, #tpu.memory_space<vmem>>, vector<1x32x8xbf16>
    %19 = vector.shape_cast %18 : vector<1x32x8xbf16> to vector<32x8xbf16>
    %20 = vector.extract_strided_slice %1 {offsets = [0, 18], sizes = [8, 324], strides = [1, 1]} : vector<8x362xbf16> to vector<8x324xbf16>
    %cst_14 = arith.constant dense<0.000000e+00> : vector<32x324xf32>
    %21 = tpu.matmul %19, %20, %cst_14 {dimension_numbers = #tpu.dot_dimension_numbers<[1], [0], [0], [1], [0, 0, 1, 1], [], []>} : vector<32x8xbf16>, vector<8x324xbf16>, vector<32x324xf32> -> vector<32x324xf32>
    %22 = arith.addf %17, %21 : vector<32x324xf32>
    %c4 = arith.constant 4 : index
    %c0_15 = arith.constant 0 : index
    %c0_16 = arith.constant 0 : index
    %23 = vector.load %arg2[%c4, %c0_15, %c0_16] : memref<9x32x8xbf16, #tpu.memory_space<vmem>>, vector<1x32x8xbf16>
    %24 = vector.shape_cast %23 : vector<1x32x8xbf16> to vector<32x8xbf16>
    %25 = vector.extract_strided_slice %1 {offsets = [0, 19], sizes = [8, 324], strides = [1, 1]} : vector<8x362xbf16> to vector<8x324xbf16>
    %cst_17 = arith.constant dense<0.000000e+00> : vector<32x324xf32>
    %26 = tpu.matmul %24, %25, %cst_17 {dimension_numbers = #tpu.dot_dimension_numbers<[1], [0], [0], [1], [0, 0, 1, 1], [], []>} : vector<32x8xbf16>, vector<8x324xbf16>, vector<32x324xf32> -> vector<32x324xf32>
    %27 = arith.addf %22, %26 : vector<32x324xf32>
    %c5 = arith.constant 5 : index
    %c0_18 = arith.constant 0 : index
    %c0_19 = arith.constant 0 : index
    %28 = vector.load %arg2[%c5, %c0_18, %c0_19] : memref<9x32x8xbf16, #tpu.memory_space<vmem>>, vector<1x32x8xbf16>
    %29 = vector.shape_cast %28 : vector<1x32x8xbf16> to vector<32x8xbf16>
    %30 = vector.extract_strided_slice %1 {offsets = [0, 20], sizes = [8, 324], strides = [1, 1]} : vector<8x362xbf16> to vector<8x324xbf16>
    %cst_20 = arith.constant dense<0.000000e+00> : vector<32x324xf32>
    %31 = tpu.matmul %29, %30, %cst_20 {dimension_numbers = #tpu.dot_dimension_numbers<[1], [0], [0], [1], [0, 0, 1, 1], [], []>} : vector<32x8xbf16>, vector<8x324xbf16>, vector<32x324xf32> -> vector<32x324xf32>
    %32 = arith.addf %27, %31 : vector<32x324xf32>
    %c6 = arith.constant 6 : index
    %c0_21 = arith.constant 0 : index
    %c0_22 = arith.constant 0 : index
    %33 = vector.load %arg2[%c6, %c0_21, %c0_22] : memref<9x32x8xbf16, #tpu.memory_space<vmem>>, vector<1x32x8xbf16>
    %34 = vector.shape_cast %33 : vector<1x32x8xbf16> to vector<32x8xbf16>
    %35 = vector.extract_strided_slice %1 {offsets = [0, 36], sizes = [8, 324], strides = [1, 1]} : vector<8x362xbf16> to vector<8x324xbf16>
    %cst_23 = arith.constant dense<0.000000e+00> : vector<32x324xf32>
    %36 = tpu.matmul %34, %35, %cst_23 {dimension_numbers = #tpu.dot_dimension_numbers<[1], [0], [0], [1], [0, 0, 1, 1], [], []>} : vector<32x8xbf16>, vector<8x324xbf16>, vector<32x324xf32> -> vector<32x324xf32>
    %37 = arith.addf %32, %36 : vector<32x324xf32>
    %c7 = arith.constant 7 : index
    %c0_24 = arith.constant 0 : index
    %c0_25 = arith.constant 0 : index
    %38 = vector.load %arg2[%c7, %c0_24, %c0_25] : memref<9x32x8xbf16, #tpu.memory_space<vmem>>, vector<1x32x8xbf16>
    %39 = vector.shape_cast %38 : vector<1x32x8xbf16> to vector<32x8xbf16>
    %40 = vector.extract_strided_slice %1 {offsets = [0, 37], sizes = [8, 324], strides = [1, 1]} : vector<8x362xbf16> to vector<8x324xbf16>
    %cst_26 = arith.constant dense<0.000000e+00> : vector<32x324xf32>
    %41 = tpu.matmul %39, %40, %cst_26 {dimension_numbers = #tpu.dot_dimension_numbers<[1], [0], [0], [1], [0, 0, 1, 1], [], []>} : vector<32x8xbf16>, vector<8x324xbf16>, vector<32x324xf32> -> vector<32x324xf32>
    %42 = arith.addf %37, %41 : vector<32x324xf32>
    %c8 = arith.constant 8 : index
    %c0_27 = arith.constant 0 : index
    %c0_28 = arith.constant 0 : index
    %43 = vector.load %arg2[%c8, %c0_27, %c0_28] : memref<9x32x8xbf16, #tpu.memory_space<vmem>>, vector<1x32x8xbf16>
    %44 = vector.shape_cast %43 : vector<1x32x8xbf16> to vector<32x8xbf16>
    %45 = vector.extract_strided_slice %1 {offsets = [0, 38], sizes = [8, 324], strides = [1, 1]} : vector<8x362xbf16> to vector<8x324xbf16>
    %cst_29 = arith.constant dense<0.000000e+00> : vector<32x324xf32>
    %46 = tpu.matmul %44, %45, %cst_29 {dimension_numbers = #tpu.dot_dimension_numbers<[1], [0], [0], [1], [0, 0, 1, 1], [], []>} : vector<32x8xbf16>, vector<8x324xbf16>, vector<32x324xf32> -> vector<32x324xf32>
    %47 = arith.addf %42, %46 : vector<32x324xf32>
    %c0_i32 = arith.constant 0 : i32
    %48 = arith.cmpi eq, %arg0, %c0_i32 : i32
    %c0_i32_30 = arith.constant 0 : i32
    %49 = arith.cmpi eq, %arg1, %c0_i32_30 : i32
    %50 = arith.andi %48, %49 : i1
    %51 = arith.extui %50 : i1 to i32
    %c0_i32_31 = arith.constant 0 : i32
    %52 = arith.cmpi ne, %51, %c0_i32_31 : i32
    scf.if %52 {
      %cst_38 = arith.constant 0.000000e+00 : f32
      %64 = vector.broadcast %cst_38 : f32 to vector<32x1xf32>
      %c0_39 = arith.constant 0 : index
      %c0_40 = arith.constant 0 : index
      %65 = vector.load %arg8[%c0_39, %c0_40] : memref<32x1xf32, #tpu.memory_space<vmem>>, vector<32x1xf32>
      tpu.vector_store %arg8[%c0_39, %c0_40], %64 {strides = array<i32>} : memref<32x1xf32, #tpu.memory_space<vmem>>, vector<32x1xf32>,
      %cst_41 = arith.constant 0.000000e+00 : f32
      %66 = vector.broadcast %cst_41 : f32 to vector<32x1xf32>
      %c0_42 = arith.constant 0 : index
      %c0_43 = arith.constant 0 : index
      %67 = vector.load %arg9[%c0_42, %c0_43] : memref<32x1xf32, #tpu.memory_space<vmem>>, vector<32x1xf32>
      tpu.vector_store %arg9[%c0_42, %c0_43], %66 {strides = array<i32>} : memref<32x1xf32, #tpu.memory_space<vmem>>, vector<32x1xf32>,
    } else {
    }
    %c0_i32_32 = arith.constant 0 : i32
    %53 = arith.cmpi eq, %arg0, %c0_i32_32 : i32
    %54 = arith.extui %53 : i1 to i32
    %c0_i32_33 = arith.constant 0 : i32
    %55 = arith.cmpi ne, %54, %c0_i32_33 : i32
    scf.if %55 {
      %c0_38 = arith.constant 0 : index
      %c0_39 = arith.constant 0 : index
      %64 = vector.load %arg6[%c0_38, %c0_39] : memref<1x324xf32, #tpu.memory_space<vmem>>, vector<1x324xf32>
      %65 = vector.broadcast %64 : vector<1x324xf32> to vector<32x324xf32>
      %66 = arith.mulf %47, %65 : vector<32x324xf32>
      %c0_40 = arith.constant 0 : index
      %c0_41 = arith.constant 0 : index
      %67 = vector.load %arg8[%c0_40, %c0_41] : memref<32x1xf32, #tpu.memory_space<vmem>>, vector<32x1xf32>
      %cst_42 = arith.constant dense<0.000000e+00> : vector<32xf32>
      %68 = vector.multi_reduction <add>, %66, %cst_42 [1] : vector<32x324xf32> to vector<32xf32>
      %69 = vector.shape_cast %68 : vector<32xf32> to vector<32x1xf32>
      %70 = arith.addf %67, %69 : vector<32x1xf32>
      %c0_43 = arith.constant 0 : index
      %c0_44 = arith.constant 0 : index
      %71 = vector.load %arg8[%c0_43, %c0_44] : memref<32x1xf32, #tpu.memory_space<vmem>>, vector<32x1xf32>
      tpu.vector_store %arg8[%c0_43, %c0_44], %70 {strides = array<i32>} : memref<32x1xf32, #tpu.memory_space<vmem>>, vector<32x1xf32>,
      %c0_45 = arith.constant 0 : index
      %c0_46 = arith.constant 0 : index
      %72 = vector.load %arg9[%c0_45, %c0_46] : memref<32x1xf32, #tpu.memory_space<vmem>>, vector<32x1xf32>
      %73 = arith.mulf %47, %66 : vector<32x324xf32>
      %cst_47 = arith.constant dense<0.000000e+00> : vector<32xf32>
      %74 = vector.multi_reduction <add>, %73, %cst_47 [1] : vector<32x324xf32> to vector<32xf32>
      %75 = vector.shape_cast %74 : vector<32xf32> to vector<32x1xf32>
      %76 = arith.addf %72, %75 : vector<32x1xf32>
      %c0_48 = arith.constant 0 : index
      %c0_49 = arith.constant 0 : index
      %77 = vector.load %arg9[%c0_48, %c0_49] : memref<32x1xf32, #tpu.memory_space<vmem>>, vector<32x1xf32>
      tpu.vector_store %arg9[%c0_48, %c0_49], %76 {strides = array<i32>} : memref<32x1xf32, #tpu.memory_space<vmem>>, vector<32x1xf32>,
    } else {
    }
    %c0_i32_34 = arith.constant 0 : i32
    %56 = arith.cmpi eq, %arg0, %c0_i32_34 : i32
    %c1_i32 = arith.constant 1 : i32
    %57 = arith.cmpi eq, %arg1, %c1_i32 : i32
    %58 = arith.andi %56, %57 : i1
    %59 = arith.extui %58 : i1 to i32
    %c0_i32_35 = arith.constant 0 : i32
    %60 = arith.cmpi ne, %59, %c0_i32_35 : i32
    scf.if %60 {
      %c0_38 = arith.constant 0 : index
      %c0_39 = arith.constant 0 : index
      %64 = vector.load %arg8[%c0_38, %c0_39] : memref<32x1xf32, #tpu.memory_space<vmem>>, vector<32x1xf32>
      %cst_40 = arith.constant 7.812500e-03 : f32
      %65 = vector.broadcast %cst_40 : f32 to vector<32x1xf32>
      %66 = arith.mulf %64, %65 : vector<32x1xf32>
      %c0_41 = arith.constant 0 : index
      %c0_42 = arith.constant 0 : index
      %67 = vector.load %arg9[%c0_41, %c0_42] : memref<32x1xf32, #tpu.memory_space<vmem>>, vector<32x1xf32>
      %cst_43 = arith.constant 7.812500e-03 : f32
      %68 = vector.broadcast %cst_43 : f32 to vector<32x1xf32>
      %69 = arith.mulf %67, %68 : vector<32x1xf32>
      %70 = arith.mulf %66, %66 : vector<32x1xf32>
      %71 = arith.subf %69, %70 : vector<32x1xf32>
      %c0_44 = arith.constant 0 : index
      %c0_45 = arith.constant 0 : index
      %72 = vector.load %arg4[%c0_44, %c0_45] : memref<32x1xf32, #tpu.memory_space<vmem>>, vector<32x1xf32>
      %cst_46 = arith.constant 9.99999974E-6 : f32
      %73 = vector.broadcast %cst_46 : f32 to vector<32x1xf32>
      %74 = arith.addf %71, %73 : vector<32x1xf32>
      %75 = math.rsqrt %74 : vector<32x1xf32>
      %76 = arith.mulf %72, %75 : vector<32x1xf32>
      %c0_47 = arith.constant 0 : index
      %c0_48 = arith.constant 0 : index
      %77 = vector.load %arg10[%c0_47, %c0_48] : memref<32x1xf32, #tpu.memory_space<vmem>>, vector<32x1xf32>
      tpu.vector_store %arg10[%c0_47, %c0_48], %76 {strides = array<i32>} : memref<32x1xf32, #tpu.memory_space<vmem>>, vector<32x1xf32>,
      %c0_49 = arith.constant 0 : index
      %c0_50 = arith.constant 0 : index
      %78 = vector.load %arg5[%c0_49, %c0_50] : memref<32x1xf32, #tpu.memory_space<vmem>>, vector<32x1xf32>
      %79 = arith.mulf %66, %76 : vector<32x1xf32>
      %80 = arith.subf %78, %79 : vector<32x1xf32>
      %c0_51 = arith.constant 0 : index
      %c0_52 = arith.constant 0 : index
      %81 = vector.load %arg11[%c0_51, %c0_52] : memref<32x1xf32, #tpu.memory_space<vmem>>, vector<32x1xf32>
      tpu.vector_store %arg11[%c0_51, %c0_52], %80 {strides = array<i32>} : memref<32x1xf32, #tpu.memory_space<vmem>>, vector<32x1xf32>,
    } else {
    }
    %c1_i32_36 = arith.constant 1 : i32
    %61 = arith.cmpi eq, %arg0, %c1_i32_36 : i32
    %62 = arith.extui %61 : i1 to i32
    %c0_i32_37 = arith.constant 0 : i32
    %63 = arith.cmpi ne, %62, %c0_i32_37 : i32
    scf.if %63 {
      %c0_38 = arith.constant 0 : index
      %c0_39 = arith.constant 0 : index
      %64 = vector.load %arg10[%c0_38, %c0_39] : memref<32x1xf32, #tpu.memory_space<vmem>>, vector<32x1xf32>
      %65 = vector.broadcast %64 : vector<32x1xf32> to vector<32x324xf32>
      %66 = arith.mulf %47, %65 : vector<32x324xf32>
      %c0_40 = arith.constant 0 : index
      %c0_41 = arith.constant 0 : index
      %67 = vector.load %arg11[%c0_40, %c0_41] : memref<32x1xf32, #tpu.memory_space<vmem>>, vector<32x1xf32>
      %68 = vector.broadcast %67 : vector<32x1xf32> to vector<32x324xf32>
      %69 = arith.addf %66, %68 : vector<32x324xf32>
      %cst_42 = arith.constant 0.000000e+00 : f32
      %70 = vector.broadcast %cst_42 : f32 to vector<32x324xf32>
      %71 = arith.maximumf %69, %70 : vector<32x324xf32>
      %c0_43 = arith.constant 0 : index
      %c0_44 = arith.constant 0 : index
      %c0_45 = arith.constant 0 : index
      %72 = vector.load %arg7[%c0_43, %c0_44, %c0_45] : memref<1x32x324xf32, #tpu.memory_space<vmem>>, vector<1x32x324xf32>
      %73 = vector.shape_cast %72 : vector<1x32x324xf32> to vector<32x324xf32>
      %74 = vector.shape_cast %71 : vector<32x324xf32> to vector<1x32x324xf32>
      tpu.vector_store %arg7[%c0_43, %c0_44, %c0_45], %74 {strides = array<i32>} : memref<1x32x324xf32, #tpu.memory_space<vmem>>, vector<1x32x324xf32>,
    } else {
    }
    return
  }
  func.func @transform_0(%arg0: i32, %arg1: i32) -> (i32, i32, i32) {
    %c0_i32 = arith.constant 0 : i32
    %c0_i32_0 = arith.constant 0 : i32
    %c0_i32_1 = arith.constant 0 : i32
    %c0_i32_2 = arith.constant 0 : i32
    return %c0_i32, %c0_i32_0, %c0_i32_1 : i32, i32, i32
  }
  func.func @transform_1(%arg0: i32, %arg1: i32) -> (i32, i32, i32) {
    %c0_i32 = arith.constant 0 : i32
    %c0_i32_0 = arith.constant 0 : i32
    %c0_i32_1 = arith.constant 0 : i32
    return %arg1, %c0_i32, %c0_i32_0 : i32, i32, i32
  }
  func.func @transform_2(%arg0: i32, %arg1: i32) -> (i32, i32) {
    %c0_i32 = arith.constant 0 : i32
    %c0_i32_0 = arith.constant 0 : i32
    %c0_i32_1 = arith.constant 0 : i32
    return %c0_i32, %c0_i32_0 : i32, i32
  }
  func.func @transform_3(%arg0: i32, %arg1: i32) -> (i32, i32) {
    %c0_i32 = arith.constant 0 : i32
    %c0_i32_0 = arith.constant 0 : i32
    %c0_i32_1 = arith.constant 0 : i32
    return %c0_i32, %c0_i32_0 : i32, i32
  }
  func.func @transform_4(%arg0: i32, %arg1: i32) -> (i32, i32) {
    %c0_i32 = arith.constant 0 : i32
    %c0_i32_0 = arith.constant 0 : i32
    %c0_i32_1 = arith.constant 0 : i32
    return %c0_i32, %c0_i32_0 : i32, i32
  }
  func.func @transform_5(%arg0: i32, %arg1: i32) -> (i32, i32, i32) {
    %c0_i32 = arith.constant 0 : i32
    %c0_i32_0 = arith.constant 0 : i32
    %c0_i32_1 = arith.constant 0 : i32
    return %arg1, %c0_i32, %c0_i32_0 : i32, i32, i32
  }
}

module attributes {stable_mosaic.version = 11 : i64} {
  func.func @_cna_res_kernel(%arg0: i32, %arg1: i32, %arg2: memref<1x32x8xbf16, #tpu.memory_space<vmem>>, %arg3: memref<1x8x64xbf16, #tpu.memory_space<vmem>>, %arg4: memref<32x1xf32, #tpu.memory_space<vmem>>, %arg5: memref<32x1xf32, #tpu.memory_space<vmem>>, %arg6: memref<1x64xf32, #tpu.memory_space<vmem>>, %arg7: memref<1x32x64xf32, #tpu.memory_space<vmem>>, %arg8: memref<1x32x64xf32, #tpu.memory_space<vmem>>, %arg9: memref<32x1xf32, #tpu.memory_space<vmem>>, %arg10: memref<32x1xf32, #tpu.memory_space<vmem>>, %arg11: memref<32x1xf32, #tpu.memory_space<vmem>>, %arg12: memref<32x1xf32, #tpu.memory_space<vmem>>) attributes {dimension_semantics = [#tpu.dimension_semantics<arbitrary>, #tpu.dimension_semantics<arbitrary>], iteration_bounds = array<i64: 2, 2>, scalar_prefetch = 0 : i64, scratch_operands = 4 : i64, tpu.core_type = #tpu.core_type<tc>, window_params = [{pipeline_mode = #tpu.pipeline_mode<synchronous>, transform_indices = @transform_0, window_bounds = array<i64: 1, 32, 8>}, {transform_indices = @transform_1, window_bounds = array<i64: 1, 8, 64>}, {pipeline_mode = #tpu.pipeline_mode<synchronous>, transform_indices = @transform_2, window_bounds = array<i64: 32, 1>}, {pipeline_mode = #tpu.pipeline_mode<synchronous>, transform_indices = @transform_3, window_bounds = array<i64: 32, 1>}, {pipeline_mode = #tpu.pipeline_mode<synchronous>, transform_indices = @transform_4, window_bounds = array<i64: 1, 64>}, {transform_indices = @transform_5, window_bounds = array<i64: 1, 32, 64>}, {transform_indices = @transform_6, window_bounds = array<i64: 1, 32, 64>}]} {
    %c0 = arith.constant 0 : index
    %c0_0 = arith.constant 0 : index
    %c0_1 = arith.constant 0 : index
    %0 = vector.load %arg3[%c0, %c0_0, %c0_1] : memref<1x8x64xbf16, #tpu.memory_space<vmem>>, vector<1x8x64xbf16>
    %1 = vector.shape_cast %0 : vector<1x8x64xbf16> to vector<8x64xbf16>
    %cst = arith.constant 0.000000e+00 : f32
    %2 = vector.broadcast %cst : f32 to vector<32x64xf32>
    %c0_2 = arith.constant 0 : index
    %c0_3 = arith.constant 0 : index
    %c0_4 = arith.constant 0 : index
    %3 = vector.load %arg2[%c0_2, %c0_3, %c0_4] : memref<1x32x8xbf16, #tpu.memory_space<vmem>>, vector<1x32x8xbf16>
    %4 = vector.shape_cast %3 : vector<1x32x8xbf16> to vector<32x8xbf16>
    %cst_5 = arith.constant dense<0.000000e+00> : vector<32x64xf32>
    %5 = tpu.matmul %4, %1, %cst_5 {dimension_numbers = #tpu.dot_dimension_numbers<[1], [0], [0], [1], [0, 0, 1, 1], [], []>} : vector<32x8xbf16>, vector<8x64xbf16>, vector<32x64xf32> -> vector<32x64xf32>
    %6 = arith.addf %2, %5 : vector<32x64xf32>
    %c0_i32 = arith.constant 0 : i32
    %7 = arith.cmpi eq, %arg0, %c0_i32 : i32
    %c0_i32_6 = arith.constant 0 : i32
    %8 = arith.cmpi eq, %arg1, %c0_i32_6 : i32
    %9 = arith.andi %7, %8 : i1
    %10 = arith.extui %9 : i1 to i32
    %c0_i32_7 = arith.constant 0 : i32
    %11 = arith.cmpi ne, %10, %c0_i32_7 : i32
    scf.if %11 {
      %cst_14 = arith.constant 0.000000e+00 : f32
      %23 = vector.broadcast %cst_14 : f32 to vector<32x1xf32>
      %c0_15 = arith.constant 0 : index
      %c0_16 = arith.constant 0 : index
      %24 = vector.load %arg9[%c0_15, %c0_16] : memref<32x1xf32, #tpu.memory_space<vmem>>, vector<32x1xf32>
      tpu.vector_store %arg9[%c0_15, %c0_16], %23 {strides = array<i32>} : memref<32x1xf32, #tpu.memory_space<vmem>>, vector<32x1xf32>,
      %cst_17 = arith.constant 0.000000e+00 : f32
      %25 = vector.broadcast %cst_17 : f32 to vector<32x1xf32>
      %c0_18 = arith.constant 0 : index
      %c0_19 = arith.constant 0 : index
      %26 = vector.load %arg10[%c0_18, %c0_19] : memref<32x1xf32, #tpu.memory_space<vmem>>, vector<32x1xf32>
      tpu.vector_store %arg10[%c0_18, %c0_19], %25 {strides = array<i32>} : memref<32x1xf32, #tpu.memory_space<vmem>>, vector<32x1xf32>,
    } else {
    }
    %c0_i32_8 = arith.constant 0 : i32
    %12 = arith.cmpi eq, %arg0, %c0_i32_8 : i32
    %13 = arith.extui %12 : i1 to i32
    %c0_i32_9 = arith.constant 0 : i32
    %14 = arith.cmpi ne, %13, %c0_i32_9 : i32
    scf.if %14 {
      %c0_14 = arith.constant 0 : index
      %c0_15 = arith.constant 0 : index
      %23 = vector.load %arg6[%c0_14, %c0_15] : memref<1x64xf32, #tpu.memory_space<vmem>>, vector<1x64xf32>
      %24 = vector.broadcast %23 : vector<1x64xf32> to vector<32x64xf32>
      %25 = arith.mulf %6, %24 : vector<32x64xf32>
      %c0_16 = arith.constant 0 : index
      %c0_17 = arith.constant 0 : index
      %26 = vector.load %arg9[%c0_16, %c0_17] : memref<32x1xf32, #tpu.memory_space<vmem>>, vector<32x1xf32>
      %cst_18 = arith.constant dense<0.000000e+00> : vector<32xf32>
      %27 = vector.multi_reduction <add>, %25, %cst_18 [1] : vector<32x64xf32> to vector<32xf32>
      %28 = vector.shape_cast %27 : vector<32xf32> to vector<32x1xf32>
      %29 = arith.addf %26, %28 : vector<32x1xf32>
      %c0_19 = arith.constant 0 : index
      %c0_20 = arith.constant 0 : index
      %30 = vector.load %arg9[%c0_19, %c0_20] : memref<32x1xf32, #tpu.memory_space<vmem>>, vector<32x1xf32>
      tpu.vector_store %arg9[%c0_19, %c0_20], %29 {strides = array<i32>} : memref<32x1xf32, #tpu.memory_space<vmem>>, vector<32x1xf32>,
      %c0_21 = arith.constant 0 : index
      %c0_22 = arith.constant 0 : index
      %31 = vector.load %arg10[%c0_21, %c0_22] : memref<32x1xf32, #tpu.memory_space<vmem>>, vector<32x1xf32>
      %32 = arith.mulf %6, %25 : vector<32x64xf32>
      %cst_23 = arith.constant dense<0.000000e+00> : vector<32xf32>
      %33 = vector.multi_reduction <add>, %32, %cst_23 [1] : vector<32x64xf32> to vector<32xf32>
      %34 = vector.shape_cast %33 : vector<32xf32> to vector<32x1xf32>
      %35 = arith.addf %31, %34 : vector<32x1xf32>
      %c0_24 = arith.constant 0 : index
      %c0_25 = arith.constant 0 : index
      %36 = vector.load %arg10[%c0_24, %c0_25] : memref<32x1xf32, #tpu.memory_space<vmem>>, vector<32x1xf32>
      tpu.vector_store %arg10[%c0_24, %c0_25], %35 {strides = array<i32>} : memref<32x1xf32, #tpu.memory_space<vmem>>, vector<32x1xf32>,
    } else {
    }
    %c0_i32_10 = arith.constant 0 : i32
    %15 = arith.cmpi eq, %arg0, %c0_i32_10 : i32
    %c1_i32 = arith.constant 1 : i32
    %16 = arith.cmpi eq, %arg1, %c1_i32 : i32
    %17 = arith.andi %15, %16 : i1
    %18 = arith.extui %17 : i1 to i32
    %c0_i32_11 = arith.constant 0 : i32
    %19 = arith.cmpi ne, %18, %c0_i32_11 : i32
    scf.if %19 {
      %c0_14 = arith.constant 0 : index
      %c0_15 = arith.constant 0 : index
      %23 = vector.load %arg9[%c0_14, %c0_15] : memref<32x1xf32, #tpu.memory_space<vmem>>, vector<32x1xf32>
      %cst_16 = arith.constant 7.812500e-03 : f32
      %24 = vector.broadcast %cst_16 : f32 to vector<32x1xf32>
      %25 = arith.mulf %23, %24 : vector<32x1xf32>
      %c0_17 = arith.constant 0 : index
      %c0_18 = arith.constant 0 : index
      %26 = vector.load %arg10[%c0_17, %c0_18] : memref<32x1xf32, #tpu.memory_space<vmem>>, vector<32x1xf32>
      %cst_19 = arith.constant 7.812500e-03 : f32
      %27 = vector.broadcast %cst_19 : f32 to vector<32x1xf32>
      %28 = arith.mulf %26, %27 : vector<32x1xf32>
      %29 = arith.mulf %25, %25 : vector<32x1xf32>
      %30 = arith.subf %28, %29 : vector<32x1xf32>
      %c0_20 = arith.constant 0 : index
      %c0_21 = arith.constant 0 : index
      %31 = vector.load %arg4[%c0_20, %c0_21] : memref<32x1xf32, #tpu.memory_space<vmem>>, vector<32x1xf32>
      %cst_22 = arith.constant 9.99999974E-6 : f32
      %32 = vector.broadcast %cst_22 : f32 to vector<32x1xf32>
      %33 = arith.addf %30, %32 : vector<32x1xf32>
      %34 = math.rsqrt %33 : vector<32x1xf32>
      %35 = arith.mulf %31, %34 : vector<32x1xf32>
      %c0_23 = arith.constant 0 : index
      %c0_24 = arith.constant 0 : index
      %36 = vector.load %arg11[%c0_23, %c0_24] : memref<32x1xf32, #tpu.memory_space<vmem>>, vector<32x1xf32>
      tpu.vector_store %arg11[%c0_23, %c0_24], %35 {strides = array<i32>} : memref<32x1xf32, #tpu.memory_space<vmem>>, vector<32x1xf32>,
      %c0_25 = arith.constant 0 : index
      %c0_26 = arith.constant 0 : index
      %37 = vector.load %arg5[%c0_25, %c0_26] : memref<32x1xf32, #tpu.memory_space<vmem>>, vector<32x1xf32>
      %38 = arith.mulf %25, %35 : vector<32x1xf32>
      %39 = arith.subf %37, %38 : vector<32x1xf32>
      %c0_27 = arith.constant 0 : index
      %c0_28 = arith.constant 0 : index
      %40 = vector.load %arg12[%c0_27, %c0_28] : memref<32x1xf32, #tpu.memory_space<vmem>>, vector<32x1xf32>
      tpu.vector_store %arg12[%c0_27, %c0_28], %39 {strides = array<i32>} : memref<32x1xf32, #tpu.memory_space<vmem>>, vector<32x1xf32>,
    } else {
    }
    %c1_i32_12 = arith.constant 1 : i32
    %20 = arith.cmpi eq, %arg0, %c1_i32_12 : i32
    %21 = arith.extui %20 : i1 to i32
    %c0_i32_13 = arith.constant 0 : i32
    %22 = arith.cmpi ne, %21, %c0_i32_13 : i32
    scf.if %22 {
      %c0_14 = arith.constant 0 : index
      %c0_15 = arith.constant 0 : index
      %23 = vector.load %arg11[%c0_14, %c0_15] : memref<32x1xf32, #tpu.memory_space<vmem>>, vector<32x1xf32>
      %24 = vector.broadcast %23 : vector<32x1xf32> to vector<32x64xf32>
      %25 = arith.mulf %6, %24 : vector<32x64xf32>
      %c0_16 = arith.constant 0 : index
      %c0_17 = arith.constant 0 : index
      %26 = vector.load %arg12[%c0_16, %c0_17] : memref<32x1xf32, #tpu.memory_space<vmem>>, vector<32x1xf32>
      %27 = vector.broadcast %26 : vector<32x1xf32> to vector<32x64xf32>
      %28 = arith.addf %25, %27 : vector<32x64xf32>
      %cst_18 = arith.constant 0.000000e+00 : f32
      %29 = vector.broadcast %cst_18 : f32 to vector<32x64xf32>
      %30 = arith.maximumf %28, %29 : vector<32x64xf32>
      %c0_19 = arith.constant 0 : index
      %c0_20 = arith.constant 0 : index
      %c0_21 = arith.constant 0 : index
      %31 = vector.load %arg7[%c0_19, %c0_20, %c0_21] : memref<1x32x64xf32, #tpu.memory_space<vmem>>, vector<1x32x64xf32>
      %32 = vector.shape_cast %31 : vector<1x32x64xf32> to vector<32x64xf32>
      %33 = arith.addf %30, %32 : vector<32x64xf32>
      %c0_22 = arith.constant 0 : index
      %c0_23 = arith.constant 0 : index
      %c0_24 = arith.constant 0 : index
      %34 = vector.load %arg8[%c0_22, %c0_23, %c0_24] : memref<1x32x64xf32, #tpu.memory_space<vmem>>, vector<1x32x64xf32>
      %35 = vector.shape_cast %34 : vector<1x32x64xf32> to vector<32x64xf32>
      %36 = vector.shape_cast %33 : vector<32x64xf32> to vector<1x32x64xf32>
      tpu.vector_store %arg8[%c0_22, %c0_23, %c0_24], %36 {strides = array<i32>} : memref<1x32x64xf32, #tpu.memory_space<vmem>>, vector<1x32x64xf32>,
    } else {
    }
    return
  }
  func.func @transform_0(%arg0: i32, %arg1: i32) -> (i32, i32, i32) {
    %c0_i32 = arith.constant 0 : i32
    %c0_i32_0 = arith.constant 0 : i32
    %c0_i32_1 = arith.constant 0 : i32
    %c0_i32_2 = arith.constant 0 : i32
    return %c0_i32, %c0_i32_0, %c0_i32_1 : i32, i32, i32
  }
  func.func @transform_1(%arg0: i32, %arg1: i32) -> (i32, i32, i32) {
    %c0_i32 = arith.constant 0 : i32
    %c0_i32_0 = arith.constant 0 : i32
    %c0_i32_1 = arith.constant 0 : i32
    return %arg1, %c0_i32, %c0_i32_0 : i32, i32, i32
  }
  func.func @transform_2(%arg0: i32, %arg1: i32) -> (i32, i32) {
    %c0_i32 = arith.constant 0 : i32
    %c0_i32_0 = arith.constant 0 : i32
    %c0_i32_1 = arith.constant 0 : i32
    return %c0_i32, %c0_i32_0 : i32, i32
  }
  func.func @transform_3(%arg0: i32, %arg1: i32) -> (i32, i32) {
    %c0_i32 = arith.constant 0 : i32
    %c0_i32_0 = arith.constant 0 : i32
    %c0_i32_1 = arith.constant 0 : i32
    return %c0_i32, %c0_i32_0 : i32, i32
  }
  func.func @transform_4(%arg0: i32, %arg1: i32) -> (i32, i32) {
    %c0_i32 = arith.constant 0 : i32
    %c0_i32_0 = arith.constant 0 : i32
    %c0_i32_1 = arith.constant 0 : i32
    return %c0_i32, %c0_i32_0 : i32, i32
  }
  func.func @transform_5(%arg0: i32, %arg1: i32) -> (i32, i32, i32) {
    %c0_i32 = arith.constant 0 : i32
    %c0_i32_0 = arith.constant 0 : i32
    %c0_i32_1 = arith.constant 0 : i32
    return %arg1, %c0_i32, %c0_i32_0 : i32, i32, i32
  }
  func.func @transform_6(%arg0: i32, %arg1: i32) -> (i32, i32, i32) {
    %c0_i32 = arith.constant 0 : i32
    %c0_i32_0 = arith.constant 0 : i32
    %c0_i32_1 = arith.constant 0 : i32
    return %arg1, %c0_i32, %c0_i32_0 : i32, i32, i32
  }
}

module attributes {stable_mosaic.version = 11 : i64} {
  func.func @_cna_kernel(%arg0: i32, %arg1: i32, %arg2: memref<1x8x32xbf16, #tpu.memory_space<vmem>>, %arg3: memref<1x32x64xbf16, #tpu.memory_space<vmem>>, %arg4: memref<8x1xf32, #tpu.memory_space<vmem>>, %arg5: memref<8x1xf32, #tpu.memory_space<vmem>>, %arg6: memref<1x64xf32, #tpu.memory_space<vmem>>, %arg7: memref<1x8x64xf32, #tpu.memory_space<vmem>>, %arg8: memref<8x1xf32, #tpu.memory_space<vmem>>, %arg9: memref<8x1xf32, #tpu.memory_space<vmem>>, %arg10: memref<8x1xf32, #tpu.memory_space<vmem>>, %arg11: memref<8x1xf32, #tpu.memory_space<vmem>>) attributes {dimension_semantics = [#tpu.dimension_semantics<arbitrary>, #tpu.dimension_semantics<arbitrary>], iteration_bounds = array<i64: 2, 2>, scalar_prefetch = 0 : i64, scratch_operands = 4 : i64, tpu.core_type = #tpu.core_type<tc>, window_params = [{pipeline_mode = #tpu.pipeline_mode<synchronous>, transform_indices = @transform_0, window_bounds = array<i64: 1, 8, 32>}, {transform_indices = @transform_1, window_bounds = array<i64: 1, 32, 64>}, {pipeline_mode = #tpu.pipeline_mode<synchronous>, transform_indices = @transform_2, window_bounds = array<i64: 8, 1>}, {pipeline_mode = #tpu.pipeline_mode<synchronous>, transform_indices = @transform_3, window_bounds = array<i64: 8, 1>}, {pipeline_mode = #tpu.pipeline_mode<synchronous>, transform_indices = @transform_4, window_bounds = array<i64: 1, 64>}, {transform_indices = @transform_5, window_bounds = array<i64: 1, 8, 64>}]} {
    %c0 = arith.constant 0 : index
    %c0_0 = arith.constant 0 : index
    %c0_1 = arith.constant 0 : index
    %0 = vector.load %arg3[%c0, %c0_0, %c0_1] : memref<1x32x64xbf16, #tpu.memory_space<vmem>>, vector<1x32x64xbf16>
    %1 = vector.shape_cast %0 : vector<1x32x64xbf16> to vector<32x64xbf16>
    %cst = arith.constant 0.000000e+00 : f32
    %2 = vector.broadcast %cst : f32 to vector<8x64xf32>
    %c0_2 = arith.constant 0 : index
    %c0_3 = arith.constant 0 : index
    %c0_4 = arith.constant 0 : index
    %3 = vector.load %arg2[%c0_2, %c0_3, %c0_4] : memref<1x8x32xbf16, #tpu.memory_space<vmem>>, vector<1x8x32xbf16>
    %4 = vector.shape_cast %3 : vector<1x8x32xbf16> to vector<8x32xbf16>
    %cst_5 = arith.constant dense<0.000000e+00> : vector<8x64xf32>
    %5 = tpu.matmul %4, %1, %cst_5 {dimension_numbers = #tpu.dot_dimension_numbers<[1], [0], [0], [1], [0, 0, 1, 1], [], []>} : vector<8x32xbf16>, vector<32x64xbf16>, vector<8x64xf32> -> vector<8x64xf32>
    %6 = arith.addf %2, %5 : vector<8x64xf32>
    %c0_i32 = arith.constant 0 : i32
    %7 = arith.cmpi eq, %arg0, %c0_i32 : i32
    %c0_i32_6 = arith.constant 0 : i32
    %8 = arith.cmpi eq, %arg1, %c0_i32_6 : i32
    %9 = arith.andi %7, %8 : i1
    %10 = arith.extui %9 : i1 to i32
    %c0_i32_7 = arith.constant 0 : i32
    %11 = arith.cmpi ne, %10, %c0_i32_7 : i32
    scf.if %11 {
      %cst_14 = arith.constant 0.000000e+00 : f32
      %23 = vector.broadcast %cst_14 : f32 to vector<8x1xf32>
      %c0_15 = arith.constant 0 : index
      %c0_16 = arith.constant 0 : index
      %24 = vector.load %arg8[%c0_15, %c0_16] : memref<8x1xf32, #tpu.memory_space<vmem>>, vector<8x1xf32>
      tpu.vector_store %arg8[%c0_15, %c0_16], %23 {strides = array<i32>} : memref<8x1xf32, #tpu.memory_space<vmem>>, vector<8x1xf32>,
      %cst_17 = arith.constant 0.000000e+00 : f32
      %25 = vector.broadcast %cst_17 : f32 to vector<8x1xf32>
      %c0_18 = arith.constant 0 : index
      %c0_19 = arith.constant 0 : index
      %26 = vector.load %arg9[%c0_18, %c0_19] : memref<8x1xf32, #tpu.memory_space<vmem>>, vector<8x1xf32>
      tpu.vector_store %arg9[%c0_18, %c0_19], %25 {strides = array<i32>} : memref<8x1xf32, #tpu.memory_space<vmem>>, vector<8x1xf32>,
    } else {
    }
    %c0_i32_8 = arith.constant 0 : i32
    %12 = arith.cmpi eq, %arg0, %c0_i32_8 : i32
    %13 = arith.extui %12 : i1 to i32
    %c0_i32_9 = arith.constant 0 : i32
    %14 = arith.cmpi ne, %13, %c0_i32_9 : i32
    scf.if %14 {
      %c0_14 = arith.constant 0 : index
      %c0_15 = arith.constant 0 : index
      %23 = vector.load %arg6[%c0_14, %c0_15] : memref<1x64xf32, #tpu.memory_space<vmem>>, vector<1x64xf32>
      %24 = vector.broadcast %23 : vector<1x64xf32> to vector<8x64xf32>
      %25 = arith.mulf %6, %24 : vector<8x64xf32>
      %c0_16 = arith.constant 0 : index
      %c0_17 = arith.constant 0 : index
      %26 = vector.load %arg8[%c0_16, %c0_17] : memref<8x1xf32, #tpu.memory_space<vmem>>, vector<8x1xf32>
      %cst_18 = arith.constant dense<0.000000e+00> : vector<8xf32>
      %27 = vector.multi_reduction <add>, %25, %cst_18 [1] : vector<8x64xf32> to vector<8xf32>
      %28 = vector.shape_cast %27 : vector<8xf32> to vector<8x1xf32>
      %29 = arith.addf %26, %28 : vector<8x1xf32>
      %c0_19 = arith.constant 0 : index
      %c0_20 = arith.constant 0 : index
      %30 = vector.load %arg8[%c0_19, %c0_20] : memref<8x1xf32, #tpu.memory_space<vmem>>, vector<8x1xf32>
      tpu.vector_store %arg8[%c0_19, %c0_20], %29 {strides = array<i32>} : memref<8x1xf32, #tpu.memory_space<vmem>>, vector<8x1xf32>,
      %c0_21 = arith.constant 0 : index
      %c0_22 = arith.constant 0 : index
      %31 = vector.load %arg9[%c0_21, %c0_22] : memref<8x1xf32, #tpu.memory_space<vmem>>, vector<8x1xf32>
      %32 = arith.mulf %6, %25 : vector<8x64xf32>
      %cst_23 = arith.constant dense<0.000000e+00> : vector<8xf32>
      %33 = vector.multi_reduction <add>, %32, %cst_23 [1] : vector<8x64xf32> to vector<8xf32>
      %34 = vector.shape_cast %33 : vector<8xf32> to vector<8x1xf32>
      %35 = arith.addf %31, %34 : vector<8x1xf32>
      %c0_24 = arith.constant 0 : index
      %c0_25 = arith.constant 0 : index
      %36 = vector.load %arg9[%c0_24, %c0_25] : memref<8x1xf32, #tpu.memory_space<vmem>>, vector<8x1xf32>
      tpu.vector_store %arg9[%c0_24, %c0_25], %35 {strides = array<i32>} : memref<8x1xf32, #tpu.memory_space<vmem>>, vector<8x1xf32>,
    } else {
    }
    %c0_i32_10 = arith.constant 0 : i32
    %15 = arith.cmpi eq, %arg0, %c0_i32_10 : i32
    %c1_i32 = arith.constant 1 : i32
    %16 = arith.cmpi eq, %arg1, %c1_i32 : i32
    %17 = arith.andi %15, %16 : i1
    %18 = arith.extui %17 : i1 to i32
    %c0_i32_11 = arith.constant 0 : i32
    %19 = arith.cmpi ne, %18, %c0_i32_11 : i32
    scf.if %19 {
      %c0_14 = arith.constant 0 : index
      %c0_15 = arith.constant 0 : index
      %23 = vector.load %arg8[%c0_14, %c0_15] : memref<8x1xf32, #tpu.memory_space<vmem>>, vector<8x1xf32>
      %cst_16 = arith.constant 7.812500e-03 : f32
      %24 = vector.broadcast %cst_16 : f32 to vector<8x1xf32>
      %25 = arith.mulf %23, %24 : vector<8x1xf32>
      %c0_17 = arith.constant 0 : index
      %c0_18 = arith.constant 0 : index
      %26 = vector.load %arg9[%c0_17, %c0_18] : memref<8x1xf32, #tpu.memory_space<vmem>>, vector<8x1xf32>
      %cst_19 = arith.constant 7.812500e-03 : f32
      %27 = vector.broadcast %cst_19 : f32 to vector<8x1xf32>
      %28 = arith.mulf %26, %27 : vector<8x1xf32>
      %29 = arith.mulf %25, %25 : vector<8x1xf32>
      %30 = arith.subf %28, %29 : vector<8x1xf32>
      %c0_20 = arith.constant 0 : index
      %c0_21 = arith.constant 0 : index
      %31 = vector.load %arg4[%c0_20, %c0_21] : memref<8x1xf32, #tpu.memory_space<vmem>>, vector<8x1xf32>
      %cst_22 = arith.constant 9.99999974E-6 : f32
      %32 = vector.broadcast %cst_22 : f32 to vector<8x1xf32>
      %33 = arith.addf %30, %32 : vector<8x1xf32>
      %34 = math.rsqrt %33 : vector<8x1xf32>
      %35 = arith.mulf %31, %34 : vector<8x1xf32>
      %c0_23 = arith.constant 0 : index
      %c0_24 = arith.constant 0 : index
      %36 = vector.load %arg10[%c0_23, %c0_24] : memref<8x1xf32, #tpu.memory_space<vmem>>, vector<8x1xf32>
      tpu.vector_store %arg10[%c0_23, %c0_24], %35 {strides = array<i32>} : memref<8x1xf32, #tpu.memory_space<vmem>>, vector<8x1xf32>,
      %c0_25 = arith.constant 0 : index
      %c0_26 = arith.constant 0 : index
      %37 = vector.load %arg5[%c0_25, %c0_26] : memref<8x1xf32, #tpu.memory_space<vmem>>, vector<8x1xf32>
      %38 = arith.mulf %25, %35 : vector<8x1xf32>
      %39 = arith.subf %37, %38 : vector<8x1xf32>
      %c0_27 = arith.constant 0 : index
      %c0_28 = arith.constant 0 : index
      %40 = vector.load %arg11[%c0_27, %c0_28] : memref<8x1xf32, #tpu.memory_space<vmem>>, vector<8x1xf32>
      tpu.vector_store %arg11[%c0_27, %c0_28], %39 {strides = array<i32>} : memref<8x1xf32, #tpu.memory_space<vmem>>, vector<8x1xf32>,
    } else {
    }
    %c1_i32_12 = arith.constant 1 : i32
    %20 = arith.cmpi eq, %arg0, %c1_i32_12 : i32
    %21 = arith.extui %20 : i1 to i32
    %c0_i32_13 = arith.constant 0 : i32
    %22 = arith.cmpi ne, %21, %c0_i32_13 : i32
    scf.if %22 {
      %c0_14 = arith.constant 0 : index
      %c0_15 = arith.constant 0 : index
      %23 = vector.load %arg10[%c0_14, %c0_15] : memref<8x1xf32, #tpu.memory_space<vmem>>, vector<8x1xf32>
      %24 = vector.broadcast %23 : vector<8x1xf32> to vector<8x64xf32>
      %25 = arith.mulf %6, %24 : vector<8x64xf32>
      %c0_16 = arith.constant 0 : index
      %c0_17 = arith.constant 0 : index
      %26 = vector.load %arg11[%c0_16, %c0_17] : memref<8x1xf32, #tpu.memory_space<vmem>>, vector<8x1xf32>
      %27 = vector.broadcast %26 : vector<8x1xf32> to vector<8x64xf32>
      %28 = arith.addf %25, %27 : vector<8x64xf32>
      %cst_18 = arith.constant 0.000000e+00 : f32
      %29 = vector.broadcast %cst_18 : f32 to vector<8x64xf32>
      %30 = arith.maximumf %28, %29 : vector<8x64xf32>
      %c0_19 = arith.constant 0 : index
      %c0_20 = arith.constant 0 : index
      %c0_21 = arith.constant 0 : index
      %31 = vector.load %arg7[%c0_19, %c0_20, %c0_21] : memref<1x8x64xf32, #tpu.memory_space<vmem>>, vector<1x8x64xf32>
      %32 = vector.shape_cast %31 : vector<1x8x64xf32> to vector<8x64xf32>
      %33 = vector.shape_cast %30 : vector<8x64xf32> to vector<1x8x64xf32>
      tpu.vector_store %arg7[%c0_19, %c0_20, %c0_21], %33 {strides = array<i32>} : memref<1x8x64xf32, #tpu.memory_space<vmem>>, vector<1x8x64xf32>,
    } else {
    }
    return
  }
  func.func @transform_0(%arg0: i32, %arg1: i32) -> (i32, i32, i32) {
    %c0_i32 = arith.constant 0 : i32
    %c0_i32_0 = arith.constant 0 : i32
    %c0_i32_1 = arith.constant 0 : i32
    %c0_i32_2 = arith.constant 0 : i32
    return %c0_i32, %c0_i32_0, %c0_i32_1 : i32, i32, i32
  }
  func.func @transform_1(%arg0: i32, %arg1: i32) -> (i32, i32, i32) {
    %c0_i32 = arith.constant 0 : i32
    %c0_i32_0 = arith.constant 0 : i32
    %c0_i32_1 = arith.constant 0 : i32
    return %arg1, %c0_i32, %c0_i32_0 : i32, i32, i32
  }
  func.func @transform_2(%arg0: i32, %arg1: i32) -> (i32, i32) {
    %c0_i32 = arith.constant 0 : i32
    %c0_i32_0 = arith.constant 0 : i32
    %c0_i32_1 = arith.constant 0 : i32
    return %c0_i32, %c0_i32_0 : i32, i32
  }
  func.func @transform_3(%arg0: i32, %arg1: i32) -> (i32, i32) {
    %c0_i32 = arith.constant 0 : i32
    %c0_i32_0 = arith.constant 0 : i32
    %c0_i32_1 = arith.constant 0 : i32
    return %c0_i32, %c0_i32_0 : i32, i32
  }
  func.func @transform_4(%arg0: i32, %arg1: i32) -> (i32, i32) {
    %c0_i32 = arith.constant 0 : i32
    %c0_i32_0 = arith.constant 0 : i32
    %c0_i32_1 = arith.constant 0 : i32
    return %c0_i32, %c0_i32_0 : i32, i32
  }
  func.func @transform_5(%arg0: i32, %arg1: i32) -> (i32, i32, i32) {
    %c0_i32 = arith.constant 0 : i32
    %c0_i32_0 = arith.constant 0 : i32
    %c0_i32_1 = arith.constant 0 : i32
    return %arg1, %c0_i32, %c0_i32_0 : i32, i32, i32
  }
}

module attributes {stable_mosaic.version = 11 : i64} {
  func.func @_cna_kernel(%arg0: i32, %arg1: i32, %arg2: memref<9x8x8xbf16, #tpu.memory_space<vmem>>, %arg3: memref<1x8x122xbf16, #tpu.memory_space<vmem>>, %arg4: memref<8x1xf32, #tpu.memory_space<vmem>>, %arg5: memref<8x1xf32, #tpu.memory_space<vmem>>, %arg6: memref<1x100xf32, #tpu.memory_space<vmem>>, %arg7: memref<1x8x100xf32, #tpu.memory_space<vmem>>, %arg8: memref<8x1xf32, #tpu.memory_space<vmem>>, %arg9: memref<8x1xf32, #tpu.memory_space<vmem>>, %arg10: memref<8x1xf32, #tpu.memory_space<vmem>>, %arg11: memref<8x1xf32, #tpu.memory_space<vmem>>) attributes {dimension_semantics = [#tpu.dimension_semantics<arbitrary>, #tpu.dimension_semantics<arbitrary>], iteration_bounds = array<i64: 2, 2>, scalar_prefetch = 0 : i64, scratch_operands = 4 : i64, tpu.core_type = #tpu.core_type<tc>, window_params = [{pipeline_mode = #tpu.pipeline_mode<synchronous>, transform_indices = @transform_0, window_bounds = array<i64: 9, 8, 8>}, {transform_indices = @transform_1, window_bounds = array<i64: 1, 8, 122>}, {pipeline_mode = #tpu.pipeline_mode<synchronous>, transform_indices = @transform_2, window_bounds = array<i64: 8, 1>}, {pipeline_mode = #tpu.pipeline_mode<synchronous>, transform_indices = @transform_3, window_bounds = array<i64: 8, 1>}, {pipeline_mode = #tpu.pipeline_mode<synchronous>, transform_indices = @transform_4, window_bounds = array<i64: 1, 100>}, {transform_indices = @transform_5, window_bounds = array<i64: 1, 8, 100>}]} {
    %c0 = arith.constant 0 : index
    %c0_0 = arith.constant 0 : index
    %c0_1 = arith.constant 0 : index
    %0 = vector.load %arg3[%c0, %c0_0, %c0_1] : memref<1x8x122xbf16, #tpu.memory_space<vmem>>, vector<1x8x122xbf16>
    %1 = vector.shape_cast %0 : vector<1x8x122xbf16> to vector<8x122xbf16>
    %cst = arith.constant 0.000000e+00 : f32
    %2 = vector.broadcast %cst : f32 to vector<8x100xf32>
    %c0_2 = arith.constant 0 : index
    %c0_3 = arith.constant 0 : index
    %c0_4 = arith.constant 0 : index
    %3 = vector.load %arg2[%c0_2, %c0_3, %c0_4] : memref<9x8x8xbf16, #tpu.memory_space<vmem>>, vector<1x8x8xbf16>
    %4 = vector.shape_cast %3 : vector<1x8x8xbf16> to vector<8x8xbf16>
    %5 = vector.extract_strided_slice %1 {offsets = [0, 0], sizes = [8, 100], strides = [1, 1]} : vector<8x122xbf16> to vector<8x100xbf16>
    %cst_5 = arith.constant dense<0.000000e+00> : vector<8x100xf32>
    %6 = tpu.matmul %4, %5, %cst_5 {dimension_numbers = #tpu.dot_dimension_numbers<[1], [0], [0], [1], [0, 0, 1, 1], [], []>} : vector<8x8xbf16>, vector<8x100xbf16>, vector<8x100xf32> -> vector<8x100xf32>
    %7 = arith.addf %2, %6 : vector<8x100xf32>
    %c1 = arith.constant 1 : index
    %c0_6 = arith.constant 0 : index
    %c0_7 = arith.constant 0 : index
    %8 = vector.load %arg2[%c1, %c0_6, %c0_7] : memref<9x8x8xbf16, #tpu.memory_space<vmem>>, vector<1x8x8xbf16>
    %9 = vector.shape_cast %8 : vector<1x8x8xbf16> to vector<8x8xbf16>
    %10 = vector.extract_strided_slice %1 {offsets = [0, 1], sizes = [8, 100], strides = [1, 1]} : vector<8x122xbf16> to vector<8x100xbf16>
    %cst_8 = arith.constant dense<0.000000e+00> : vector<8x100xf32>
    %11 = tpu.matmul %9, %10, %cst_8 {dimension_numbers = #tpu.dot_dimension_numbers<[1], [0], [0], [1], [0, 0, 1, 1], [], []>} : vector<8x8xbf16>, vector<8x100xbf16>, vector<8x100xf32> -> vector<8x100xf32>
    %12 = arith.addf %7, %11 : vector<8x100xf32>
    %c2 = arith.constant 2 : index
    %c0_9 = arith.constant 0 : index
    %c0_10 = arith.constant 0 : index
    %13 = vector.load %arg2[%c2, %c0_9, %c0_10] : memref<9x8x8xbf16, #tpu.memory_space<vmem>>, vector<1x8x8xbf16>
    %14 = vector.shape_cast %13 : vector<1x8x8xbf16> to vector<8x8xbf16>
    %15 = vector.extract_strided_slice %1 {offsets = [0, 2], sizes = [8, 100], strides = [1, 1]} : vector<8x122xbf16> to vector<8x100xbf16>
    %cst_11 = arith.constant dense<0.000000e+00> : vector<8x100xf32>
    %16 = tpu.matmul %14, %15, %cst_11 {dimension_numbers = #tpu.dot_dimension_numbers<[1], [0], [0], [1], [0, 0, 1, 1], [], []>} : vector<8x8xbf16>, vector<8x100xbf16>, vector<8x100xf32> -> vector<8x100xf32>
    %17 = arith.addf %12, %16 : vector<8x100xf32>
    %c3 = arith.constant 3 : index
    %c0_12 = arith.constant 0 : index
    %c0_13 = arith.constant 0 : index
    %18 = vector.load %arg2[%c3, %c0_12, %c0_13] : memref<9x8x8xbf16, #tpu.memory_space<vmem>>, vector<1x8x8xbf16>
    %19 = vector.shape_cast %18 : vector<1x8x8xbf16> to vector<8x8xbf16>
    %20 = vector.extract_strided_slice %1 {offsets = [0, 10], sizes = [8, 100], strides = [1, 1]} : vector<8x122xbf16> to vector<8x100xbf16>
    %cst_14 = arith.constant dense<0.000000e+00> : vector<8x100xf32>
    %21 = tpu.matmul %19, %20, %cst_14 {dimension_numbers = #tpu.dot_dimension_numbers<[1], [0], [0], [1], [0, 0, 1, 1], [], []>} : vector<8x8xbf16>, vector<8x100xbf16>, vector<8x100xf32> -> vector<8x100xf32>
    %22 = arith.addf %17, %21 : vector<8x100xf32>
    %c4 = arith.constant 4 : index
    %c0_15 = arith.constant 0 : index
    %c0_16 = arith.constant 0 : index
    %23 = vector.load %arg2[%c4, %c0_15, %c0_16] : memref<9x8x8xbf16, #tpu.memory_space<vmem>>, vector<1x8x8xbf16>
    %24 = vector.shape_cast %23 : vector<1x8x8xbf16> to vector<8x8xbf16>
    %25 = vector.extract_strided_slice %1 {offsets = [0, 11], sizes = [8, 100], strides = [1, 1]} : vector<8x122xbf16> to vector<8x100xbf16>
    %cst_17 = arith.constant dense<0.000000e+00> : vector<8x100xf32>
    %26 = tpu.matmul %24, %25, %cst_17 {dimension_numbers = #tpu.dot_dimension_numbers<[1], [0], [0], [1], [0, 0, 1, 1], [], []>} : vector<8x8xbf16>, vector<8x100xbf16>, vector<8x100xf32> -> vector<8x100xf32>
    %27 = arith.addf %22, %26 : vector<8x100xf32>
    %c5 = arith.constant 5 : index
    %c0_18 = arith.constant 0 : index
    %c0_19 = arith.constant 0 : index
    %28 = vector.load %arg2[%c5, %c0_18, %c0_19] : memref<9x8x8xbf16, #tpu.memory_space<vmem>>, vector<1x8x8xbf16>
    %29 = vector.shape_cast %28 : vector<1x8x8xbf16> to vector<8x8xbf16>
    %30 = vector.extract_strided_slice %1 {offsets = [0, 12], sizes = [8, 100], strides = [1, 1]} : vector<8x122xbf16> to vector<8x100xbf16>
    %cst_20 = arith.constant dense<0.000000e+00> : vector<8x100xf32>
    %31 = tpu.matmul %29, %30, %cst_20 {dimension_numbers = #tpu.dot_dimension_numbers<[1], [0], [0], [1], [0, 0, 1, 1], [], []>} : vector<8x8xbf16>, vector<8x100xbf16>, vector<8x100xf32> -> vector<8x100xf32>
    %32 = arith.addf %27, %31 : vector<8x100xf32>
    %c6 = arith.constant 6 : index
    %c0_21 = arith.constant 0 : index
    %c0_22 = arith.constant 0 : index
    %33 = vector.load %arg2[%c6, %c0_21, %c0_22] : memref<9x8x8xbf16, #tpu.memory_space<vmem>>, vector<1x8x8xbf16>
    %34 = vector.shape_cast %33 : vector<1x8x8xbf16> to vector<8x8xbf16>
    %35 = vector.extract_strided_slice %1 {offsets = [0, 20], sizes = [8, 100], strides = [1, 1]} : vector<8x122xbf16> to vector<8x100xbf16>
    %cst_23 = arith.constant dense<0.000000e+00> : vector<8x100xf32>
    %36 = tpu.matmul %34, %35, %cst_23 {dimension_numbers = #tpu.dot_dimension_numbers<[1], [0], [0], [1], [0, 0, 1, 1], [], []>} : vector<8x8xbf16>, vector<8x100xbf16>, vector<8x100xf32> -> vector<8x100xf32>
    %37 = arith.addf %32, %36 : vector<8x100xf32>
    %c7 = arith.constant 7 : index
    %c0_24 = arith.constant 0 : index
    %c0_25 = arith.constant 0 : index
    %38 = vector.load %arg2[%c7, %c0_24, %c0_25] : memref<9x8x8xbf16, #tpu.memory_space<vmem>>, vector<1x8x8xbf16>
    %39 = vector.shape_cast %38 : vector<1x8x8xbf16> to vector<8x8xbf16>
    %40 = vector.extract_strided_slice %1 {offsets = [0, 21], sizes = [8, 100], strides = [1, 1]} : vector<8x122xbf16> to vector<8x100xbf16>
    %cst_26 = arith.constant dense<0.000000e+00> : vector<8x100xf32>
    %41 = tpu.matmul %39, %40, %cst_26 {dimension_numbers = #tpu.dot_dimension_numbers<[1], [0], [0], [1], [0, 0, 1, 1], [], []>} : vector<8x8xbf16>, vector<8x100xbf16>, vector<8x100xf32> -> vector<8x100xf32>
    %42 = arith.addf %37, %41 : vector<8x100xf32>
    %c8 = arith.constant 8 : index
    %c0_27 = arith.constant 0 : index
    %c0_28 = arith.constant 0 : index
    %43 = vector.load %arg2[%c8, %c0_27, %c0_28] : memref<9x8x8xbf16, #tpu.memory_space<vmem>>, vector<1x8x8xbf16>
    %44 = vector.shape_cast %43 : vector<1x8x8xbf16> to vector<8x8xbf16>
    %45 = vector.extract_strided_slice %1 {offsets = [0, 22], sizes = [8, 100], strides = [1, 1]} : vector<8x122xbf16> to vector<8x100xbf16>
    %cst_29 = arith.constant dense<0.000000e+00> : vector<8x100xf32>
    %46 = tpu.matmul %44, %45, %cst_29 {dimension_numbers = #tpu.dot_dimension_numbers<[1], [0], [0], [1], [0, 0, 1, 1], [], []>} : vector<8x8xbf16>, vector<8x100xbf16>, vector<8x100xf32> -> vector<8x100xf32>
    %47 = arith.addf %42, %46 : vector<8x100xf32>
    %c0_i32 = arith.constant 0 : i32
    %48 = arith.cmpi eq, %arg0, %c0_i32 : i32
    %c0_i32_30 = arith.constant 0 : i32
    %49 = arith.cmpi eq, %arg1, %c0_i32_30 : i32
    %50 = arith.andi %48, %49 : i1
    %51 = arith.extui %50 : i1 to i32
    %c0_i32_31 = arith.constant 0 : i32
    %52 = arith.cmpi ne, %51, %c0_i32_31 : i32
    scf.if %52 {
      %cst_38 = arith.constant 0.000000e+00 : f32
      %64 = vector.broadcast %cst_38 : f32 to vector<8x1xf32>
      %c0_39 = arith.constant 0 : index
      %c0_40 = arith.constant 0 : index
      %65 = vector.load %arg8[%c0_39, %c0_40] : memref<8x1xf32, #tpu.memory_space<vmem>>, vector<8x1xf32>
      tpu.vector_store %arg8[%c0_39, %c0_40], %64 {strides = array<i32>} : memref<8x1xf32, #tpu.memory_space<vmem>>, vector<8x1xf32>,
      %cst_41 = arith.constant 0.000000e+00 : f32
      %66 = vector.broadcast %cst_41 : f32 to vector<8x1xf32>
      %c0_42 = arith.constant 0 : index
      %c0_43 = arith.constant 0 : index
      %67 = vector.load %arg9[%c0_42, %c0_43] : memref<8x1xf32, #tpu.memory_space<vmem>>, vector<8x1xf32>
      tpu.vector_store %arg9[%c0_42, %c0_43], %66 {strides = array<i32>} : memref<8x1xf32, #tpu.memory_space<vmem>>, vector<8x1xf32>,
    } else {
    }
    %c0_i32_32 = arith.constant 0 : i32
    %53 = arith.cmpi eq, %arg0, %c0_i32_32 : i32
    %54 = arith.extui %53 : i1 to i32
    %c0_i32_33 = arith.constant 0 : i32
    %55 = arith.cmpi ne, %54, %c0_i32_33 : i32
    scf.if %55 {
      %c0_38 = arith.constant 0 : index
      %c0_39 = arith.constant 0 : index
      %64 = vector.load %arg6[%c0_38, %c0_39] : memref<1x100xf32, #tpu.memory_space<vmem>>, vector<1x100xf32>
      %65 = vector.broadcast %64 : vector<1x100xf32> to vector<8x100xf32>
      %66 = arith.mulf %47, %65 : vector<8x100xf32>
      %c0_40 = arith.constant 0 : index
      %c0_41 = arith.constant 0 : index
      %67 = vector.load %arg8[%c0_40, %c0_41] : memref<8x1xf32, #tpu.memory_space<vmem>>, vector<8x1xf32>
      %cst_42 = arith.constant dense<0.000000e+00> : vector<8xf32>
      %68 = vector.multi_reduction <add>, %66, %cst_42 [1] : vector<8x100xf32> to vector<8xf32>
      %69 = vector.shape_cast %68 : vector<8xf32> to vector<8x1xf32>
      %70 = arith.addf %67, %69 : vector<8x1xf32>
      %c0_43 = arith.constant 0 : index
      %c0_44 = arith.constant 0 : index
      %71 = vector.load %arg8[%c0_43, %c0_44] : memref<8x1xf32, #tpu.memory_space<vmem>>, vector<8x1xf32>
      tpu.vector_store %arg8[%c0_43, %c0_44], %70 {strides = array<i32>} : memref<8x1xf32, #tpu.memory_space<vmem>>, vector<8x1xf32>,
      %c0_45 = arith.constant 0 : index
      %c0_46 = arith.constant 0 : index
      %72 = vector.load %arg9[%c0_45, %c0_46] : memref<8x1xf32, #tpu.memory_space<vmem>>, vector<8x1xf32>
      %73 = arith.mulf %47, %66 : vector<8x100xf32>
      %cst_47 = arith.constant dense<0.000000e+00> : vector<8xf32>
      %74 = vector.multi_reduction <add>, %73, %cst_47 [1] : vector<8x100xf32> to vector<8xf32>
      %75 = vector.shape_cast %74 : vector<8xf32> to vector<8x1xf32>
      %76 = arith.addf %72, %75 : vector<8x1xf32>
      %c0_48 = arith.constant 0 : index
      %c0_49 = arith.constant 0 : index
      %77 = vector.load %arg9[%c0_48, %c0_49] : memref<8x1xf32, #tpu.memory_space<vmem>>, vector<8x1xf32>
      tpu.vector_store %arg9[%c0_48, %c0_49], %76 {strides = array<i32>} : memref<8x1xf32, #tpu.memory_space<vmem>>, vector<8x1xf32>,
    } else {
    }
    %c0_i32_34 = arith.constant 0 : i32
    %56 = arith.cmpi eq, %arg0, %c0_i32_34 : i32
    %c1_i32 = arith.constant 1 : i32
    %57 = arith.cmpi eq, %arg1, %c1_i32 : i32
    %58 = arith.andi %56, %57 : i1
    %59 = arith.extui %58 : i1 to i32
    %c0_i32_35 = arith.constant 0 : i32
    %60 = arith.cmpi ne, %59, %c0_i32_35 : i32
    scf.if %60 {
      %c0_38 = arith.constant 0 : index
      %c0_39 = arith.constant 0 : index
      %64 = vector.load %arg8[%c0_38, %c0_39] : memref<8x1xf32, #tpu.memory_space<vmem>>, vector<8x1xf32>
      %cst_40 = arith.constant 7.812500e-03 : f32
      %65 = vector.broadcast %cst_40 : f32 to vector<8x1xf32>
      %66 = arith.mulf %64, %65 : vector<8x1xf32>
      %c0_41 = arith.constant 0 : index
      %c0_42 = arith.constant 0 : index
      %67 = vector.load %arg9[%c0_41, %c0_42] : memref<8x1xf32, #tpu.memory_space<vmem>>, vector<8x1xf32>
      %cst_43 = arith.constant 7.812500e-03 : f32
      %68 = vector.broadcast %cst_43 : f32 to vector<8x1xf32>
      %69 = arith.mulf %67, %68 : vector<8x1xf32>
      %70 = arith.mulf %66, %66 : vector<8x1xf32>
      %71 = arith.subf %69, %70 : vector<8x1xf32>
      %c0_44 = arith.constant 0 : index
      %c0_45 = arith.constant 0 : index
      %72 = vector.load %arg4[%c0_44, %c0_45] : memref<8x1xf32, #tpu.memory_space<vmem>>, vector<8x1xf32>
      %cst_46 = arith.constant 9.99999974E-6 : f32
      %73 = vector.broadcast %cst_46 : f32 to vector<8x1xf32>
      %74 = arith.addf %71, %73 : vector<8x1xf32>
      %75 = math.rsqrt %74 : vector<8x1xf32>
      %76 = arith.mulf %72, %75 : vector<8x1xf32>
      %c0_47 = arith.constant 0 : index
      %c0_48 = arith.constant 0 : index
      %77 = vector.load %arg10[%c0_47, %c0_48] : memref<8x1xf32, #tpu.memory_space<vmem>>, vector<8x1xf32>
      tpu.vector_store %arg10[%c0_47, %c0_48], %76 {strides = array<i32>} : memref<8x1xf32, #tpu.memory_space<vmem>>, vector<8x1xf32>,
      %c0_49 = arith.constant 0 : index
      %c0_50 = arith.constant 0 : index
      %78 = vector.load %arg5[%c0_49, %c0_50] : memref<8x1xf32, #tpu.memory_space<vmem>>, vector<8x1xf32>
      %79 = arith.mulf %66, %76 : vector<8x1xf32>
      %80 = arith.subf %78, %79 : vector<8x1xf32>
      %c0_51 = arith.constant 0 : index
      %c0_52 = arith.constant 0 : index
      %81 = vector.load %arg11[%c0_51, %c0_52] : memref<8x1xf32, #tpu.memory_space<vmem>>, vector<8x1xf32>
      tpu.vector_store %arg11[%c0_51, %c0_52], %80 {strides = array<i32>} : memref<8x1xf32, #tpu.memory_space<vmem>>, vector<8x1xf32>,
    } else {
    }
    %c1_i32_36 = arith.constant 1 : i32
    %61 = arith.cmpi eq, %arg0, %c1_i32_36 : i32
    %62 = arith.extui %61 : i1 to i32
    %c0_i32_37 = arith.constant 0 : i32
    %63 = arith.cmpi ne, %62, %c0_i32_37 : i32
    scf.if %63 {
      %c0_38 = arith.constant 0 : index
      %c0_39 = arith.constant 0 : index
      %64 = vector.load %arg10[%c0_38, %c0_39] : memref<8x1xf32, #tpu.memory_space<vmem>>, vector<8x1xf32>
      %65 = vector.broadcast %64 : vector<8x1xf32> to vector<8x100xf32>
      %66 = arith.mulf %47, %65 : vector<8x100xf32>
      %c0_40 = arith.constant 0 : index
      %c0_41 = arith.constant 0 : index
      %67 = vector.load %arg11[%c0_40, %c0_41] : memref<8x1xf32, #tpu.memory_space<vmem>>, vector<8x1xf32>
      %68 = vector.broadcast %67 : vector<8x1xf32> to vector<8x100xf32>
      %69 = arith.addf %66, %68 : vector<8x100xf32>
      %cst_42 = arith.constant 0.000000e+00 : f32
      %70 = vector.broadcast %cst_42 : f32 to vector<8x100xf32>
      %71 = arith.maximumf %69, %70 : vector<8x100xf32>
      %c0_43 = arith.constant 0 : index
      %c0_44 = arith.constant 0 : index
      %c0_45 = arith.constant 0 : index
      %72 = vector.load %arg7[%c0_43, %c0_44, %c0_45] : memref<1x8x100xf32, #tpu.memory_space<vmem>>, vector<1x8x100xf32>
      %73 = vector.shape_cast %72 : vector<1x8x100xf32> to vector<8x100xf32>
      %74 = vector.shape_cast %71 : vector<8x100xf32> to vector<1x8x100xf32>
      tpu.vector_store %arg7[%c0_43, %c0_44, %c0_45], %74 {strides = array<i32>} : memref<1x8x100xf32, #tpu.memory_space<vmem>>, vector<1x8x100xf32>,
    } else {
    }
    return
  }
  func.func @transform_0(%arg0: i32, %arg1: i32) -> (i32, i32, i32) {
    %c0_i32 = arith.constant 0 : i32
    %c0_i32_0 = arith.constant 0 : i32
    %c0_i32_1 = arith.constant 0 : i32
    %c0_i32_2 = arith.constant 0 : i32
    return %c0_i32, %c0_i32_0, %c0_i32_1 : i32, i32, i32
  }
  func.func @transform_1(%arg0: i32, %arg1: i32) -> (i32, i32, i32) {
    %c0_i32 = arith.constant 0 : i32
    %c0_i32_0 = arith.constant 0 : i32
    %c0_i32_1 = arith.constant 0 : i32
    return %arg1, %c0_i32, %c0_i32_0 : i32, i32, i32
  }
  func.func @transform_2(%arg0: i32, %arg1: i32) -> (i32, i32) {
    %c0_i32 = arith.constant 0 : i32
    %c0_i32_0 = arith.constant 0 : i32
    %c0_i32_1 = arith.constant 0 : i32
    return %c0_i32, %c0_i32_0 : i32, i32
  }
  func.func @transform_3(%arg0: i32, %arg1: i32) -> (i32, i32) {
    %c0_i32 = arith.constant 0 : i32
    %c0_i32_0 = arith.constant 0 : i32
    %c0_i32_1 = arith.constant 0 : i32
    return %c0_i32, %c0_i32_0 : i32, i32
  }
  func.func @transform_4(%arg0: i32, %arg1: i32) -> (i32, i32) {
    %c0_i32 = arith.constant 0 : i32
    %c0_i32_0 = arith.constant 0 : i32
    %c0_i32_1 = arith.constant 0 : i32
    return %c0_i32, %c0_i32_0 : i32, i32
  }
  func.func @transform_5(%arg0: i32, %arg1: i32) -> (i32, i32, i32) {
    %c0_i32 = arith.constant 0 : i32
    %c0_i32_0 = arith.constant 0 : i32
    %c0_i32_1 = arith.constant 0 : i32
    return %arg1, %c0_i32, %c0_i32_0 : i32, i32, i32
  }
}

</mosaic_0001>

<bundles_post_ra>
// kernel: forward.8
= control target key start
LH: loop header
LB: loop body
LE: loop exit
PB: predicated region body
PF: predicated region fallthrough
CT: control target
= control target key end

     0   :  { %s589_s18 = smov 0   ;;  %s591_s19 = smov 0   ;;  %s681_s0 = inlined_call_operand.vmem [shape: bf16[1,8,8], index: 0, kind: input, shape index: {}]   ;;  %s682_s1 = inlined_call_operand.vmem [shape: bf16[2,8,256], index: 1, kind: input, shape index: {}]   ;;  %s683_s2 = inlined_call_operand.vmem [shape: f32[8,1], index: 2, kind: input, shape index: {}]   ;;  %s684_s3 = inlined_call_operand.vmem [shape: f32[8,1], index: 3, kind: input, shape index: {}]   ;;  %s685_s4 = inlined_call_operand.vmem [shape: f32[1,256], index: 4, kind: input, shape index: {}]   ;;  %s686_s5 = inlined_call_operand.vmem [shape: f32[2,8,256], index: 5, kind: output, shape index: {}]  }
   0x1   :  { %s593_s20 = smov 0   ;;  %s595_s21 = smov 0  }
   0x2   :  { %s597_s22 = smov 0  }
   0x3 LB: > { %s24_s23 = sadd.s32 1, %s546_s20  ;;  %s27_s24 = sadd.s32 1, %s550_s21  ;;  %s554_s22 = sphi %s597_s22, %s15_s22   ;;  %s550_s21 = sphi %s595_s21, %s690_s21   ;;  %s546_s20 = sphi %s593_s20, %s689_s20   ;;  %s542_s19 = sphi %s591_s19, %s688_s19   ;;  %s538_s18 = sphi %s589_s18, %s687_s18  }
   0x4   : > { %p25_p0 = scmp.ge.s32.totalorder %s24_s23, 2  ;;  %p453_p1 = scmp.ge.s32.totalorder %s554_s22, 1 }
   0x5   : > { %p199_p2 = scmp.lt.s32.totalorder %s554_s22, 5 }
   0x6   : > { %s692_s23 = smov (%p25_p0, %s24_s23), 0  ;;  %s694_s24 = smov (!%p25_p0, %s27_s24), %s550_s21 }
   0x7   : > { %p200_p3 = pnand %p453_p1, %p199_p2  ;;  %p29_p4 = scmp.ge.s32.totalorder %s694_s24, 2 }
   0x8   : > { %p227_p5 = scmp.lt.s32.totalorder (!%p200_p3), %s538_s18, 1  ;;  %v556_v0 = vmov (!%p200_p3), 0   ;;  %vm249_vm0 = vcmask (!%p200_p3), 1043456   ;;  %v239_v5 = vld [vmem:[%s681_s0] sm:$0xf] (!%p200_p3)  ;;  %vm245_vm1 = vcmask (!%p200_p3), 64512  }
   0x9   : > { %s696_s24 = smov (%p29_p4, %s694_s24), 0  ;;  %203 = sbr.rel (%p200_p3) target bundleno = 575 (0x23f), region = 40 }
   0xa   : > { %288 = vmatprep.mubr.bf16.mxu0 (!%p200_p3), %v556_v0  ;;  %p297_p6 = scmp.eq.s32.totalorder (!%p200_p3), %s542_s19, 0  ;;  %p298_p7 = scmp.eq.s32.totalorder (!%p200_p3), %s538_s18, 0 }
   0xc   : > { %p299_p8 = pnand (!%p200_p3), %p298_p7, %p297_p6 }
  0x10   : > { %s228_s25 = scalar_select %p227_p5, %s538_s18, 1 }
  0x11   : > { %vm303_vm2 = vcmask (!%p299_p8), 7168   ;;  %v557_v10 = vmov (!%p299_p8), 0.0  }
  0x12   : > { %s466_s26 = sshll.u32 %s228_s25, 3  ;;  %s467_s27 = sshll.u32 %s228_s25, 4  ;;  %304 = vst.msk [vmem:[#allocation2] sm:$0xff] (!%p299_p8), %vm303_vm2, %v557_v10  ;;  %305 = vst.msk [vmem:[#allocation3] sm:$0xff] (!%p299_p8), %vm303_vm2, %v557_v10 }
  0x13   : > { %s231_s30 = scalar_lea.vmem %s682_s1, %s466_s26  ;;  %s631_s8 = scalar_lea.vmem %s686_s5, %s467_s27 }
  0x14   : > { %v238_v1 = vld [vmem:[%s231_s30] sm:$0xff] }
  0x15   : > { %v459_v2 = vcombine.high %v238_v1, %v238_v1  ;;  %v458_v3 = vcombine.low %v238_v1, %v238_v1 }
  0x17   : > { %460 = vmatprep.subr.msk.bf16.mxu0 %vm249_vm0, %v459_v2  ;;  %v251_v4 = vsel %vm249_vm0, %v458_v3, 0 }
  0x18   : > { %257 = vmatpush1.bf16.msra.mxu0 %v251_v4 }
  0x1b   : > { %461 = vmatmul.mubr.msk.bf16.vlgmr.msra.gmra.mrb[0].mxu0 %vm245_vm1, %v239_v5 }
  0xeb   : > { %302 = sbr.rel (%p299_p8) target bundleno = 242 (0xf2), region = 44 }
  0xee   : > { %v640_v6 = vpop.f32.mrb[0].mxu0 }
  0xef   : > { %v642_v7 = vpop.f32.mrb[1].mxu0 }
  0xf0   : > { %v294_v8 = vpop.f32.mrb[2].mxu0 }
  0xf1   : > { %v295_v9 = vpop.f32.mrb[3].mxu0 }
  0xf2 PF: > { %p462_p9 = scmp.ne.s32.totalorder %s542_s19, 0 }
  0xf3   : > { %v311_v11 = vlaneseq (!%p462_p9)  ;;  %v309_v13 = vld [vmem:[%s685_s4] sm:$0x3] (!%p462_p9)  ;;  %vm328_vm3 = vcmask (!%p462_p9), 7168   ;;  %v330_v27 = vld [vmem:[#allocation3] sm:$0xff] (!%p462_p9) }
  0xf4   : > { %308 = sbr.rel (%p462_p9) target bundleno = 404 (0x194), region = 48  ;;  %v323_v24 = vld [vmem:[#allocation2] sm:$0xff] (!%p462_p9) }
  0xf5   : > { %v312_v12 = vshrl.u32 (!%p462_p9), %v311_v11, 7 }
  0xf7   : > { %v313_v14 = vsub.s32 (!%p462_p9), 0, %v312_v12  ;;  %v317_v15 = vsub.s32 (!%p462_p9), 1, %v312_v12 }
  0xf9   : > { %v314_v16 = vrot.slane (!%p462_p9), %v309_v13, %v313_v14  ;;  %v318_v17 = vrot.slane (!%p462_p9), %v309_v13, %v317_v15 }
  0xfb   : > { %v321_v18 = vmul.f32 %v314_v16, %v640_v6  ;;  %v322_v19 = vmul.f32 %v318_v17, %v642_v7 }
  0xfd   : > { %v324_v20 = vadd.f32 %v322_v19, %v321_v18  ;;  %v331_v21 = vmul.f32 %v321_v18, %v640_v6  ;;  %v332_v22 = vmul.f32 %v322_v19, %v642_v7 }
  0xff   : > { %325 = vadd.xlane.f32.xlu0 %v324_v20  ;;  %v333_v23 = vadd.f32 %v332_v22, %v331_v21 }
 0x103   : > { %334 = vadd.xlane.f32.xlu0 %v333_v23 }
 0x18c   : > { %v326_v25 = vpop.xlane.xlu0 %325 }
 0x18d   : > { %v327_v26 = vadd.f32 %v326_v25, %v323_v24 }
 0x18f   : > { %329 = vst.msk [vmem:[#allocation2] sm:$0xff] %vm328_vm3, %v327_v26 }
 0x190   : > { %v335_v28 = vpop.xlane.xlu0 %334 }
 0x191   : > { %v336_v29 = vadd.f32 %v335_v28, %v330_v27 }
 0x193   : > { %337 = vst.msk [vmem:[#allocation3] sm:$0xff] %vm328_vm3, %v336_v29 }
 0x194 PF: > { %p338_p10 = scmp.eq.s32.totalorder %s538_s18, 1 }
 0x196   : > { %p339_p11 = pnand %p338_p10, %p297_p6 }
 0x197   : > { %v343_v30 = vld [vmem:[#allocation2] sm:$0xff] (!%p339_p11)  ;;  %vm353_vm4 = vcmask (!%p339_p11), 7168  }
 0x198   : > { %342 = sbr.rel (%p339_p11) target bundleno = 435 (0x1b3), region = 52  ;;  %v344_v32 = vmul.f32 (!%p339_p11), 0.001953125, %v343_v30  ;;  %v349_v37 = vld [vmem:[%s683_s2] sm:$0xff] (!%p339_p11) }
 0x199   : > { %v355_v40 = vld [vmem:[%s684_s3] sm:$0xff] (!%p339_p11) }
 0x19a   : > { %v345_v31 = vld [vmem:[#allocation3] sm:$0xff] (!%p339_p11)  ;;  %v347_v34 = vmul.f32 (!%p339_p11), %v344_v32, %v344_v32 }
 0x19b   : > { %v346_v33 = vmul.f32 (!%p339_p11), 0.001953125, %v345_v31 }
 0x19d   : > { %v348_v35 = vsub.f32 (!%p339_p11), %v346_v33, %v347_v34 }
 0x19f   : > { %v350_v36 = vadd.f32 1e-05, %v348_v35 }
 0x1a1   : > { %513 = vrsqrt.f32 %v350_v36 }
 0x1ab   : > { %v514_v38 = vpop.eup %513 }
 0x1ac   : > { %v352_v39 = vmul.f32 %v514_v38, %v349_v37 }
 0x1ae   : > { %354 = vst.msk [vmem:[#allocation4] sm:$0xff] %vm353_vm4, %v352_v39  ;;  %v356_v41 = vmul.f32 %v352_v39, %v344_v32 }
 0x1b0   : > { %v357_v42 = vsub.f32 %v355_v40, %v356_v41 }
 0x1b2   : > { %358 = vst.msk [vmem:[#allocation5] sm:$0xff] %vm353_vm4, %v357_v42 }
 0x1b3 PF: > { %p463_p12 = scmp.ne.s32.totalorder %s542_s19, 1 }
 0x1b4   : > { %v558_v44 = vmov (!%p463_p12), 0  }
 0x1b5   : > { %362 = sbr.rel (%p463_p12) target bundleno = 575 (0x23f), region = 56  ;;  %v363_v43 = vld [vmem:[#allocation4] sm:$0xff] (!%p463_p12)  ;;  %515 = vset.pattern.permute.xlu0 (!%p463_p12), %v558_v44 }
 0x1b6   : > { %366 = vperm.xlu0 (!%p463_p12), %515, %v363_v43  }
 0x1b9   : > { %v371_v45 = vld [vmem:[#allocation5] sm:$0xff] (!%p463_p12) }
 0x1ba   : > { %374 = vperm.xlu0 (!%p463_p12), %515, %v371_v45  }
 0x235   : > { %v367_v46 = vpop.permute.xlu0 %366 }
 0x236   : > { %v369_v47 = vmul.f32 %v367_v46, %v640_v6  ;;  %v370_v48 = vmul.f32 %v367_v46, %v642_v7 }
 0x239   : > { %v375_v49 = vpop.permute.xlu0 %374 }
 0x23a   : > { %v377_v50 = vadd.f32 %v375_v49, %v369_v47  ;;  %v378_v51 = vadd.f32 %v375_v49, %v370_v48 }
 0x23c   : > { %v379_v52 = vmax.f32 %v377_v50, 0.0  ;;  %v380_v53 = vmax.f32 %v378_v51, 0.0 }
 0x23e   : > { %381 = vst [vmem:[%s631_s8] sm:$0xff] %v379_v52  ;;  %382 = vst [vmem:[%s631_s8 + $0x8] sm:$0xff] %v380_v53 }
 0x23f PF: > { %s15_s22 = sadd.s32 1, %s554_s22   ;;  %s687_s18 = smov %s546_s20 }
 0x240   : > { %p12_p13 = scmp.ge.s32.totalorder %s15_s22, 6   ;;  %s688_s19 = smov %s550_s21 }
 0x241   : > { %s689_s20 = smov %s692_s23  ;;  %s690_s21 = smov %s696_s24 }
 0x242   :  { %14 = sbr.rel (!%p12_p13) target bundleno = 3 (0x3), region = 86 }

// kernel: forward.9
= control target key start
LH: loop header
LB: loop body
LE: loop exit
PB: predicated region body
PF: predicated region fallthrough
CT: control target
= control target key end

     0   :  { %s1695_s18 = smov 0   ;;  %s1697_s19 = smov 0   ;;  %s1900_s0 = inlined_call_operand.vmem [shape: bf16[9,8,8], index: 0, kind: input, shape index: {}]   ;;  %s1901_s1 = inlined_call_operand.vmem [shape: bf16[2,8,362], index: 1, kind: input, shape index: {}]   ;;  %s1902_s2 = inlined_call_operand.vmem [shape: f32[8,1], index: 2, kind: input, shape index: {}]   ;;  %s1903_s3 = inlined_call_operand.vmem [shape: f32[8,1], index: 3, kind: input, shape index: {}]   ;;  %s1904_s4 = inlined_call_operand.vmem [shape: f32[1,324], index: 4, kind: input, shape index: {}]   ;;  %s1905_s5 = inlined_call_operand.vmem [shape: f32[2,8,324], index: 5, kind: output, shape index: {}]  }
   0x1   :  { %s1699_s20 = smov 0   ;;  %s1701_s21 = smov 0  }
   0x2   :  { %s1703_s22 = smov 0  }
   0x3 LB: > { %s24_s23 = sadd.s32 1, %s1642_s20  ;;  %s27_s24 = sadd.s32 1, %s1646_s21  ;;  %s1650_s22 = sphi %s1703_s22, %s15_s22   ;;  %s1646_s21 = sphi %s1701_s21, %s1909_s21   ;;  %s1642_s20 = sphi %s1699_s20, %s1908_s20   ;;  %s1638_s19 = sphi %s1697_s19, %s1907_s19   ;;  %s1634_s18 = sphi %s1695_s18, %s1906_s18  }
   0x4   : > { %p25_p0 = scmp.ge.s32.totalorder %s24_s23, 2  ;;  %p1370_p1 = scmp.ge.s32.totalorder %s1650_s22, 1 }
   0x5   : > { %p199_p2 = scmp.lt.s32.totalorder %s1650_s22, 5 }
   0x6   : > { %s1911_s23 = smov (%p25_p0, %s24_s23), 0  ;;  %s1913_s24 = smov (!%p25_p0, %s27_s24), %s1646_s21 }
   0x7   : > { %p200_p3 = pnand %p1370_p1, %p199_p2  ;;  %p29_p4 = scmp.ge.s32.totalorder %s1913_s24, 2 }
   0x8   : > { %p227_p5 = scmp.lt.s32.totalorder (!%p200_p3), %s1634_s18, 1  ;;  %v1652_v0 = vmov (!%p200_p3), 0.0   ;;  %vm1653_vm0 = vmmov (!%p200_p3), 0   ;;  %v1654_v1 = vmov (!%p200_p3), 0   ;;  %s1655_s9 = smov (!%p200_p3), 127   ;;  %vm264_vm1 = vcmask (!%p200_p3), 1043456  }
   0x9   : > { %s1915_s24 = smov (%p29_p4, %s1913_s24), 0  ;;  %203 = sbr.rel (%p200_p3) target bundleno = 795 (0x31b), region = 40 }
   0xa   : > { %1433 = vmatprep.subr.bf16.mxu1 (!%p200_p3), %v1652_v0  ;;  %1435 = vmatprep.mubr.msk.bf16.mxu1 (!%p200_p3), %vm1653_vm0, %v1652_v0  ;;  %s1656_s10 = smov (!%p200_p3), 126   ;;  %s1657_s11 = smov (!%p200_p3), 110   ;;  %v1373_v9 = vld [vmem:[%s1900_s0 + $0x4] sm:$0xf] (!%p200_p3)  ;;  %vm260_vm2 = vcmask (!%p200_p3), 64512   ;;  %vm257_vm3 = vcmask (!%p200_p3), 1039360  }
   0xb   : > { %306 = vmatprep.mubr.bf16.mxu0 (!%p200_p3), %v1654_v1  ;;  %s1658_s12 = smov (!%p200_p3), 109   ;;  %s1659_s13 = smov (!%p200_p3), 108   ;;  %vm456_vm4 = vcmask (!%p200_p3), 1031168   ;;  %v240_v21 = vld [vmem:[%s1900_s0] sm:$0xf] (!%p200_p3)  ;;  %vm563_vm5 = vcmask (!%p200_p3), 900096  }
   0xc   : > { %s1660_s14 = smov (!%p200_p3), 92   ;;  %s1661_s15 = smov (!%p200_p3), 91   ;;  %v1383_v29 = vld [vmem:[%s1900_s0 + $0x8] sm:$0xf] (!%p200_p3)  ;;  %vm670_vm6 = vcmask (!%p200_p3), 891904   ;;  %vm777_vm7 = vcmask (!%p200_p3), 883712  }
   0xd   : > { %s1662_s16 = smov (!%p200_p3), 90   ;;  %v1387_v37 = vld [vmem:[%s1900_s0 + $0xc] sm:$0xf] (!%p200_p3)  ;;  %v1391_v45 = vld [vmem:[%s1900_s0 + $0x10] sm:$0xf] (!%p200_p3)  ;;  %vm884_vm8 = vcmask (!%p200_p3), 752640  }
   0xe   : > { %v1395_v53 = vld [vmem:[%s1900_s0 + $0x14] sm:$0xf] (!%p200_p3)  ;;  %vm991_vm9 = vcmask (!%p200_p3), 744448   ;;  %v1399_v61 = vld [vmem:[%s1900_s0 + $0x18] sm:$0xf] (!%p200_p3)  ;;  %vm1098_vm10 = vcmask (!%p200_p3), 736256  }
   0xf   : > { %p1197_p6 = scmp.eq.s32.totalorder (!%p200_p3), %s1638_s19, 0  ;;  %p1198_p7 = scmp.eq.s32.totalorder (!%p200_p3), %s1634_s18, 0 }
  0x10   : > { %s228_s25 = scalar_select %p227_p5, %s1634_s18, 1 }
  0x11   : > { %p1199_p8 = pnand %p1198_p7, %p1197_p6 }
  0x12   : > { %s1551_s26 = smul.u32 12, %s228_s25  ;;  %vm1203_vm11 = vcmask (!%p1199_p8), 7168  }
  0x13   : > { %s1552_s27 = smul.u32 24, %s228_s25 }
  0x14   : > { %s231_s30 = scalar_lea.vmem %s1901_s1, %s1551_s26 }
  0x15   : > { %s1741_s8 = scalar_lea.vmem %s1905_s5, %s1552_s27  ;;  %v1606_v2 = vld [vmem:[%s231_s30 + $0x8] ss:$0 sps:$4 sm:$0xff]   ;;  %v238_v3 = vld [vmem:[%s231_s30] sm:$0xff] }
  0x16   : > { %v1374_v4 = vcombine.low %v238_v3, %v238_v3  ;;  %255 = vrot.lane.b32.xlu1 %v1606_v2, %s1655_s9  ;;  %v1375_v5 = vcombine.high %v238_v3, %v238_v3  ;;  %v365_v10 = vsel %vm264_vm1, %v1606_v2, 0 }
  0x18   : > { %251 = vrot.lane.b32.xlu0 %v1374_v4, %s1655_s9  ;;  %v359_v17 = vsel %vm264_vm1, %v1374_v4, 0 }
  0x1a   : > { %450 = vrot.lane.b32.xlu1 %v1374_v4, %s1656_s10 }
  0x1c   : > { %253 = vrot.lane.b32.xlu0 %v1375_v5, %s1655_s9 }
  0x1e   : > { %454 = vrot.lane.b32.xlu1 %v1606_v2, %s1656_s10 }
  0x20   : > { %452 = vrot.lane.b32.xlu0 %v1375_v5, %s1656_s10 }
  0x22   : > { %559 = vrot.lane.b32.xlu1 %v1375_v5, %s1657_s11 }
  0x24   : > { %557 = vrot.lane.b32.xlu0 %v1374_v4, %s1657_s11 }
  0x26   : > { %664 = vrot.lane.b32.xlu1 %v1374_v4, %s1658_s12 }
  0x28   : > { %561 = vrot.lane.b32.xlu0 %v1606_v2, %s1657_s11 }
  0x2a   : > { %668 = vrot.lane.b32.xlu1 %v1606_v2, %s1658_s12 }
  0x2c   : > { %666 = vrot.lane.b32.xlu0 %v1375_v5, %s1658_s12 }
  0x2e   : > { %773 = vrot.lane.b32.xlu1 %v1375_v5, %s1659_s13 }
  0x30   : > { %771 = vrot.lane.b32.xlu0 %v1374_v4, %s1659_s13 }
  0x32   : > { %878 = vrot.lane.b32.xlu1 %v1374_v4, %s1660_s14 }
  0x34   : > { %775 = vrot.lane.b32.xlu0 %v1606_v2, %s1659_s13 }
  0x36   : > { %882 = vrot.lane.b32.xlu1 %v1606_v2, %s1660_s14 }
  0x38   : > { %880 = vrot.lane.b32.xlu0 %v1375_v5, %s1660_s14 }
  0x3a   : > { %987 = vrot.lane.b32.xlu1 %v1375_v5, %s1661_s15 }
  0x3c   : > { %985 = vrot.lane.b32.xlu0 %v1374_v4, %s1661_s15 }
  0x3e   : > { %1092 = vrot.lane.b32.xlu1 %v1374_v4, %s1662_s16 }
  0x40   : > { %989 = vrot.lane.b32.xlu0 %v1606_v2, %s1661_s15 }
  0x42   : > { %1096 = vrot.lane.b32.xlu1 %v1606_v2, %s1662_s16 }
  0x44   : > { %1094 = vrot.lane.b32.xlu0 %v1375_v5, %s1662_s16 }
  0x88   : > { %v256_v6 = vpop.permute.xlu1 %255 }
  0x89   : > { %v272_v8 = vsel %vm264_vm1, %v256_v6, 0 }
  0x8a   : > { %v252_v7 = vpop.permute.xlu0 %251  ;;  %1434 = vmatpush3.bf16.msra.mxu1 %v272_v8 }
  0x8b   : > { %1439 = vmatprep.subr.bf16.mxu1 %v1652_v0 }
  0x8c   : > { %v451_v11 = vpop.permute.xlu1 %450 }
  0x8d   : > { %1436 = vmatmul.mubr.msk.bf16.vlgmr.msra.gmra.mrb[0].mxu1 %vm260_vm2, %v1373_v9 }
  0x8e   : > { %v254_v12 = vpop.permute.xlu0 %253  ;;  %1440 = vmatpush3.bf16.msra.mxu1 %v365_v10  ;;  %1441 = vmatprep.mubr.msk.bf16.mxu1 %vm1653_vm0, %v1652_v0  ;;  %v1407_v10 = vld [vmem:[%s1900_s0 + $0x20] sm:$0xf] }
  0x8f   : > { %v259_v13 = vsel %vm257_vm3, %v254_v12, %v256_v6  ;;  %v258_v14 = vsel %vm257_vm3, %v252_v7, %v254_v12  ;;  %1445 = vmatprep.subr.bf16.mxu1 %v1652_v0  ;;  %v1403_v6 = vld [vmem:[%s1900_s0 + $0x1c] sm:$0xf] }
  0x90   : > { %1377 = vmatprep.subr.msk.bf16.mxu0 %vm264_vm1, %v259_v13  ;;  %v266_v15 = vsel %vm264_vm1, %v258_v14, 0  ;;  %v455_v16 = vpop.permute.xlu1 %454 }
  0x91   : > { %275 = vmatpush1.bf16.msra.mxu0 %v266_v15  ;;  %v469_v22 = vsel %vm264_vm1, %v455_v16, 0 }
  0x92   : > { %1380 = vmatprep.subr.msk.bf16.mxu0 %vm264_vm1, %v1375_v5  ;;  %v453_v18 = vpop.permute.xlu0 %452 }
  0x93   : > { %v458_v19 = vsel %vm456_vm4, %v453_v18, %v455_v16  ;;  %v457_v23 = vsel %vm456_vm4, %v451_v11, %v453_v18 }
  0x94   : > { %1378 = vmatmul.mubr.msk.bf16.vlgmr.msra.gmra.mrb[0].mxu0 %vm260_vm2, %v1373_v9  ;;  %v560_v24 = vpop.permute.xlu1 %559  ;;  %v463_v26 = vsel %vm264_vm1, %v457_v23, 0 }
  0x95   : > { %368 = vmatpush1.bf16.msra.mxu0 %v359_v17  ;;  %399 = vmatprep.mubr.bf16.mxu0 %v1654_v1  ;;  %v1663_v17 = vmov (!%p1199_p8), 0.0  }
  0x96   : > { %1384 = vmatprep.subr.msk.bf16.mxu0 %vm264_vm1, %v458_v19  ;;  %v558_v20 = vpop.permute.xlu0 %557  ;;  %1204 = vst.msk [vmem:[#allocation2] sm:$0xff] (!%p1199_p8), %vm1203_vm11, %v1663_v17  ;;  %1205 = vst.msk [vmem:[#allocation3] sm:$0xff] (!%p1199_p8), %vm1203_vm11, %v1663_v17 }
  0x97   : > { %v564_v31 = vsel %vm563_vm5, %v558_v20, %v560_v24 }
  0x98   : > { %v665_v28 = vpop.permute.xlu1 %664  ;;  %v570_v34 = vsel %vm264_vm1, %v564_v31, 0 }
  0x99   : > { %1442 = vmatmul.mubr.msk.bf16.vlgmr.msra.gmra.mrb[0].mxu1 %vm260_vm2, %v240_v21 }
  0x9a   : > { %1446 = vmatpush3.bf16.msra.mxu1 %v469_v22  ;;  %1447 = vmatprep.mubr.msk.bf16.mxu1 %vm1653_vm0, %v1652_v0  ;;  %v562_v25 = vpop.permute.xlu0 %561 }
  0x9b   : > { %1451 = vmatprep.subr.bf16.mxu1 %v1652_v0  ;;  %v565_v27 = vsel %vm563_vm5, %v560_v24, %v562_v25  ;;  %v576_v30 = vsel %vm264_vm1, %v562_v25, 0 }
  0x9c   : > { %v669_v33 = vpop.permute.xlu1 %668 }
  0x9d   : > { %v683_v38 = vsel %vm264_vm1, %v669_v33, 0 }
  0x9e   : > { %v667_v32 = vpop.permute.xlu0 %666 }
  0x9f   : > { %v672_v35 = vsel %vm670_vm6, %v667_v32, %v669_v33  ;;  %v671_v39 = vsel %vm670_vm6, %v665_v28, %v667_v32 }
  0xa0   : > { %1381 = vmatmul.mubr.msk.bf16.vlgmr.msra.gmra.mrb[0].mxu0 %vm260_vm2, %v240_v21  ;;  %v774_v40 = vpop.permute.xlu1 %773  ;;  %v677_v42 = vsel %vm264_vm1, %v671_v39, 0 }
  0xa1   : > { %472 = vmatpush1.bf16.msra.mxu0 %v463_v26  ;;  %503 = vmatprep.mubr.bf16.mxu0 %v1654_v1 }
  0xa2   : > { %1388 = vmatprep.subr.msk.bf16.mxu0 %vm264_vm1, %v565_v27  ;;  %v772_v36 = vpop.permute.xlu0 %771 }
  0xa3   : > { %v778_v47 = vsel %vm777_vm7, %v772_v36, %v774_v40 }
  0xa4   : > { %v879_v44 = vpop.permute.xlu1 %878  ;;  %v784_v50 = vsel %vm264_vm1, %v778_v47, 0 }
  0xa5   : > { %1448 = vmatmul.mubr.msk.bf16.vlgmr.msra.gmra.mrb[0].mxu1 %vm260_vm2, %v1383_v29 }
  0xa6   : > { %1452 = vmatpush3.bf16.msra.mxu1 %v576_v30  ;;  %1453 = vmatprep.mubr.msk.bf16.mxu1 %vm1653_vm0, %v1652_v0  ;;  %v776_v41 = vpop.permute.xlu0 %775 }
  0xa7   : > { %1457 = vmatprep.subr.bf16.mxu1 %v1652_v0  ;;  %v779_v43 = vsel %vm777_vm7, %v774_v40, %v776_v41  ;;  %v790_v46 = vsel %vm264_vm1, %v776_v41, 0 }
  0xa8   : > { %v883_v49 = vpop.permute.xlu1 %882 }
  0xa9   : > { %v897_v54 = vsel %vm264_vm1, %v883_v49, 0 }
  0xaa   : > { %v881_v48 = vpop.permute.xlu0 %880 }
  0xab   : > { %v886_v51 = vsel %vm884_vm8, %v881_v48, %v883_v49  ;;  %v885_v55 = vsel %vm884_vm8, %v879_v44, %v881_v48 }
  0xac   : > { %1385 = vmatmul.mubr.msk.bf16.vlgmr.msra.gmra.mrb[0].mxu0 %vm260_vm2, %v1383_v29  ;;  %v988_v56 = vpop.permute.xlu1 %987  ;;  %v891_v58 = vsel %vm264_vm1, %v885_v55, 0 }
  0xad   : > { %579 = vmatpush1.bf16.msra.mxu0 %v570_v34  ;;  %610 = vmatprep.mubr.bf16.mxu0 %v1654_v1 }
  0xae   : > { %1392 = vmatprep.subr.msk.bf16.mxu0 %vm264_vm1, %v672_v35  ;;  %v986_v52 = vpop.permute.xlu0 %985 }
  0xaf   : > { %v992_v63 = vsel %vm991_vm9, %v986_v52, %v988_v56 }
  0xb0   : > { %v1093_v60 = vpop.permute.xlu1 %1092  ;;  %v998_v4 = vsel %vm264_vm1, %v992_v63, 0 }
  0xb1   : > { %1454 = vmatmul.mubr.msk.bf16.vlgmr.msra.gmra.mrb[0].mxu1 %vm260_vm2, %v1387_v37 }
  0xb2   : > { %1458 = vmatpush3.bf16.msra.mxu1 %v683_v38  ;;  %1459 = vmatprep.mubr.msk.bf16.mxu1 %vm1653_vm0, %v1652_v0  ;;  %v990_v57 = vpop.permute.xlu0 %989 }
  0xb3   : > { %1463 = vmatprep.subr.bf16.mxu1 %v1652_v0  ;;  %v993_v59 = vsel %vm991_vm9, %v988_v56, %v990_v57  ;;  %v1004_v62 = vsel %vm264_vm1, %v990_v57, 0 }
  0xb4   : > { %v1097_v3 = vpop.permute.xlu1 %1096 }
  0xb5   : > { %v1111_v7 = vsel %vm264_vm1, %v1097_v3, 0 }
  0xb6   : > { %v1095_v2 = vpop.permute.xlu0 %1094 }
  0xb7   : > { %v1100_v5 = vsel %vm1098_vm10, %v1095_v2, %v1097_v3  ;;  %v1099_v8 = vsel %vm1098_vm10, %v1093_v60, %v1095_v2 }
  0xb8   : > { %1389 = vmatmul.mubr.msk.bf16.vlgmr.msra.gmra.mrb[0].mxu0 %vm260_vm2, %v1387_v37  ;;  %v1105_v9 = vsel %vm264_vm1, %v1099_v8, 0 }
  0xb9   : > { %686 = vmatpush1.bf16.msra.mxu0 %v677_v42  ;;  %717 = vmatprep.mubr.bf16.mxu0 %v1654_v1 }
  0xba   : > { %1396 = vmatprep.subr.msk.bf16.mxu0 %vm264_vm1, %v779_v43 }
  0xbd   : > { %1460 = vmatmul.mubr.msk.bf16.vlgmr.msra.gmra.mrb[0].mxu1 %vm260_vm2, %v1391_v45 }
  0xbe   : > { %1464 = vmatpush3.bf16.msra.mxu1 %v790_v46  ;;  %1465 = vmatprep.mubr.msk.bf16.mxu1 %vm1653_vm0, %v1652_v0 }
  0xbf   : > { %1469 = vmatprep.subr.bf16.mxu1 %v1652_v0 }
  0xc4   : > { %1393 = vmatmul.mubr.msk.bf16.vlgmr.msra.gmra.mrb[0].mxu0 %vm260_vm2, %v1391_v45 }
  0xc5   : > { %793 = vmatpush1.bf16.msra.mxu0 %v784_v50  ;;  %824 = vmatprep.mubr.bf16.mxu0 %v1654_v1 }
  0xc6   : > { %1400 = vmatprep.subr.msk.bf16.mxu0 %vm264_vm1, %v886_v51 }
  0xc9   : > { %1466 = vmatmul.mubr.msk.bf16.vlgmr.msra.gmra.mrb[0].mxu1 %vm260_vm2, %v1395_v53 }
  0xca   : > { %1470 = vmatpush3.bf16.msra.mxu1 %v897_v54  ;;  %1471 = vmatprep.mubr.msk.bf16.mxu1 %vm1653_vm0, %v1652_v0 }
  0xcb   : > { %1475 = vmatprep.subr.bf16.mxu1 %v1652_v0 }
  0xd0   : > { %1397 = vmatmul.mubr.msk.bf16.vlgmr.msra.gmra.mrb[0].mxu0 %vm260_vm2, %v1395_v53 }
  0xd1   : > { %900 = vmatpush1.bf16.msra.mxu0 %v891_v58  ;;  %931 = vmatprep.mubr.bf16.mxu0 %v1654_v1 }
  0xd2   : > { %1404 = vmatprep.subr.msk.bf16.mxu0 %vm264_vm1, %v993_v59 }
  0xd5   : > { %1472 = vmatmul.mubr.msk.bf16.vlgmr.msra.gmra.mrb[0].mxu1 %vm260_vm2, %v1399_v61 }
  0xd6   : > { %1476 = vmatpush3.bf16.msra.mxu1 %v1004_v62  ;;  %1477 = vmatprep.mubr.msk.bf16.mxu1 %vm1653_vm0, %v1652_v0 }
  0xd7   : > { %1481 = vmatprep.subr.bf16.mxu1 %v1652_v0 }
  0xdc   : > { %1401 = vmatmul.mubr.msk.bf16.vlgmr.msra.gmra.mrb[0].mxu0 %vm260_vm2, %v1399_v61 }
  0xdd   : > { %1007 = vmatpush1.bf16.msra.mxu0 %v998_v4  ;;  %1038 = vmatprep.mubr.bf16.mxu0 %v1654_v1 }
  0xde   : > { %1408 = vmatprep.subr.msk.bf16.mxu0 %vm264_vm1, %v1100_v5 }
  0xe1   : > { %1478 = vmatmul.mubr.msk.bf16.vlgmr.msra.gmra.mrb[0].mxu1 %vm260_vm2, %v1403_v6 }
  0xe2   : > { %1482 = vmatpush3.bf16.msra.mxu1 %v1111_v7  ;;  %1483 = vmatprep.mubr.msk.bf16.mxu1 %vm1653_vm0, %v1652_v0 }
  0xe8   : > { %1405 = vmatmul.mubr.msk.bf16.vlgmr.msra.gmra.mrb[0].mxu0 %vm260_vm2, %v1403_v6 }
  0xe9   : > { %1114 = vmatpush1.bf16.msra.mxu0 %v1105_v9  ;;  %1145 = vmatprep.mubr.bf16.mxu0 %v1654_v1 }
  0xed   : > { %1484 = vmatmul.mubr.msk.bf16.vlgmr.msra.gmra.mrb[0].mxu1 %vm260_vm2, %v1407_v10 }
  0xf4   : > { %1409 = vmatmul.mubr.msk.bf16.vlgmr.msra.gmra.mrb[0].mxu0 %vm260_vm2, %v1407_v10 }
 0x1c0   : > { %v1853_v0 = vpop.f32.mrb[0].mxu1 }
 0x1c1   : > { %v1485_v11 = vpop.f32.mrb[1].mxu1 }
 0x1c2   : > { %v1191_v12 = vpop.f32.mrb[2].mxu1 }
 0x1c3   : > { %v1486_v13 = vpop.f32.mrb[3].mxu1 }
 0x1c4   : > { %1202 = sbr.rel (%p1199_p8) target bundleno = 459 (0x1cb), region = 44 }
 0x1c7   : > { %v1855_v14 = vpop.f32.mrb[0].mxu0 }
 0x1c8   : > { %v1857_v1 = vpop.f32.mrb[1].mxu0 }
 0x1c9   : > { %v1151_v15 = vpop.f32.mrb[2].mxu0 }
 0x1ca   : > { %v1152_v16 = vpop.f32.mrb[3].mxu0 }
 0x1cb PF: > { %p1411_p9 = scmp.ne.s32.totalorder %s1638_s19, 0 }
 0x1cc   : > { %v1211_v18 = vlaneseq (!%p1411_p9)  ;;  %v1209_v20 = vld [vmem:[%s1904_s4] sm:$0x7] (!%p1411_p9)  ;;  %vm1231_vm12 = vcmask (!%p1411_p9), 556032   ;;  %vm1237_vm13 = vcmask (!%p1411_p9), 7168   ;;  %v1239_v42 = vld [vmem:[#allocation3] sm:$0xff] (!%p1411_p9) }
 0x1cd   : > { %1208 = sbr.rel (%p1411_p9) target bundleno = 623 (0x26f), region = 48  ;;  %v1229_v39 = vld [vmem:[#allocation2] sm:$0xff] (!%p1411_p9) }
 0x1ce   : > { %v1212_v19 = vshrl.u32 (!%p1411_p9), %v1211_v18, 7 }
 0x1d0   : > { %v1213_v21 = vsub.s32 (!%p1411_p9), 0, %v1212_v19  ;;  %v1217_v22 = vsub.s32 (!%p1411_p9), 1, %v1212_v19  ;;  %v1221_v23 = vsub.s32 (!%p1411_p9), 2, %v1212_v19 }
 0x1d2   : > { %v1214_v24 = vrot.slane (!%p1411_p9), %v1209_v20, %v1213_v21  ;;  %v1218_v25 = vrot.slane (!%p1411_p9), %v1209_v20, %v1217_v22  ;;  %v1222_v26 = vrot.slane (!%p1411_p9), %v1209_v20, %v1221_v23 }
 0x1d4   : > { %v1226_v27 = vmul.f32 %v1214_v24, %v1855_v14  ;;  %v1227_v28 = vmul.f32 %v1218_v25, %v1857_v1  ;;  %v1228_v29 = vmul.f32 %v1222_v26, %v1853_v0 }
 0x1d6   : > { %v1230_v30 = vadd.f32 %v1227_v28, %v1226_v27  ;;  %v1232_v31 = vsel %vm1231_vm12, %v1228_v29, 0.0  ;;  %v1240_v32 = vmul.f32 %v1226_v27, %v1855_v14  ;;  %v1241_v33 = vmul.f32 %v1227_v28, %v1857_v1 }
 0x1d7   : > { %v1242_v34 = vmul.f32 %v1228_v29, %v1853_v0 }
 0x1d8   : > { %v1233_v35 = vadd.f32 %v1232_v31, %v1230_v30  ;;  %v1243_v36 = vadd.f32 %v1241_v33, %v1240_v32 }
 0x1d9   : > { %v1244_v37 = vsel %vm1231_vm12, %v1242_v34, 0.0 }
 0x1da   : > { %1234 = vadd.xlane.f32.xlu0 %v1233_v35  ;;  %v1245_v38 = vadd.f32 %v1244_v37, %v1243_v36 }
 0x1de   : > { %1246 = vadd.xlane.f32.xlu0 %v1245_v38 }
 0x267   : > { %v1235_v40 = vpop.xlane.xlu0 %1234 }
 0x268   : > { %v1236_v41 = vadd.f32 %v1235_v40, %v1229_v39 }
 0x26a   : > { %1238 = vst.msk [vmem:[#allocation2] sm:$0xff] %vm1237_vm13, %v1236_v41 }
 0x26b   : > { %v1247_v43 = vpop.xlane.xlu0 %1246 }
 0x26c   : > { %v1248_v44 = vadd.f32 %v1247_v43, %v1239_v42 }
 0x26e   : > { %1249 = vst.msk [vmem:[#allocation3] sm:$0xff] %vm1237_vm13, %v1248_v44 }
 0x26f PF: > { %p1250_p10 = scmp.eq.s32.totalorder %s1634_s18, 1 }
 0x271   : > { %p1251_p11 = pnand %p1250_p10, %p1197_p6 }
 0x272   : > { %v1255_v45 = vld [vmem:[#allocation2] sm:$0xff] (!%p1251_p11)  ;;  %vm1265_vm14 = vcmask (!%p1251_p11), 7168  }
 0x273   : > { %1254 = sbr.rel (%p1251_p11) target bundleno = 654 (0x28e), region = 52  ;;  %v1256_v47 = vmul.f32 (!%p1251_p11), 0.0078125, %v1255_v45  ;;  %v1261_v52 = vld [vmem:[%s1902_s2] sm:$0xff] (!%p1251_p11) }
 0x274   : > { %v1267_v55 = vld [vmem:[%s1903_s3] sm:$0xff] (!%p1251_p11) }
 0x275   : > { %v1257_v46 = vld [vmem:[#allocation3] sm:$0xff] (!%p1251_p11)  ;;  %v1259_v49 = vmul.f32 (!%p1251_p11), %v1256_v47, %v1256_v47 }
 0x276   : > { %v1258_v48 = vmul.f32 (!%p1251_p11), 0.0078125, %v1257_v46 }
 0x278   : > { %v1260_v50 = vsub.f32 (!%p1251_p11), %v1258_v48, %v1259_v49 }
 0x27a   : > { %v1262_v51 = vadd.f32 1e-05, %v1260_v50 }
 0x27c   : > { %1609 = vrsqrt.f32 %v1262_v51 }
 0x286   : > { %v1610_v53 = vpop.eup %1609 }
 0x287   : > { %v1264_v54 = vmul.f32 %v1610_v53, %v1261_v52 }
 0x289   : > { %1266 = vst.msk [vmem:[#allocation4] sm:$0xff] %vm1265_vm14, %v1264_v54  ;;  %v1268_v56 = vmul.f32 %v1264_v54, %v1256_v47 }
 0x28b   : > { %v1269_v57 = vsub.f32 %v1267_v55, %v1268_v56 }
 0x28d   : > { %1270 = vst.msk [vmem:[#allocation5] sm:$0xff] %vm1265_vm14, %v1269_v57 }
 0x28e PF: > { %p1412_p12 = scmp.ne.s32.totalorder %s1638_s19, 1 }
 0x28f   : > { %v1664_v59 = vmov (!%p1412_p12), 0   ;;  %vm1298_vm15 = vcmask (!%p1412_p12), 556032  }
 0x290   : > { %1274 = sbr.rel (%p1412_p12) target bundleno = 795 (0x31b), region = 56  ;;  %v1275_v58 = vld [vmem:[#allocation4] sm:$0xff] (!%p1412_p12)  ;;  %1611 = vset.pattern.permute.xlu0 (!%p1412_p12), %v1664_v59 }
 0x291   : > { %1278 = vperm.xlu0 (!%p1412_p12), %1611, %v1275_v58  }
 0x294   : > { %v1284_v60 = vld [vmem:[#allocation5] sm:$0xff] (!%p1412_p12) }
 0x295   : > { %1287 = vperm.xlu0 (!%p1412_p12), %1611, %v1284_v60  }
 0x310   : > { %v1279_v61 = vpop.permute.xlu0 %1278 }
 0x311   : > { %v1281_v62 = vmul.f32 %v1279_v61, %v1855_v14  ;;  %v1282_v63 = vmul.f32 %v1279_v61, %v1857_v1  ;;  %v1283_v2 = vmul.f32 %v1279_v61, %v1853_v0 }
 0x314   : > { %v1288_v3 = vpop.permute.xlu0 %1287 }
 0x315   : > { %v1290_v4 = vadd.f32 %v1288_v3, %v1281_v62  ;;  %v1291_v5 = vadd.f32 %v1288_v3, %v1282_v63  ;;  %v1292_v6 = vadd.f32 %v1288_v3, %v1283_v2 }
 0x317   : > { %v1293_v7 = vmax.f32 %v1290_v4, 0.0  ;;  %v1294_v8 = vmax.f32 %v1291_v5, 0.0  ;;  %v1295_v9 = vmax.f32 %v1292_v6, 0.0 }
 0x319   : > { %1296 = vst [vmem:[%s1741_s8] sm:$0xff] %v1293_v7  ;;  %1297 = vst [vmem:[%s1741_s8 + $0x8] sm:$0xff] %v1294_v8 }
 0x31a   : > { %1299 = vst.msk [vmem:[%s1741_s8 + $0x10] sm:$0xff] %vm1298_vm15, %v1295_v9 }
 0x31b PF: > { %s15_s22 = sadd.s32 1, %s1650_s22   ;;  %s1906_s18 = smov %s1642_s20 }
 0x31c   : > { %p12_p13 = scmp.ge.s32.totalorder %s15_s22, 6   ;;  %s1907_s19 = smov %s1646_s21 }
 0x31d   : > { %s1908_s20 = smov %s1911_s23  ;;  %s1909_s21 = smov %s1915_s24 }
 0x31e   :  { %14 = sbr.rel (!%p12_p13) target bundleno = 3 (0x3), region = 94 }

// kernel: forward.10
= control target key start
LH: loop header
LB: loop body
LE: loop exit
PB: predicated region body
PF: predicated region fallthrough
CT: control target
= control target key end

     0   :  { %s823_s21 = smov 0   ;;  %s825_s22 = smov 0   ;;  %s985_s0 = inlined_call_operand.vmem [shape: bf16[1,32,8], index: 0, kind: input, shape index: {}]   ;;  %s986_s1 = inlined_call_operand.vmem [shape: bf16[2,8,64], index: 1, kind: input, shape index: {}]   ;;  %s987_s2 = inlined_call_operand.vmem [shape: f32[32,1], index: 2, kind: input, shape index: {}]   ;;  %s988_s3 = inlined_call_operand.vmem [shape: f32[32,1], index: 3, kind: input, shape index: {}]   ;;  %s989_s4 = inlined_call_operand.vmem [shape: f32[1,64], index: 4, kind: input, shape index: {}]   ;;  %s990_s5 = inlined_call_operand.vmem [shape: f32[2,32,64], index: 5, kind: input, shape index: {}]   ;;  %s991_s6 = inlined_call_operand.vmem [shape: f32[2,32,64], index: 6, kind: output, shape index: {}]  }
   0x1   :  { %s827_s23 = smov 0   ;;  %s829_s24 = smov 0  }
   0x2   :  { %s831_s25 = smov 0  }
   0x3 LB: > { %s25_s26 = sadd.s32 1, %s776_s23  ;;  %s28_s27 = sadd.s32 1, %s780_s24  ;;  %s784_s25 = sphi %s831_s25, %s16_s25   ;;  %s780_s24 = sphi %s829_s24, %s995_s24   ;;  %s776_s23 = sphi %s827_s23, %s994_s23   ;;  %s772_s22 = sphi %s825_s22, %s993_s22   ;;  %s768_s21 = sphi %s823_s21, %s992_s21  }
   0x4   : > { %p26_p0 = scmp.ge.s32.totalorder %s25_s26, 2  ;;  %p665_p1 = scmp.ge.s32.totalorder %s784_s25, 1 }
   0x5   : > { %p233_p2 = scmp.lt.s32.totalorder %s784_s25, 5 }
   0x6   : > { %s997_s26 = smov (%p26_p0, %s25_s26), 0  ;;  %s999_s27 = smov (!%p26_p0, %s28_s27), %s780_s24 }
   0x7   : > { %p234_p3 = pnand %p665_p1, %p233_p2  ;;  %p30_p4 = scmp.ge.s32.totalorder %s999_s27, 2 }
   0x8   : > { %p267_p5 = scmp.lt.s32.totalorder (!%p234_p3), %s768_s21, 1  ;;  %v734_v0 = vld [vmem:[%s985_s0] sm:$0xff] (!%p234_p3)   ;;  %vm297_vm0 = vcmask (!%p234_p3), 64512   ;;  %vm304_vm1 = vcmask (!%p234_p3), 1043456   ;;  %v735_v3 = vld [vmem:[%s985_s0 + $0x8] sm:$0xff] (!%p234_p3)   ;;  %p357_p6 = scmp.eq.s32.totalorder (!%p234_p3), %s772_s22, 0 }
   0x9   : > { %s1001_s27 = smov (%p30_p4, %s999_s27), 0  ;;  %237 = sbr.rel (%p234_p3) target bundleno = 585 (0x249), region = 44 }
   0xa   : > { %687 = vmatprep.mubr.msk.bf16.mxu0 (!%p234_p3), %vm297_vm0, %v734_v0  ;;  %p358_p7 = scmp.eq.s32.totalorder (!%p234_p3), %s768_s21, 0 }
   0xc   : > { %p359_p8 = pnand (!%p234_p3), %p358_p7, %p357_p6 }
  0x10   : > { %s268_s30 = scalar_select %p267_p5, %s768_s21, 1 }
  0x11   : > { %vm363_vm2 = vcmask (!%p359_p8), 7168   ;;  %v786_v8 = vmov (!%p359_p8), 0.0  }
  0x12   : > { %s666_s7 = sshll.u32 %s268_s30, 2  ;;  %s680_s8 = sshll.u32 %s268_s30, 5  ;;  %364 = vst.msk [vmem:[#allocation2] sm:$0xff] (!%p359_p8), %vm363_vm2, %v786_v8  ;;  %365 = vst.msk [vmem:[#allocation2 + $0x8] sm:$0xff] (!%p359_p8), %vm363_vm2, %v786_v8 }
  0x13   : > { %s270_s11 = scalar_lea.vmem %s986_s1, %s666_s7  ;;  %s868_s14 = scalar_lea.vmem %s990_s5, %s680_s8  ;;  %366 = vst.msk [vmem:[#allocation2 + $0x10] sm:$0xff] (!%p359_p8), %vm363_vm2, %v786_v8  ;;  %367 = vst.msk [vmem:[#allocation2 + $0x18] sm:$0xff] (!%p359_p8), %vm363_vm2, %v786_v8 }
  0x14   : > { %s873_s17 = scalar_lea.vmem %s991_s6, %s680_s8  ;;  %v282_v1 = vld [vmem:[%s270_s11] sm:$0xf]  ;;  %368 = vst.msk [vmem:[#allocation3] sm:$0xff] (!%p359_p8), %vm363_vm2, %v786_v8  ;;  %369 = vst.msk [vmem:[#allocation3 + $0x8] sm:$0xff] (!%p359_p8), %vm363_vm2, %v786_v8 }
  0x15   : > { %691 = vmatprep.subr.msk.bf16.mxu0 %vm304_vm1, %v282_v1  ;;  %v306_v2 = vsel %vm304_vm1, %v282_v1, 0  ;;  %370 = vst.msk [vmem:[#allocation3 + $0x10] sm:$0xff] (!%p359_p8), %vm363_vm2, %v786_v8  ;;  %371 = vst.msk [vmem:[#allocation3 + $0x18] sm:$0xff] (!%p359_p8), %vm363_vm2, %v786_v8 }
  0x16   : > { %686 = vmatpush3.bf16.msra.mxu0 %v306_v2 }
  0x19   : > { %688 = vmatmul.mubr.msk.bf16.vlgmr.msra.gmra.mrb[0].mxu0 %vm297_vm0, %v735_v3 }
  0xe9   : > { %362 = sbr.rel (%p359_p8) target bundleno = 240 (0xf0), region = 48 }
  0xec   : > { %v882_v4 = vpop.f32.mrb[0].mxu0 }
  0xed   : > { %v884_v5 = vpop.f32.mrb[1].mxu0 }
  0xee   : > { %v886_v6 = vpop.f32.mrb[2].mxu0 }
  0xef   : > { %v888_v7 = vpop.f32.mrb[3].mxu0 }
  0xf0 PF: > { %p675_p9 = scmp.ne.s32.totalorder %s772_s22, 0 }
  0xf1   : > { %v676_v9 = vld [vmem:[%s989_s4] ss:$0 sm:$0xff] (!%p675_p9)  ;;  %vm390_vm3 = vcmask (!%p675_p9), 523264   ;;  %v388_v26 = vld [vmem:[#allocation2 + $0x10] sm:$0xff] (!%p675_p9)  ;;  %vm407_vm4 = vcmask (!%p675_p9), 7168   ;;  %v389_v32 = vld [vmem:[#allocation2 + $0x18] sm:$0xff] (!%p675_p9) }
  0xf2   : > { %374 = sbr.rel (%p675_p9) target bundleno = 402 (0x192), region = 52  ;;  %v384_v10 = vmul.f32 (!%p675_p9), %v882_v4, %v676_v9  ;;  %v382_v11 = vmul.f32 (!%p675_p9), %v676_v9, %v884_v5  ;;  %v385_v12 = vmul.f32 (!%p675_p9), %v886_v6, %v676_v9  ;;  %v383_v13 = vmul.f32 (!%p675_p9), %v676_v9, %v888_v7  ;;  %v386_v27 = vld [vmem:[#allocation2] sm:$0xff] (!%p675_p9)  ;;  %v387_v33 = vld [vmem:[#allocation2 + $0x8] sm:$0xff] (!%p675_p9)  ;;  %v415_v44 = vld [vmem:[#allocation3 + $0x18] sm:$0xff] (!%p675_p9) }
  0xf3   : > { %v413_v38 = vld [vmem:[#allocation3 + $0x8] sm:$0xff] (!%p675_p9)  ;;  %v412_v39 = vld [vmem:[#allocation3] sm:$0xff] (!%p675_p9)  ;;  %v414_v45 = vld [vmem:[#allocation3 + $0x10] sm:$0xff] (!%p675_p9) }
  0xf4   : > { %v397_v14 = vsel (!%p675_p9), %vm390_vm3, %v384_v10, 0.0  ;;  %v391_v15 = vsel (!%p675_p9), %vm390_vm3, %v382_v11, 0.0  ;;  %v400_v16 = vsel (!%p675_p9), %vm390_vm3, %v385_v12, 0.0  ;;  %v394_v17 = vsel (!%p675_p9), %vm390_vm3, %v383_v13, 0.0 }
  0xf5   : > { %398 = vadd.xlane.f32.xlu1 (!%p675_p9), %v397_v14  ;;  %392 = vadd.xlane.f32.xlu0 (!%p675_p9), %v391_v15  ;;  %v417_v18 = vmul.f32 (!%p675_p9), %v383_v13, %v888_v7  ;;  %v416_v19 = vmul.f32 (!%p675_p9), %v382_v11, %v884_v5  ;;  %v419_v22 = vmul.f32 (!%p675_p9), %v886_v6, %v385_v12 }
  0xf6   : > { %v418_v23 = vmul.f32 (!%p675_p9), %v882_v4, %v384_v10 }
  0xf7   : > { %v423_v20 = vsel (!%p675_p9), %vm390_vm3, %v417_v18, 0.0  ;;  %v420_v21 = vsel (!%p675_p9), %vm390_vm3, %v416_v19, 0.0  ;;  %v429_v24 = vsel (!%p675_p9), %vm390_vm3, %v419_v22, 0.0 }
  0xf8   : > { %v426_v25 = vsel (!%p675_p9), %vm390_vm3, %v418_v23, 0.0 }
  0xf9   : > { %401 = vadd.xlane.f32.xlu1 %v400_v16  ;;  %395 = vadd.xlane.f32.xlu0 %v394_v17 }
  0xfd   : > { %424 = vadd.xlane.f32.xlu1 %v423_v20  ;;  %421 = vadd.xlane.f32.xlu0 %v420_v21 }
 0x101   : > { %430 = vadd.xlane.f32.xlu1 %v429_v24  ;;  %427 = vadd.xlane.f32.xlu0 %v426_v25 }
 0x182   : > { %v399_v28 = vpop.xlane.xlu1 %398  ;;  %v393_v29 = vpop.xlane.xlu0 %392 }
 0x183   : > { %v405_v30 = vadd.f32 %v399_v28, %v388_v26  ;;  %v403_v31 = vadd.f32 %v393_v29, %v386_v27 }
 0x185   : > { %410 = vst.msk [vmem:[#allocation2 + $0x10] sm:$0xff] %vm407_vm4, %v405_v30  ;;  %408 = vst.msk [vmem:[#allocation2] sm:$0xff] %vm407_vm4, %v403_v31 }
 0x186   : > { %v402_v34 = vpop.xlane.xlu1 %401  ;;  %v396_v35 = vpop.xlane.xlu0 %395 }
 0x187   : > { %v406_v36 = vadd.f32 %v402_v34, %v389_v32  ;;  %v404_v37 = vadd.f32 %v396_v35, %v387_v33 }
 0x189   : > { %411 = vst.msk [vmem:[#allocation2 + $0x18] sm:$0xff] %vm407_vm4, %v406_v36  ;;  %409 = vst.msk [vmem:[#allocation2 + $0x8] sm:$0xff] %vm407_vm4, %v404_v37 }
 0x18a   : > { %v425_v40 = vpop.xlane.xlu1 %424  ;;  %v422_v41 = vpop.xlane.xlu0 %421 }
 0x18b   : > { %v433_v42 = vadd.f32 %v425_v40, %v413_v38  ;;  %v432_v43 = vadd.f32 %v422_v41, %v412_v39 }
 0x18d   : > { %437 = vst.msk [vmem:[#allocation3 + $0x8] sm:$0xff] %vm407_vm4, %v433_v42  ;;  %436 = vst.msk [vmem:[#allocation3] sm:$0xff] %vm407_vm4, %v432_v43 }
 0x18e   : > { %v431_v46 = vpop.xlane.xlu1 %430  ;;  %v428_v47 = vpop.xlane.xlu0 %427 }
 0x18f   : > { %v435_v48 = vadd.f32 %v431_v46, %v415_v44  ;;  %v434_v49 = vadd.f32 %v428_v47, %v414_v45 }
 0x191   : > { %439 = vst.msk [vmem:[#allocation3 + $0x18] sm:$0xff] %vm407_vm4, %v435_v48  ;;  %438 = vst.msk [vmem:[#allocation3 + $0x10] sm:$0xff] %vm407_vm4, %v434_v49 }
 0x192 PF: > { %p440_p10 = scmp.eq.s32.totalorder %s768_s21, 1 }
 0x194   : > { %p441_p11 = pnand %p440_p10, %p357_p6 }
 0x195   : > { %v445_v50 = vld [vmem:[#allocation2] sm:$0xff] (!%p441_p11)  ;;  %v446_v54 = vld [vmem:[#allocation2 + $0x8] sm:$0xff] (!%p441_p11)  ;;  %v447_v58 = vld [vmem:[#allocation2 + $0x10] sm:$0xff] (!%p441_p11)  ;;  %vm485_vm5 = vcmask (!%p441_p11), 7168  }
 0x196   : > { %444 = sbr.rel (%p441_p11) target bundleno = 435 (0x1b3), region = 56  ;;  %v453_v51 = vld [vmem:[#allocation3] sm:$0xff] (!%p441_p11)  ;;  %v449_v52 = vmul.f32 (!%p441_p11), 0.0078125, %v445_v50  ;;  %v454_v55 = vld [vmem:[#allocation3 + $0x8] sm:$0xff] (!%p441_p11)  ;;  %v450_v56 = vmul.f32 (!%p441_p11), 0.0078125, %v446_v54  ;;  %v451_v61 = vmul.f32 (!%p441_p11), 0.0078125, %v447_v58 }
 0x197   : > { %v457_v53 = vmul.f32 (!%p441_p11), 0.0078125, %v453_v51  ;;  %v458_v57 = vmul.f32 (!%p441_p11), 0.0078125, %v454_v55  ;;  %v448_v63 = vld [vmem:[#allocation2 + $0x18] sm:$0xff] (!%p441_p11)  ;;  %v469_v18 = vld [vmem:[%s987_s2] sm:$0xff] (!%p441_p11)  ;;  %v470_v19 = vld [vmem:[%s987_s2 + $0x8] sm:$0xff] (!%p441_p11) }
 0x198   : > { %v455_v59 = vld [vmem:[#allocation3 + $0x10] sm:$0xff] (!%p441_p11)  ;;  %v461_v60 = vmul.f32 (!%p441_p11), %v449_v52, %v449_v52  ;;  %v456_v0 = vld [vmem:[#allocation3 + $0x18] sm:$0xff] (!%p441_p11)  ;;  %v462_v1 = vmul.f32 (!%p441_p11), %v450_v56, %v450_v56  ;;  %v452_v2 = vmul.f32 (!%p441_p11), 0.0078125, %v448_v63  ;;  %v463_v9 = vmul.f32 (!%p441_p11), %v451_v61, %v451_v61  ;;  %v490_v27 = vld [vmem:[%s988_s3] sm:$0xff] (!%p441_p11) }
 0x199   : > { %v459_v62 = vmul.f32 (!%p441_p11), 0.0078125, %v455_v59  ;;  %v460_v3 = vmul.f32 (!%p441_p11), 0.0078125, %v456_v0  ;;  %v471_v21 = vld [vmem:[%s987_s2 + $0x10] sm:$0xff] (!%p441_p11)  ;;  %v472_v24 = vld [vmem:[%s987_s2 + $0x18] sm:$0xff] (!%p441_p11)  ;;  %v491_v31 = vld [vmem:[%s988_s3 + $0x8] sm:$0xff] (!%p441_p11) }
 0x19a   : > { %v465_v8 = vsub.f32 (!%p441_p11), %v457_v53, %v461_v60  ;;  %v466_v10 = vsub.f32 (!%p441_p11), %v458_v57, %v462_v1  ;;  %v464_v11 = vmul.f32 (!%p441_p11), %v452_v2, %v452_v2  ;;  %v492_v34 = vld [vmem:[%s988_s3 + $0x10] sm:$0xff] (!%p441_p11)  ;;  %v493_v37 = vld [vmem:[%s988_s3 + $0x18] sm:$0xff] (!%p441_p11) }
 0x19b   : > { %v467_v13 = vsub.f32 (!%p441_p11), %v459_v62, %v463_v9 }
 0x19c   : > { %v473_v12 = vadd.f32 (!%p441_p11), 1e-05, %v465_v8  ;;  %v474_v14 = vadd.f32 (!%p441_p11), 1e-05, %v466_v10  ;;  %v468_v15 = vsub.f32 (!%p441_p11), %v460_v3, %v464_v11 }
 0x19d   : > { %v475_v16 = vadd.f32 1e-05, %v467_v13 }
 0x19e   : > { %736 = vrsqrt.f32 %v473_v12  ;;  %v476_v17 = vadd.f32 1e-05, %v468_v15 }
 0x19f   : > { %738 = vrsqrt.f32 %v474_v14 }
 0x1a0   : > { %740 = vrsqrt.f32 %v475_v16 }
 0x1a1   : > { %742 = vrsqrt.f32 %v476_v17 }
 0x1a8   : > { %v737_v20 = vpop.eup %736 }
 0x1a9   : > { %v739_v22 = vpop.eup %738  ;;  %v481_v23 = vmul.f32 %v737_v20, %v469_v18 }
 0x1aa   : > { %v741_v25 = vpop.eup %740  ;;  %v482_v26 = vmul.f32 %v739_v22, %v470_v19 }
 0x1ab   : > { %v743_v28 = vpop.eup %742  ;;  %486 = vst.msk [vmem:[#allocation4] sm:$0xff] %vm485_vm5, %v481_v23  ;;  %v483_v29 = vmul.f32 %v741_v25, %v471_v21  ;;  %v494_v30 = vmul.f32 %v481_v23, %v449_v52 }
 0x1ac   : > { %487 = vst.msk [vmem:[#allocation4 + $0x8] sm:$0xff] %vm485_vm5, %v482_v26  ;;  %v484_v32 = vmul.f32 %v743_v28, %v472_v24  ;;  %v495_v33 = vmul.f32 %v482_v26, %v450_v56 }
 0x1ad   : > { %488 = vst.msk [vmem:[#allocation4 + $0x10] sm:$0xff] %vm485_vm5, %v483_v29  ;;  %v498_v35 = vsub.f32 %v490_v27, %v494_v30  ;;  %v496_v36 = vmul.f32 %v483_v29, %v451_v61 }
 0x1ae   : > { %489 = vst.msk [vmem:[#allocation4 + $0x18] sm:$0xff] %vm485_vm5, %v484_v32  ;;  %v499_v38 = vsub.f32 %v491_v31, %v495_v33  ;;  %v497_v39 = vmul.f32 %v484_v32, %v452_v2 }
 0x1af   : > { %502 = vst.msk [vmem:[#allocation5] sm:$0xff] %vm485_vm5, %v498_v35  ;;  %v500_v40 = vsub.f32 %v492_v34, %v496_v36 }
 0x1b0   : > { %503 = vst.msk [vmem:[#allocation5 + $0x8] sm:$0xff] %vm485_vm5, %v499_v38  ;;  %v501_v41 = vsub.f32 %v493_v37, %v497_v39 }
 0x1b1   : > { %504 = vst.msk [vmem:[#allocation5 + $0x10] sm:$0xff] %vm485_vm5, %v500_v40 }
 0x1b2   : > { %505 = vst.msk [vmem:[#allocation5 + $0x18] sm:$0xff] %vm485_vm5, %v501_v41 }
 0x1b3 PF: > { %p677_p12 = scmp.ne.s32.totalorder %s772_s22, 1 }
 0x1b4   : > { %v512_v42 = vld [vmem:[#allocation4 + $0x10] sm:$0xff] (!%p677_p12)  ;;  %v510_v43 = vld [vmem:[#allocation4] sm:$0xff] (!%p677_p12)  ;;  %v787_v44 = vmov (!%p677_p12), 0   ;;  %v511_v46 = vld [vmem:[#allocation4 + $0x8] sm:$0xff] (!%p677_p12)  ;;  %vm578_vm6 = vcmask (!%p677_p12), 523264  }
 0x1b5   : > { %509 = sbr.rel (%p677_p12) target bundleno = 585 (0x249), region = 60  ;;  %745 = vset.pattern.permute.xlu1 (!%p677_p12), %v787_v44  ;;  %744 = vset.pattern.permute.xlu0 (!%p677_p12), %v787_v44  ;;  %v513_v45 = vld [vmem:[#allocation4 + $0x18] sm:$0xff] (!%p677_p12)  ;;  %v571_v61 = vld [vmem:[%s868_s14 + $0x8] sm:$0xff] (!%p677_p12)  ;;  %v570_v62 = vld [vmem:[%s868_s14] sm:$0xff] (!%p677_p12) }
 0x1b6   : > { %526 = vperm.xlu1 (!%p677_p12), %745, %v512_v42   ;;  %516 = vperm.xlu0 (!%p677_p12), %744, %v510_v43   ;;  %v538_v48 = vld [vmem:[#allocation5] sm:$0xff] (!%p677_p12)  ;;  %v573_v11 = vld [vmem:[%s868_s14 + $0x18] sm:$0xff] (!%p677_p12)  ;;  %v572_v12 = vld [vmem:[%s868_s14 + $0x10] sm:$0xff] (!%p677_p12) }
 0x1b7   : > { %v539_v47 = vld [vmem:[#allocation5 + $0x8] sm:$0xff] (!%p677_p12) }
 0x1b8   : > { %v540_v50 = vld [vmem:[#allocation5 + $0x10] sm:$0xff] (!%p677_p12) }
 0x1b9   : > { %v541_v49 = vld [vmem:[#allocation5 + $0x18] sm:$0xff] (!%p677_p12) }
 0x1ba   : > { %531 = vperm.xlu1 (!%p677_p12), %745, %v513_v45   ;;  %521 = vperm.xlu0 (!%p677_p12), %744, %v511_v46  }
 0x1be   : > { %549 = vperm.xlu1 %745, %v539_v47   ;;  %544 = vperm.xlu0 %744, %v538_v48  }
 0x1c2   : > { %559 = vperm.xlu1 %745, %v541_v49   ;;  %554 = vperm.xlu0 %744, %v540_v50  }
 0x235   : > { %v527_v51 = vpop.permute.xlu1 %526  ;;  %v517_v52 = vpop.permute.xlu0 %516 }
 0x236   : > { %v534_v55 = vmul.f32 %v517_v52, %v884_v5  ;;  %v536_v63 = vmul.f32 %v882_v4, %v527_v51 }
 0x239   : > { %v532_v53 = vpop.permute.xlu1 %531  ;;  %v522_v54 = vpop.permute.xlu0 %521 }
 0x23a   : > { %v535_v56 = vmul.f32 %v522_v54, %v888_v7  ;;  %v537_v0 = vmul.f32 %v886_v6, %v532_v53 }
 0x23d   : > { %v550_v57 = vpop.permute.xlu1 %549  ;;  %v545_v58 = vpop.permute.xlu0 %544 }
 0x23e   : > { %v563_v59 = vadd.f32 %v550_v57, %v535_v56  ;;  %v562_v60 = vadd.f32 %v545_v58, %v534_v55 }
 0x240   : > { %v567_v1 = vmax.f32 %v563_v59, 0.0  ;;  %v566_v2 = vmax.f32 %v562_v60, 0.0 }
 0x241   : > { %v560_v5 = vpop.permute.xlu1 %559  ;;  %v555_v7 = vpop.permute.xlu0 %554 }
 0x242   : > { %v575_v3 = vadd.f32 %v571_v61, %v567_v1  ;;  %v574_v8 = vadd.f32 %v570_v62, %v566_v2  ;;  %v565_v9 = vadd.f32 %v560_v5, %v537_v0  ;;  %v564_v10 = vadd.f32 %v555_v7, %v536_v63 }
 0x244   : > { %580 = vst.msk [vmem:[%s873_s17 + $0x8] sm:$0xff] %vm578_vm6, %v575_v3  ;;  %579 = vst.msk [vmem:[%s873_s17] sm:$0xff] %vm578_vm6, %v574_v8  ;;  %v569_v4 = vmax.f32 %v565_v9, 0.0  ;;  %v568_v13 = vmax.f32 %v564_v10, 0.0 }
 0x246   : > { %v577_v6 = vadd.f32 %v573_v11, %v569_v4  ;;  %v576_v14 = vadd.f32 %v572_v12, %v568_v13 }
 0x248   : > { %582 = vst.msk [vmem:[%s873_s17 + $0x18] sm:$0xff] %vm578_vm6, %v577_v6  ;;  %581 = vst.msk [vmem:[%s873_s17 + $0x10] sm:$0xff] %vm578_vm6, %v576_v14 }
 0x249 PF: > { %s16_s25 = sadd.s32 1, %s784_s25   ;;  %s992_s21 = smov %s776_s23 }
 0x24a   : > { %p13_p13 = scmp.ge.s32.totalorder %s16_s25, 6   ;;  %s993_s22 = smov %s780_s24 }
 0x24b   : > { %s994_s23 = smov %s997_s26  ;;  %s995_s24 = smov %s1001_s27 }
 0x24c   :  { %15 = sbr.rel (!%p13_p13) target bundleno = 3 (0x3), region = 93 }

// kernel: forward.7
= control target key start
LH: loop header
LB: loop body
LE: loop exit
PB: predicated region body
PF: predicated region fallthrough
CT: control target
= control target key end

     0   :  { %s2411_s18 = smov 0   ;;  %s2413_s19 = smov 0   ;;  %s2820_s0 = inlined_call_operand.vmem [shape: bf16[9,32,8], index: 0, kind: input, shape index: {}]   ;;  %s2821_s1 = inlined_call_operand.vmem [shape: bf16[2,8,362], index: 1, kind: input, shape index: {}]   ;;  %s2822_s2 = inlined_call_operand.vmem [shape: f32[32,1], index: 2, kind: input, shape index: {}]   ;;  %s2823_s3 = inlined_call_operand.vmem [shape: f32[32,1], index: 3, kind: input, shape index: {}]   ;;  %s2824_s4 = inlined_call_operand.vmem [shape: f32[1,324], index: 4, kind: input, shape index: {}]   ;;  %s2825_s5 = inlined_call_operand.vmem [shape: f32[2,32,324], index: 5, kind: output, shape index: {}]  }
   0x1   :  { %s2415_s20 = smov 0   ;;  %s2417_s21 = smov 0  }
   0x2   :  { %s2419_s22 = smov 0  }
   0x3 LB: > { %s24_s23 = sadd.s32 1, %s2360_s20  ;;  %s27_s24 = sadd.s32 1, %s2364_s21  ;;  %s2368_s22 = sphi %s2419_s22, %s15_s22   ;;  %s2364_s21 = sphi %s2417_s21, %s2830_s21   ;;  %s2360_s20 = sphi %s2415_s20, %s2829_s20   ;;  %s2356_s19 = sphi %s2413_s19, %s2828_s19   ;;  %s2352_s18 = sphi %s2411_s18, %s2827_s18  }
   0x4   : > { %p25_p0 = scmp.ge.s32.totalorder %s24_s23, 2  ;;  %p1955_p1 = scmp.ge.s32.totalorder %s2368_s22, 1 }
   0x5   : > { %p199_p2 = scmp.lt.s32.totalorder %s2368_s22, 5 }
   0x6   : > { %s2832_s23 = smov (%p25_p0, %s24_s23), 0  ;;  %s2834_s24 = smov (!%p25_p0, %s27_s24), %s2364_s21 }
   0x7   : > { %p200_p3 = pnand %p1955_p1, %p199_p2  ;;  %p29_p4 = scmp.ge.s32.totalorder %s2834_s24, 2 }
   0x8   : > { %p227_p5 = scmp.lt.s32.totalorder (!%p200_p3), %s2352_s18, 1  ;;  %v2370_v0 = vmov (!%p200_p3), 0   ;;  %s2371_s9 = smov (!%p200_p3), 127   ;;  %vm273_vm0 = vcmask (!%p200_p3), 1039360   ;;  %vm283_vm1 = vcmask (!%p200_p3), 1043456   ;;  %v2302_v12 = vld [vmem:[%s2820_s0 + $0x10] sm:$0xff] (!%p200_p3)  }
   0x9   : > { %s2836_s24 = smov (%p29_p4, %s2834_s24), 0  ;;  %203 = sbr.rel (%p200_p3) target bundleno = 843 (0x34b), region = 40 }
   0xa   : > { %325 = vmatprep.mubr.bf16.mxu1 (!%p200_p3), %v2370_v0  ;;  %593 = vmatprep.mubr.bf16.mxu0 (!%p200_p3), %v2370_v0  ;;  %s2372_s10 = smov (!%p200_p3), 126   ;;  %s2373_s11 = smov (!%p200_p3), 110   ;;  %vm543_vm2 = vcmask (!%p200_p3), 1031168   ;;  %vm276_vm3 = vcmask (!%p200_p3), 64512   ;;  %v2493_v19 = vld [vmem:[%s2820_s0 + $0x20] sm:$0xff] (!%p200_p3)   ;;  %vm696_vm4 = vcmask (!%p200_p3), 900096  }
   0xb   : > { %s2374_s12 = smov (!%p200_p3), 109   ;;  %s2375_s13 = smov (!%p200_p3), 108   ;;  %v2304_v23 = vld [vmem:[%s2820_s0 + $0x18] sm:$0xff] (!%p200_p3)   ;;  %v2511_v28 = vld [vmem:[%s2820_s0 + $0x28] sm:$0xff] (!%p200_p3)   ;;  %vm849_vm5 = vcmask (!%p200_p3), 891904   ;;  %v2306_v35 = vld [vmem:[%s2820_s0 + $0x30] sm:$0xff] (!%p200_p3)  }
   0xc   : > { %s2376_s14 = smov (!%p200_p3), 92   ;;  %s2377_s15 = smov (!%p200_p3), 91   ;;  %vm1002_vm6 = vcmask (!%p200_p3), 883712   ;;  %v2307_v40 = vld [vmem:[%s2820_s0] sm:$0xff] (!%p200_p3)   ;;  %v2308_v42 = vld [vmem:[%s2820_s0 + $0x38] sm:$0xff] (!%p200_p3)   ;;  %v2309_v44 = vld [vmem:[%s2820_s0 + $0x8] sm:$0xff] (!%p200_p3)  }
   0xd   : > { %s2378_s16 = smov (!%p200_p3), 90   ;;  %v2310_v46 = vld [vmem:[%s2820_s0 + $0x40] sm:$0xff] (!%p200_p3)   ;;  %vm1155_vm7 = vcmask (!%p200_p3), 752640   ;;  %v2311_v52 = vld [vmem:[%s2820_s0 + $0x48] sm:$0xff] (!%p200_p3)   ;;  %v2312_v54 = vld [vmem:[%s2820_s0 + $0x50] sm:$0xff] (!%p200_p3)   ;;  %vm1308_vm8 = vcmask (!%p200_p3), 744448  }
   0xe   : > { %v2313_v61 = vld [vmem:[%s2820_s0 + $0x58] sm:$0xff] (!%p200_p3)   ;;  %vm1461_vm9 = vcmask (!%p200_p3), 736256   ;;  %p1593_p6 = scmp.eq.s32.totalorder (!%p200_p3), %s2356_s19, 0  ;;  %p1594_p7 = scmp.eq.s32.totalorder (!%p200_p3), %s2352_s18, 0 }
  0x10   : > { %s228_s25 = scalar_select %p227_p5, %s2352_s18, 1 }
  0x11   : > { %p2667_p8 = pnand %p1594_p7, %p1593_p6 }
  0x12   : > { %s2246_s26 = smul.u32 12, %s228_s25  ;;  %vm1599_vm10 = vcmask (!%p2667_p8), 7168  }
  0x13   : > { %s2247_s27 = smul.u32 96, %s228_s25 }
  0x14   : > { %s231_s30 = scalar_lea.vmem %s2821_s1, %s2246_s26 }
  0x15   : > { %s2455_s8 = scalar_lea.vmem %s2825_s5, %s2247_s27  ;;  %v2457_v1 = vld [vmem:[%s231_s30 + $0x8] ss:$0 sps:$4 sm:$0xff]   ;;  %v238_v2 = vld [vmem:[%s231_s30] sm:$0xff] }
  0x16   : > { %v2459_v3 = vcombine.low %v238_v2, %v238_v2  ;;  %271 = vrot.lane.b32.xlu1 %v2457_v1, %s2371_s9  ;;  %v1965_v4 = vcombine.high %v238_v2, %v238_v2  ;;  %v418_v41 = vsel %vm283_vm1, %v2457_v1, 0  ;;  %v2314_v2 = vld [vmem:[%s2820_s0 + $0x60] sm:$0xff]  }
  0x18   : > { %267 = vrot.lane.b32.xlu0 %v2459_v3, %s2371_s9  ;;  %v412_v32 = vsel %vm283_vm1, %v2459_v3, 0 }
  0x1a   : > { %537 = vrot.lane.b32.xlu1 %v2459_v3, %s2372_s10 }
  0x1c   : > { %269 = vrot.lane.b32.xlu0 %v1965_v4, %s2371_s9 }
  0x1e   : > { %541 = vrot.lane.b32.xlu1 %v2457_v1, %s2372_s10 }
  0x20   : > { %539 = vrot.lane.b32.xlu0 %v1965_v4, %s2372_s10 }
  0x22   : > { %692 = vrot.lane.b32.xlu1 %v1965_v4, %s2373_s11 }
  0x24   : > { %690 = vrot.lane.b32.xlu0 %v2459_v3, %s2373_s11 }
  0x26   : > { %843 = vrot.lane.b32.xlu1 %v2459_v3, %s2374_s12 }
  0x28   : > { %694 = vrot.lane.b32.xlu0 %v2457_v1, %s2373_s11 }
  0x2a   : > { %847 = vrot.lane.b32.xlu1 %v2457_v1, %s2374_s12 }
  0x2c   : > { %845 = vrot.lane.b32.xlu0 %v1965_v4, %s2374_s12 }
  0x2e   : > { %998 = vrot.lane.b32.xlu1 %v1965_v4, %s2375_s13 }
  0x30   : > { %996 = vrot.lane.b32.xlu0 %v2459_v3, %s2375_s13 }
  0x32   : > { %1149 = vrot.lane.b32.xlu1 %v2459_v3, %s2376_s14 }
  0x34   : > { %1000 = vrot.lane.b32.xlu0 %v2457_v1, %s2375_s13 }
  0x36   : > { %1153 = vrot.lane.b32.xlu1 %v2457_v1, %s2376_s14 }
  0x38   : > { %1151 = vrot.lane.b32.xlu0 %v1965_v4, %s2376_s14 }
  0x3a   : > { %1304 = vrot.lane.b32.xlu1 %v1965_v4, %s2377_s15 }
  0x3c   : > { %1302 = vrot.lane.b32.xlu0 %v2459_v3, %s2377_s15 }
  0x3e   : > { %1455 = vrot.lane.b32.xlu1 %v2459_v3, %s2378_s16 }
  0x40   : > { %1306 = vrot.lane.b32.xlu0 %v2457_v1, %s2377_s15 }
  0x42   : > { %1459 = vrot.lane.b32.xlu1 %v2457_v1, %s2378_s16 }
  0x44   : > { %1457 = vrot.lane.b32.xlu0 %v1965_v4, %s2378_s16 }
  0x88   : > { %v272_v5 = vpop.permute.xlu1 %271 }
  0x89   : > { %v291_v17 = vsel %vm283_vm1, %v272_v5, 0 }
  0x8a   : > { %v268_v6 = vpop.permute.xlu0 %267 }
  0x8c   : > { %v538_v7 = vpop.permute.xlu1 %537 }
  0x8e   : > { %v270_v8 = vpop.permute.xlu0 %269 }
  0x8f   : > { %v275_v9 = vsel %vm273_vm0, %v270_v8, %v272_v5  ;;  %v274_v10 = vsel %vm273_vm0, %v268_v6, %v270_v8 }
  0x90   : > { %1967 = vmatprep.subr.msk.bf16.mxu1 %vm283_vm1, %v275_v9  ;;  %v285_v11 = vsel %vm283_vm1, %v274_v10, 0  ;;  %v2482_v13 = vpop.permute.xlu1 %541  ;;  %v2316_v10 = vld [vmem:[%s2820_s0 + $0x70] sm:$0xff]  }
  0x91   : > { %294 = vmatpush1.bf16.msra.mxu1 %v285_v11  ;;  %v559_v51 = vsel %vm283_vm1, %v2482_v13, 0 }
  0x92   : > { %2237 = vmatprep.subr.msk.bf16.mxu1 %vm283_vm1, %v272_v5  ;;  %v540_v14 = vpop.permute.xlu0 %539 }
  0x93   : > { %v545_v15 = vsel %vm543_vm2, %v540_v14, %v2482_v13  ;;  %v544_v16 = vsel %vm543_vm2, %v538_v7, %v540_v14  ;;  %v2315_v7 = vld [vmem:[%s2820_s0 + $0x68] sm:$0xff]   ;;  %v2318_v14 = vld [vmem:[%s2820_s0 + $0x80] sm:$0xff]  }
  0x94   : > { %1968 = vmatmul.mubr.msk.bf16.vlgmr.msra.gmra.mrb[0].mxu1 %vm276_vm3, %v2302_v12  ;;  %1985 = vmatprep.subr.msk.bf16.mxu0 %vm283_vm1, %v545_v15  ;;  %v553_v18 = vsel %vm283_vm1, %v544_v16, 0  ;;  %v693_v20 = vpop.permute.xlu1 %692  ;;  %v2319_v16 = vld [vmem:[%s2820_s0 + $0x88] sm:$0xff]  }
  0x95   : > { %2088 = vmatpush3.bf16.msra.mxu1 %v291_v17  ;;  %562 = vmatpush1.bf16.msra.mxu0 %v553_v18 }
  0x96   : > { %335 = vmatprep.mubr.bf16.mxu1 %v2370_v0  ;;  %v691_v21 = vpop.permute.xlu0 %690  ;;  %1974 = vmatprep.subr.msk.bf16.mxu1 %vm283_vm1, %v1965_v4 }
  0x97   : > { %v697_v22 = vsel %vm696_vm4, %v691_v21, %v693_v20 }
  0x98   : > { %1986 = vmatmul.mubr.msk.bf16.vlgmr.msra.gmra.mrb[0].mxu0 %vm276_vm3, %v2493_v19  ;;  %v844_v24 = vpop.permute.xlu1 %843  ;;  %v706_v25 = vsel %vm283_vm1, %v697_v22, 0 }
  0x99   : > { %603 = vmatprep.mubr.bf16.mxu0 %v2370_v0 }
  0x9a   : > { %v2504_v26 = vpop.permute.xlu0 %694 }
  0x9b   : > { %v698_v27 = vsel %vm696_vm4, %v693_v20, %v2504_v26  ;;  %v712_v58 = vsel %vm283_vm1, %v2504_v26, 0 }
  0x9c   : > { %1969 = vmatmul.mubr.msk.bf16.gmra.mrb[4].mxu1 %vm276_vm3, %v2304_v23  ;;  %1996 = vmatprep.subr.msk.bf16.mxu0 %vm283_vm1, %v698_v27  ;;  %v2515_v29 = vpop.permute.xlu1 %847 }
  0x9d   : > { %2089 = vmatprep.mubr.msk.bf16.mxu1 %vm276_vm3, %v2302_v12  ;;  %715 = vmatpush1.bf16.msra.mxu0 %v706_v25 }
  0x9e   : > { %v846_v30 = vpop.permute.xlu0 %845 }
  0x9f   : > { %v851_v31 = vsel %vm849_vm5, %v846_v30, %v2515_v29  ;;  %v850_v34 = vsel %vm849_vm5, %v844_v24, %v846_v30 }
  0xa0   : > { %1987 = vmatmul.mubr.msk.bf16.gmra.mrb[4].mxu0 %vm276_vm3, %v2511_v28  ;;  %2007 = vmatprep.subr.msk.bf16.mxu0 %vm283_vm1, %v851_v31  ;;  %v999_v36 = vpop.permute.xlu1 %998  ;;  %v859_v37 = vsel %vm283_vm1, %v850_v34, 0 }
  0xa1   : > { %746 = vmatprep.mubr.bf16.mxu0 %v2370_v0 }
  0xa2   : > { %v997_v33 = vpop.permute.xlu0 %996 }
  0xa3   : > { %v1003_v45 = vsel %vm1002_vm6, %v997_v33, %v999_v36 }
  0xa4   : > { %2090 = vmatmul.mubr.msk.bf16.vlgmr.msra.gmra.mrb[8].mxu1 %vm276_vm3, %v2304_v23  ;;  %v1150_v43 = vpop.permute.xlu1 %1149  ;;  %v1012_v49 = vsel %vm283_vm1, %v1003_v45, 0  ;;  %v2379_v45 = vmov (!%p2667_p8), 0.0  }
  0xa5   : > { %421 = vmatpush1.bf16.msra.mxu1 %v412_v32  ;;  %452 = vmatprep.mubr.bf16.mxu1 %v2370_v0  ;;  %1600 = vst.msk [vmem:[#allocation2] sm:$0xff] (!%p2667_p8), %vm1599_vm10, %v2379_v45  ;;  %1601 = vst.msk [vmem:[#allocation2 + $0x8] sm:$0xff] (!%p2667_p8), %vm1599_vm10, %v2379_v45 }
  0xa6   : > { %2238 = vmatprep.subr.msk.bf16.mxu1 %vm283_vm1, %v2457_v1  ;;  %v2532_v38 = vpop.permute.xlu0 %1000  ;;  %v865_v1 = vsel %vm283_vm1, %v2515_v29, 0  ;;  %1602 = vst.msk [vmem:[#allocation2 + $0x10] sm:$0xff] (!%p2667_p8), %vm1599_vm10, %v2379_v45  ;;  %1603 = vst.msk [vmem:[#allocation2 + $0x18] sm:$0xff] (!%p2667_p8), %vm1599_vm10, %v2379_v45 }
  0xa7   : > { %v1004_v39 = vsel %vm1002_vm6, %v999_v36, %v2532_v38  ;;  %v1018_v8 = vsel %vm283_vm1, %v2532_v38, 0  ;;  %1604 = vst.msk [vmem:[#allocation3] sm:$0xff] (!%p2667_p8), %vm1599_vm10, %v2379_v45  ;;  %1605 = vst.msk [vmem:[#allocation3 + $0x8] sm:$0xff] (!%p2667_p8), %vm1599_vm10, %v2379_v45 }
  0xa8   : > { %1997 = vmatmul.mubr.msk.bf16.vlgmr.msra.gmra.mrb[0].mxu0 %vm276_vm3, %v2306_v35  ;;  %v2561_v47 = vpop.permute.xlu1 %1153  ;;  %1606 = vst.msk [vmem:[#allocation3 + $0x10] sm:$0xff] (!%p2667_p8), %vm1599_vm10, %v2379_v45  ;;  %1607 = vst.msk [vmem:[#allocation3 + $0x18] sm:$0xff] (!%p2667_p8), %vm1599_vm10, %v2379_v45 }
  0xa9   : > { %756 = vmatprep.mubr.bf16.mxu0 %v2370_v0  ;;  %868 = vmatpush1.bf16.msra.mxu0 %v859_v37  ;;  %v1171_v12 = vsel %vm283_vm1, %v2561_v47, 0 }
  0xaa   : > { %2018 = vmatprep.subr.msk.bf16.mxu0 %vm283_vm1, %v1004_v39  ;;  %v1152_v48 = vpop.permute.xlu0 %1151 }
  0xab   : > { %v1157_v50 = vsel %vm1155_vm7, %v1152_v48, %v2561_v47  ;;  %v1156_v55 = vsel %vm1155_vm7, %v1150_v43, %v1152_v48 }
  0xac   : > { %1975 = vmatmul.mubr.msk.bf16.vlgmr.msra.gmra.mrb[0].mxu1 %vm276_vm3, %v2307_v40  ;;  %v1305_v56 = vpop.permute.xlu1 %1304  ;;  %v1165_v59 = vsel %vm283_vm1, %v1156_v55, 0 }
  0xad   : > { %2094 = vmatpush3.bf16.msra.mxu1 %v418_v41  ;;  %462 = vmatprep.mubr.bf16.mxu1 %v2370_v0 }
  0xae   : > { %2239 = vmatprep.subr.msk.bf16.mxu1 %vm283_vm1, %v2482_v13  ;;  %v1303_v53 = vpop.permute.xlu0 %1302  ;;  %v2317_v13 = vld [vmem:[%s2820_s0 + $0x78] sm:$0xff]  }
  0xaf   : > { %v1309_v63 = vsel %vm1308_vm8, %v1303_v53, %v1305_v56 }
  0xb0   : > { %1998 = vmatmul.mubr.msk.bf16.gmra.mrb[4].mxu0 %vm276_vm3, %v2308_v42  ;;  %v1456_v62 = vpop.permute.xlu1 %1455  ;;  %v1318_v5 = vsel %vm283_vm1, %v1309_v63, 0 }
  0xb1   : > { %899 = vmatprep.mubr.bf16.mxu0 %v2370_v0 }
  0xb2   : > { %v1307_v57 = vpop.permute.xlu0 %1306 }
  0xb3   : > { %v1310_v60 = vsel %vm1308_vm8, %v1305_v56, %v1307_v57  ;;  %v1324_v15 = vsel %vm283_vm1, %v1307_v57, 0 }
  0xb4   : > { %1976 = vmatmul.mubr.msk.bf16.gmra.mrb[4].mxu1 %vm276_vm3, %v2309_v44  ;;  %v1460_v3 = vpop.permute.xlu1 %1459 }
  0xb5   : > { %2095 = vmatprep.mubr.msk.bf16.mxu1 %vm276_vm3, %v2307_v40  ;;  %v1477_v17 = vsel %vm283_vm1, %v1460_v3, 0 }
  0xb6   : > { %v1458_v4 = vpop.permute.xlu0 %1457 }
  0xb7   : > { %v1463_v6 = vsel %vm1461_vm9, %v1458_v4, %v1460_v3  ;;  %v1462_v9 = vsel %vm1461_vm9, %v1456_v62, %v1458_v4 }
  0xb8   : > { %2008 = vmatmul.mubr.msk.bf16.vlgmr.msra.gmra.mrb[0].mxu0 %vm276_vm3, %v2310_v46  ;;  %v1471_v11 = vsel %vm283_vm1, %v1462_v9, 0 }
  0xb9   : > { %909 = vmatprep.mubr.bf16.mxu0 %v2370_v0  ;;  %1021 = vmatpush1.bf16.msra.mxu0 %v1012_v49 }
  0xba   : > { %2029 = vmatprep.subr.msk.bf16.mxu0 %vm283_vm1, %v1157_v50 }
  0xbc   : > { %2096 = vmatmul.mubr.msk.bf16.vlgmr.msra.gmra.mrb[8].mxu1 %vm276_vm3, %v2309_v44 }
  0xbd   : > { %2100 = vmatpush3.bf16.msra.mxu1 %v559_v51  ;;  %2101 = vmatprep.mubr.msk.bf16.mxu1 %vm276_vm3, %v2493_v19 }
  0xbe   : > { %2240 = vmatprep.subr.msk.bf16.mxu1 %vm283_vm1, %v2504_v26 }
  0xc0   : > { %2009 = vmatmul.mubr.msk.bf16.gmra.mrb[4].mxu0 %vm276_vm3, %v2311_v52 }
  0xc1   : > { %1052 = vmatprep.mubr.bf16.mxu0 %v2370_v0 }
  0xc8   : > { %2102 = vmatmul.mubr.msk.bf16.vlgmr.msra.gmra.mrb[8].mxu1 %vm276_vm3, %v2511_v28  ;;  %2019 = vmatmul.mubr.msk.bf16.vlgmr.msra.gmra.mrb[0].mxu0 %vm276_vm3, %v2312_v54 }
  0xc9   : > { %2106 = vmatpush3.bf16.msra.mxu1 %v712_v58  ;;  %1062 = vmatprep.mubr.bf16.mxu0 %v2370_v0 }
  0xca   : > { %2241 = vmatprep.subr.msk.bf16.mxu1 %vm283_vm1, %v2515_v29  ;;  %2107 = vmatprep.mubr.msk.bf16.mxu1 %vm276_vm3, %v2306_v35 }
  0xcb   : > { %1174 = vmatpush1.bf16.msra.mxu0 %v1165_v59 }
  0xcc   : > { %2040 = vmatprep.subr.msk.bf16.mxu0 %vm283_vm1, %v1310_v60 }
  0xd0   : > { %2020 = vmatmul.mubr.msk.bf16.gmra.mrb[4].mxu0 %vm276_vm3, %v2313_v61 }
  0xd1   : > { %1205 = vmatprep.mubr.bf16.mxu0 %v2370_v0 }
  0xd4   : > { %2108 = vmatmul.mubr.msk.bf16.vlgmr.msra.gmra.mrb[8].mxu1 %vm276_vm3, %v2308_v42 }
  0xd5   : > { %2112 = vmatpush3.bf16.msra.mxu1 %v865_v1  ;;  %2113 = vmatprep.mubr.msk.bf16.mxu1 %vm276_vm3, %v2310_v46 }
  0xd6   : > { %2242 = vmatprep.subr.msk.bf16.mxu1 %vm283_vm1, %v2532_v38 }
  0xd8   : > { %2030 = vmatmul.mubr.msk.bf16.vlgmr.msra.gmra.mrb[0].mxu0 %vm276_vm3, %v2314_v2 }
  0xd9   : > { %1215 = vmatprep.mubr.bf16.mxu0 %v2370_v0  ;;  %1327 = vmatpush1.bf16.msra.mxu0 %v1318_v5 }
  0xda   : > { %2051 = vmatprep.subr.msk.bf16.mxu0 %vm283_vm1, %v1463_v6 }
  0xe0   : > { %2114 = vmatmul.mubr.msk.bf16.vlgmr.msra.gmra.mrb[8].mxu1 %vm276_vm3, %v2311_v52  ;;  %2031 = vmatmul.mubr.msk.bf16.gmra.mrb[4].mxu0 %vm276_vm3, %v2315_v7 }
  0xe1   : > { %2118 = vmatpush3.bf16.msra.mxu1 %v1018_v8  ;;  %1358 = vmatprep.mubr.bf16.mxu0 %v2370_v0 }
  0xe2   : > { %2243 = vmatprep.subr.msk.bf16.mxu1 %vm283_vm1, %v2561_v47  ;;  %2119 = vmatprep.mubr.msk.bf16.mxu1 %vm276_vm3, %v2312_v54 }
  0xe8   : > { %2041 = vmatmul.mubr.msk.bf16.vlgmr.msra.gmra.mrb[0].mxu0 %vm276_vm3, %v2316_v10 }
  0xe9   : > { %1368 = vmatprep.mubr.bf16.mxu0 %v2370_v0  ;;  %1480 = vmatpush1.bf16.msra.mxu0 %v1471_v11 }
  0xec   : > { %2120 = vmatmul.mubr.msk.bf16.vlgmr.msra.gmra.mrb[8].mxu1 %vm276_vm3, %v2313_v61 }
  0xed   : > { %2124 = vmatpush3.bf16.msra.mxu1 %v1171_v12  ;;  %2125 = vmatprep.mubr.msk.bf16.mxu1 %vm276_vm3, %v2314_v2 }
  0xee   : > { %2244 = vmatprep.subr.msk.bf16.mxu1 %vm283_vm1, %v1307_v57 }
  0xf0   : > { %2042 = vmatmul.mubr.msk.bf16.gmra.mrb[4].mxu0 %vm276_vm3, %v2317_v13 }
  0xf1   : > { %1511 = vmatprep.mubr.bf16.mxu0 %v2370_v0 }
  0xf8   : > { %2126 = vmatmul.mubr.msk.bf16.vlgmr.msra.gmra.mrb[8].mxu1 %vm276_vm3, %v2315_v7  ;;  %2052 = vmatmul.mubr.msk.bf16.vlgmr.msra.gmra.mrb[0].mxu0 %vm276_vm3, %v2318_v14 }
  0xf9   : > { %2130 = vmatpush3.bf16.msra.mxu1 %v1324_v15  ;;  %1521 = vmatprep.mubr.bf16.mxu0 %v2370_v0 }
  0xfa   : > { %2245 = vmatprep.subr.msk.bf16.mxu1 %vm283_vm1, %v1460_v3  ;;  %2131 = vmatprep.mubr.msk.bf16.mxu1 %vm276_vm3, %v2316_v10 }
 0x100   : > { %2053 = vmatmul.mubr.msk.bf16.gmra.mrb[4].mxu0 %vm276_vm3, %v2319_v16 }
 0x104   : > { %2132 = vmatmul.mubr.msk.bf16.vlgmr.msra.gmra.mrb[8].mxu1 %vm276_vm3, %v2317_v13 }
 0x105   : > { %2136 = vmatpush3.bf16.msra.mxu1 %v1477_v17  ;;  %2137 = vmatprep.mubr.msk.bf16.mxu1 %vm276_vm3, %v2318_v14 }
 0x110   : > { %2138 = vmatmul.mubr.msk.bf16.vlgmr.msra.gmra.mrb[8].mxu1 %vm276_vm3, %v2319_v16 }
 0x17f   : > { %v454_v0 = vpop.f32.mrb[0].mxu1 }
 0x180   : > { %v456_v18 = vpop.f32.mrb[1].mxu1 }
 0x181   : > { %v458_v19 = vpop.f32.mrb[2].mxu1 }
 0x182   : > { %v460_v20 = vpop.f32.mrb[3].mxu1 }
 0x187   : > { %v464_v21 = vpop.f32.mrb[4].mxu1 }
 0x188   : > { %v466_v22 = vpop.f32.mrb[5].mxu1 }
 0x189   : > { %v468_v23 = vpop.f32.mrb[6].mxu1 }
 0x18a   : > { %v470_v24 = vpop.f32.mrb[7].mxu1 }
 0x1cb   : > { %v1513_v25 = vpop.f32.mrb[0].mxu0 }
 0x1cc   : > { %v2671_v26 = vadd.f32 %v1513_v25, %v454_v0  ;;  %v1515_v27 = vpop.f32.mrb[1].mxu0 }
 0x1cd   : > { %v2673_v28 = vadd.f32 %v1515_v27, %v456_v18  ;;  %v1517_v29 = vpop.f32.mrb[2].mxu0 }
 0x1ce   : > { %v2675_v30 = vadd.f32 %v1517_v29, %v458_v19  ;;  %v1519_v31 = vpop.f32.mrb[3].mxu0 }
 0x1cf   : > { %v2677_v32 = vadd.f32 %v1519_v31, %v460_v20 }
 0x1d3   : > { %v1523_v33 = vpop.f32.mrb[4].mxu0 }
 0x1d4   : > { %v2679_v34 = vadd.f32 %v1523_v33, %v464_v21  ;;  %v1525_v35 = vpop.f32.mrb[5].mxu0 }
 0x1d5   : > { %v2681_v36 = vadd.f32 %v1525_v35, %v466_v22  ;;  %v1527_v37 = vpop.f32.mrb[6].mxu0 }
 0x1d6   : > { %v2683_v38 = vadd.f32 %v1527_v37, %v468_v23  ;;  %v1529_v39 = vpop.f32.mrb[7].mxu0 }
 0x1d7   : > { %v2685_v40 = vadd.f32 %v1529_v39, %v470_v24 }
 0x1e0   : > { %1598 = sbr.rel (%p2667_p8) target bundleno = 487 (0x1e7), region = 44 }
 0x1e3   : > { %v2687_v41 = vpop.f32.mrb[8].mxu1 }
 0x1e4   : > { %v2689_v42 = vpop.f32.mrb[9].mxu1 }
 0x1e5   : > { %v2691_v43 = vpop.f32.mrb[10].mxu1 }
 0x1e6   : > { %v2693_v44 = vpop.f32.mrb[11].mxu1 }
 0x1e7 PF: > { %p2056_p9 = scmp.ne.s32.totalorder %s2356_s19, 0 }
 0x1e8   : > { %v1613_v46 = vlaneseq (!%p2056_p9)  ;;  %v1611_v48 = vld [vmem:[%s2824_s4] sm:$0x7] (!%p2056_p9)  ;;  %vm1645_vm11 = vcmask (!%p2056_p9), 556032   ;;  %vm1669_vm12 = vcmask (!%p2056_p9), 7168  }
 0x1e9   : > { %1610 = sbr.rel (%p2056_p9) target bundleno = 660 (0x294), region = 48 }
 0x1ea   : > { %v1614_v47 = vshrl.u32 (!%p2056_p9), %v1613_v46, 7 }
 0x1ec   : > { %v1615_v49 = vsub.s32 (!%p2056_p9), 0, %v1614_v47  ;;  %v1619_v50 = vsub.s32 (!%p2056_p9), 1, %v1614_v47  ;;  %v1623_v51 = vsub.s32 (!%p2056_p9), 2, %v1614_v47 }
 0x1ee   : > { %v1616_v52 = vrot.slane (!%p2056_p9), %v1611_v48, %v1615_v49  ;;  %v1620_v53 = vrot.slane (!%p2056_p9), %v1611_v48, %v1619_v50  ;;  %v1624_v54 = vrot.slane (!%p2056_p9), %v1611_v48, %v1623_v51  ;;  %v1642_v51 = vld [vmem:[#allocation2 + $0x10] sm:$0xff] (!%p2056_p9) }
 0x1f0   : > { %v1634_v55 = vmul.f32 %v2679_v34, %v1616_v52  ;;  %v1635_v56 = vmul.f32 %v2681_v36, %v1620_v53  ;;  %v1636_v57 = vmul.f32 %v2687_v41, %v1624_v54  ;;  %v1628_v58 = vmul.f32 %v2671_v26, %v1616_v52 }
 0x1f1   : > { %v1629_v59 = vmul.f32 %v2673_v28, %v1620_v53  ;;  %v1630_v60 = vmul.f32 %v1624_v54, %v2689_v42  ;;  %v1637_v61 = vmul.f32 %v2683_v38, %v1616_v52  ;;  %v1638_v62 = vmul.f32 %v2685_v40, %v1620_v53 }
 0x1f2   : > { %v1655_v63 = vadd.f32 %v1635_v56, %v1634_v55  ;;  %v1656_v1 = vsel %vm1645_vm11, %v1636_v57, 0.0  ;;  %v1639_v2 = vmul.f32 %v2691_v43, %v1624_v54  ;;  %v1631_v3 = vmul.f32 %v2675_v30, %v1616_v52  ;;  %v1640_v52 = vld [vmem:[#allocation2] sm:$0xff] }
 0x1f3   : > { %v1644_v4 = vadd.f32 %v1629_v59, %v1628_v58  ;;  %v1646_v5 = vsel %vm1645_vm11, %v1630_v60, 0.0  ;;  %v1660_v6 = vadd.f32 %v1638_v62, %v1637_v61  ;;  %v1632_v7 = vmul.f32 %v2677_v32, %v1620_v53 }
 0x1f4   : > { %v1657_v8 = vadd.f32 %v1656_v1, %v1655_v63  ;;  %v1661_v9 = vsel %vm1645_vm11, %v1639_v2, 0.0  ;;  %v1633_v10 = vmul.f32 %v1624_v54, %v2693_v44  ;;  %v1681_v11 = vmul.f32 %v2675_v30, %v1631_v3  ;;  %v1675_v63 = vld [vmem:[#allocation3 + $0x8] sm:$0xff]  ;;  %v1674_v1 = vld [vmem:[#allocation3] sm:$0xff] }
 0x1f5   : > { %v1647_v12 = vadd.f32 %v1646_v5, %v1644_v4  ;;  %v1662_v13 = vadd.f32 %v1661_v9, %v1660_v6  ;;  %v1650_v14 = vadd.f32 %v1632_v7, %v1631_v3  ;;  %v1682_v15 = vmul.f32 %v2677_v32, %v1632_v7  ;;  %v1677_v6 = vld [vmem:[#allocation3 + $0x18] sm:$0xff]  ;;  %v1676_v7 = vld [vmem:[#allocation3 + $0x10] sm:$0xff] }
 0x1f6   : > { %1658 = vadd.xlane.f32.xlu1 %v1657_v8  ;;  %v1651_v16 = vsel %vm1645_vm11, %v1633_v10, 0.0  ;;  %v1683_v17 = vmul.f32 %v1633_v10, %v2693_v44  ;;  %v1678_v0 = vmul.f32 %v2671_v26, %v1628_v58  ;;  %v1679_v18 = vmul.f32 %v2673_v28, %v1629_v59  ;;  %v1641_v58 = vld [vmem:[#allocation2 + $0x8] sm:$0xff] }
 0x1f7   : > { %1648 = vadd.xlane.f32.xlu0 %v1647_v12  ;;  %v1652_v19 = vadd.f32 %v1651_v16, %v1650_v14  ;;  %v1695_v20 = vadd.f32 %v1682_v15, %v1681_v11  ;;  %v1680_v21 = vmul.f32 %v1630_v60, %v2689_v42  ;;  %v1687_v22 = vmul.f32 %v2683_v38, %v1637_v61 }
 0x1f8   : > { %v1696_v23 = vsel %vm1645_vm11, %v1683_v17, 0.0  ;;  %v1690_v24 = vadd.f32 %v1679_v18, %v1678_v0  ;;  %v1688_v25 = vmul.f32 %v2685_v40, %v1638_v62  ;;  %v1689_v27 = vmul.f32 %v2691_v43, %v1639_v2 }
 0x1f9   : > { %v1691_v29 = vsel %vm1645_vm11, %v1680_v21, 0.0  ;;  %v1684_v31 = vmul.f32 %v2679_v34, %v1634_v55  ;;  %v1685_v33 = vmul.f32 %v2681_v36, %v1635_v56  ;;  %v1697_v35 = vadd.f32 %v1696_v23, %v1695_v20 }
 0x1fa   : > { %1663 = vadd.xlane.f32.xlu1 %v1662_v13  ;;  %v1705_v37 = vadd.f32 %v1688_v25, %v1687_v22  ;;  %v1686_v39 = vmul.f32 %v2687_v41, %v1636_v57  ;;  %v1692_v45 = vadd.f32 %v1691_v29, %v1690_v24  ;;  %v1706_v46 = vsel %vm1645_vm11, %v1689_v27, 0.0  ;;  %v1643_v57 = vld [vmem:[#allocation2 + $0x18] sm:$0xff] }
 0x1fb   : > { %1653 = vadd.xlane.f32.xlu0 %v1652_v19  ;;  %v1700_v47 = vadd.f32 %v1685_v33, %v1684_v31 }
 0x1fc   : > { %v1701_v48 = vsel %vm1645_vm11, %v1686_v39, 0.0  ;;  %v1707_v49 = vadd.f32 %v1706_v46, %v1705_v37 }
 0x1fd   : > { %v1702_v50 = vadd.f32 %v1701_v48, %v1700_v47 }
 0x1fe   : > { %1698 = vadd.xlane.f32.xlu1 %v1697_v35 }
 0x1ff   : > { %1693 = vadd.xlane.f32.xlu0 %v1692_v45 }
 0x202   : > { %1708 = vadd.xlane.f32.xlu1 %v1707_v49 }
 0x203   : > { %1703 = vadd.xlane.f32.xlu0 %v1702_v50 }
 0x283   : > { %v1659_v53 = vpop.xlane.xlu1 %1658 }
 0x284   : > { %v1667_v54 = vadd.f32 %v1659_v53, %v1642_v51  ;;  %v1649_v55 = vpop.xlane.xlu0 %1648 }
 0x285   : > { %v1665_v56 = vadd.f32 %v1649_v55, %v1640_v52 }
 0x286   : > { %1672 = vst.msk [vmem:[#allocation2 + $0x10] sm:$0xff] %vm1669_vm12, %v1667_v54 }
 0x287   : > { %1670 = vst.msk [vmem:[#allocation2] sm:$0xff] %vm1669_vm12, %v1665_v56  ;;  %v1664_v59 = vpop.xlane.xlu1 %1663 }
 0x288   : > { %v1668_v60 = vadd.f32 %v1664_v59, %v1643_v57  ;;  %v1654_v61 = vpop.xlane.xlu0 %1653 }
 0x289   : > { %v1666_v62 = vadd.f32 %v1654_v61, %v1641_v58 }
 0x28a   : > { %1673 = vst.msk [vmem:[#allocation2 + $0x18] sm:$0xff] %vm1669_vm12, %v1668_v60 }
 0x28b   : > { %1671 = vst.msk [vmem:[#allocation2 + $0x8] sm:$0xff] %vm1669_vm12, %v1666_v62  ;;  %v1699_v2 = vpop.xlane.xlu1 %1698 }
 0x28c   : > { %v1711_v3 = vadd.f32 %v1699_v2, %v1675_v63  ;;  %v1694_v4 = vpop.xlane.xlu0 %1693 }
 0x28d   : > { %v1710_v5 = vadd.f32 %v1694_v4, %v1674_v1 }
 0x28e   : > { %1715 = vst.msk [vmem:[#allocation3 + $0x8] sm:$0xff] %vm1669_vm12, %v1711_v3 }
 0x28f   : > { %1714 = vst.msk [vmem:[#allocation3] sm:$0xff] %vm1669_vm12, %v1710_v5  ;;  %v1709_v8 = vpop.xlane.xlu1 %1708 }
 0x290   : > { %v1713_v9 = vadd.f32 %v1709_v8, %v1677_v6  ;;  %v1704_v10 = vpop.xlane.xlu0 %1703 }
 0x291   : > { %v1712_v11 = vadd.f32 %v1704_v10, %v1676_v7 }
 0x292   : > { %1717 = vst.msk [vmem:[#allocation3 + $0x18] sm:$0xff] %vm1669_vm12, %v1713_v9 }
 0x293   : > { %1716 = vst.msk [vmem:[#allocation3 + $0x10] sm:$0xff] %vm1669_vm12, %v1712_v11 }
 0x294 PF: > { %p1718_p10 = scmp.eq.s32.totalorder %s2352_s18, 1 }
 0x296   : > { %p1719_p11 = pnand %p1718_p10, %p1593_p6 }
 0x297   : > { %v1723_v12 = vld [vmem:[#allocation2] sm:$0xff] (!%p1719_p11)  ;;  %v1724_v16 = vld [vmem:[#allocation2 + $0x8] sm:$0xff] (!%p1719_p11)  ;;  %v1725_v19 = vld [vmem:[#allocation2 + $0x10] sm:$0xff] (!%p1719_p11)  ;;  %vm1763_vm13 = vcmask (!%p1719_p11), 7168  }
 0x298   : > { %1722 = sbr.rel (%p1719_p11) target bundleno = 693 (0x2b5), region = 52  ;;  %v1731_v13 = vld [vmem:[#allocation3] sm:$0xff] (!%p1719_p11)  ;;  %v1727_v14 = vmul.f32 (!%p1719_p11), 0.0078125, %v1723_v12  ;;  %v1732_v17 = vld [vmem:[#allocation3 + $0x8] sm:$0xff] (!%p1719_p11)  ;;  %v1728_v0 = vmul.f32 (!%p1719_p11), 0.0078125, %v1724_v16  ;;  %v1729_v22 = vmul.f32 (!%p1719_p11), 0.0078125, %v1725_v19 }
 0x299   : > { %v1735_v15 = vmul.f32 (!%p1719_p11), 0.0078125, %v1731_v13  ;;  %v1736_v18 = vmul.f32 (!%p1719_p11), 0.0078125, %v1732_v17  ;;  %v1726_v24 = vld [vmem:[#allocation2 + $0x18] sm:$0xff] (!%p1719_p11)  ;;  %v1747_v51 = vld [vmem:[%s2822_s2] sm:$0xff] (!%p1719_p11)  ;;  %v1748_v52 = vld [vmem:[%s2822_s2 + $0x8] sm:$0xff] (!%p1719_p11) }
 0x29a   : > { %v1733_v20 = vld [vmem:[#allocation3 + $0x10] sm:$0xff] (!%p1719_p11)  ;;  %v1739_v21 = vmul.f32 (!%p1719_p11), %v1727_v14, %v1727_v14  ;;  %v1734_v25 = vld [vmem:[#allocation3 + $0x18] sm:$0xff] (!%p1719_p11)  ;;  %v1740_v27 = vmul.f32 (!%p1719_p11), %v1728_v0, %v1728_v0  ;;  %v1730_v29 = vmul.f32 (!%p1719_p11), 0.0078125, %v1726_v24  ;;  %v1741_v35 = vmul.f32 (!%p1719_p11), %v1729_v22, %v1729_v22  ;;  %v1768_v60 = vld [vmem:[%s2823_s3] sm:$0xff] (!%p1719_p11) }
 0x29b   : > { %v1737_v23 = vmul.f32 (!%p1719_p11), 0.0078125, %v1733_v20  ;;  %v1738_v31 = vmul.f32 (!%p1719_p11), 0.0078125, %v1734_v25  ;;  %v1749_v54 = vld [vmem:[%s2822_s2 + $0x10] sm:$0xff] (!%p1719_p11)  ;;  %v1750_v57 = vld [vmem:[%s2822_s2 + $0x18] sm:$0xff] (!%p1719_p11)  ;;  %v1769_v1 = vld [vmem:[%s2823_s3 + $0x8] sm:$0xff] (!%p1719_p11) }
 0x29c   : > { %v1743_v33 = vsub.f32 (!%p1719_p11), %v1735_v15, %v1739_v21  ;;  %v1744_v37 = vsub.f32 (!%p1719_p11), %v1736_v18, %v1740_v27  ;;  %v1742_v39 = vmul.f32 (!%p1719_p11), %v1730_v29, %v1730_v29  ;;  %v1770_v4 = vld [vmem:[%s2823_s3 + $0x10] sm:$0xff] (!%p1719_p11)  ;;  %v1771_v7 = vld [vmem:[%s2823_s3 + $0x18] sm:$0xff] (!%p1719_p11) }
 0x29d   : > { %v1745_v46 = vsub.f32 (!%p1719_p11), %v1737_v23, %v1741_v35 }
 0x29e   : > { %v1751_v45 = vadd.f32 (!%p1719_p11), 1e-05, %v1743_v33  ;;  %v1752_v47 = vadd.f32 (!%p1719_p11), 1e-05, %v1744_v37  ;;  %v1746_v48 = vsub.f32 (!%p1719_p11), %v1738_v31, %v1742_v39 }
 0x29f   : > { %v1753_v49 = vadd.f32 1e-05, %v1745_v46 }
 0x2a0   : > { %2320 = vrsqrt.f32 %v1751_v45  ;;  %v1754_v50 = vadd.f32 1e-05, %v1746_v48 }
 0x2a1   : > { %2322 = vrsqrt.f32 %v1752_v47 }
 0x2a2   : > { %2324 = vrsqrt.f32 %v1753_v49 }
 0x2a3   : > { %2326 = vrsqrt.f32 %v1754_v50 }
 0x2aa   : > { %v2321_v53 = vpop.eup %2320 }
 0x2ab   : > { %v2323_v55 = vpop.eup %2322  ;;  %v1759_v56 = vmul.f32 %v2321_v53, %v1747_v51 }
 0x2ac   : > { %v2325_v58 = vpop.eup %2324  ;;  %v1760_v59 = vmul.f32 %v2323_v55, %v1748_v52 }
 0x2ad   : > { %v2327_v61 = vpop.eup %2326  ;;  %1764 = vst.msk [vmem:[#allocation4] sm:$0xff] %vm1763_vm13, %v1759_v56  ;;  %v1761_v62 = vmul.f32 %v2325_v58, %v1749_v54  ;;  %v1772_v63 = vmul.f32 %v1759_v56, %v1727_v14 }
 0x2ae   : > { %1765 = vst.msk [vmem:[#allocation4 + $0x8] sm:$0xff] %vm1763_vm13, %v1760_v59  ;;  %v1762_v2 = vmul.f32 %v2327_v61, %v1750_v57  ;;  %v1773_v3 = vmul.f32 %v1760_v59, %v1728_v0 }
 0x2af   : > { %1766 = vst.msk [vmem:[#allocation4 + $0x10] sm:$0xff] %vm1763_vm13, %v1761_v62  ;;  %v1776_v5 = vsub.f32 %v1768_v60, %v1772_v63  ;;  %v1774_v6 = vmul.f32 %v1761_v62, %v1729_v22 }
 0x2b0   : > { %1767 = vst.msk [vmem:[#allocation4 + $0x18] sm:$0xff] %vm1763_vm13, %v1762_v2  ;;  %v1777_v8 = vsub.f32 %v1769_v1, %v1773_v3  ;;  %v1775_v9 = vmul.f32 %v1762_v2, %v1730_v29 }
 0x2b1   : > { %1780 = vst.msk [vmem:[#allocation5] sm:$0xff] %vm1763_vm13, %v1776_v5  ;;  %v1778_v10 = vsub.f32 %v1770_v4, %v1774_v6 }
 0x2b2   : > { %1781 = vst.msk [vmem:[#allocation5 + $0x8] sm:$0xff] %vm1763_vm13, %v1777_v8  ;;  %v1779_v11 = vsub.f32 %v1771_v7, %v1775_v9 }
 0x2b3   : > { %1782 = vst.msk [vmem:[#allocation5 + $0x10] sm:$0xff] %vm1763_vm13, %v1778_v10 }
 0x2b4   : > { %1783 = vst.msk [vmem:[#allocation5 + $0x18] sm:$0xff] %vm1763_vm13, %v1779_v11 }
 0x2b5 PF: > { %p2057_p12 = scmp.ne.s32.totalorder %s2356_s19, 1 }
 0x2b6   : > { %v1790_v12 = vld [vmem:[#allocation4 + $0x10] sm:$0xff] (!%p2057_p12)  ;;  %v1788_v13 = vld [vmem:[#allocation4] sm:$0xff] (!%p2057_p12)  ;;  %v2380_v14 = vmov (!%p2057_p12), 0   ;;  %v1789_v16 = vld [vmem:[#allocation4 + $0x8] sm:$0xff] (!%p2057_p12)  ;;  %vm1874_vm14 = vcmask (!%p2057_p12), 556032  }
 0x2b7   : > { %1787 = sbr.rel (%p2057_p12) target bundleno = 843 (0x34b), region = 56  ;;  %2329 = vset.pattern.permute.xlu1 (!%p2057_p12), %v2380_v14  ;;  %2328 = vset.pattern.permute.xlu0 (!%p2057_p12), %v2380_v14  ;;  %v1791_v15 = vld [vmem:[#allocation4 + $0x18] sm:$0xff] (!%p2057_p12) }
 0x2b8   : > { %1804 = vperm.xlu1 (!%p2057_p12), %2329, %v1790_v12   ;;  %1794 = vperm.xlu0 (!%p2057_p12), %2328, %v1788_v13   ;;  %v1824_v0 = vld [vmem:[#allocation5] sm:$0xff] (!%p2057_p12) }
 0x2b9   : > { %v1825_v17 = vld [vmem:[#allocation5 + $0x8] sm:$0xff] (!%p2057_p12) }
 0x2ba   : > { %v1826_v19 = vld [vmem:[#allocation5 + $0x10] sm:$0xff] (!%p2057_p12) }
 0x2bb   : > { %v1827_v18 = vld [vmem:[#allocation5 + $0x18] sm:$0xff] (!%p2057_p12) }
 0x2bc   : > { %1809 = vperm.xlu1 (!%p2057_p12), %2329, %v1791_v15   ;;  %1799 = vperm.xlu0 (!%p2057_p12), %2328, %v1789_v16  }
 0x2c0   : > { %1835 = vperm.xlu1 %2329, %v1825_v17   ;;  %1830 = vperm.xlu0 %2328, %v1824_v0  }
 0x2c4   : > { %1845 = vperm.xlu1 %2329, %v1827_v18   ;;  %1840 = vperm.xlu0 %2328, %v1826_v19  }
 0x337   : > { %v1805_v20 = vpop.permute.xlu1 %1804  ;;  %v1795_v21 = vpop.permute.xlu0 %1794 }
 0x338   : > { %v1812_v24 = vmul.f32 %v2671_v26, %v1795_v21  ;;  %v1818_v31 = vmul.f32 %v2679_v34, %v1805_v20  ;;  %v1813_v33 = vmul.f32 %v2673_v28, %v1795_v21  ;;  %v1814_v35 = vmul.f32 %v1795_v21, %v2689_v42 }
 0x339   : > { %v1819_v50 = vmul.f32 %v2681_v36, %v1805_v20  ;;  %v1820_v51 = vmul.f32 %v2687_v41, %v1805_v20 }
 0x33b   : > { %v1810_v22 = vpop.permute.xlu1 %1809  ;;  %v1800_v23 = vpop.permute.xlu0 %1799 }
 0x33c   : > { %v1815_v25 = vmul.f32 %v2675_v30, %v1800_v23  ;;  %v1816_v27 = vmul.f32 %v2677_v32, %v1800_v23  ;;  %v1817_v29 = vmul.f32 %v1800_v23, %v2693_v44  ;;  %v1821_v37 = vmul.f32 %v2683_v38, %v1810_v22 }
 0x33d   : > { %v1822_v30 = vmul.f32 %v2685_v40, %v1810_v22  ;;  %v1823_v32 = vmul.f32 %v2691_v43, %v1810_v22 }
 0x33f   : > { %v1836_v39 = vpop.permute.xlu1 %1835  ;;  %v1831_v45 = vpop.permute.xlu0 %1830 }
 0x340   : > { %v1851_v46 = vadd.f32 %v1836_v39, %v1815_v25  ;;  %v1852_v47 = vadd.f32 %v1836_v39, %v1816_v27  ;;  %v1853_v48 = vadd.f32 %v1836_v39, %v1817_v29  ;;  %v1848_v26 = vadd.f32 %v1831_v45, %v1812_v24 }
 0x341   : > { %v1849_v34 = vadd.f32 %v1831_v45, %v1813_v33  ;;  %v1850_v28 = vadd.f32 %v1831_v45, %v1814_v35 }
 0x342   : > { %v1863_v44 = vmax.f32 %v1851_v46, 0.0  ;;  %v1864_v42 = vmax.f32 %v1852_v47, 0.0  ;;  %v1865_v49 = vmax.f32 %v1853_v48, 0.0  ;;  %v1860_v38 = vmax.f32 %v1848_v26, 0.0 }
 0x343   : > { %v1861_v52 = vmax.f32 %v1849_v34, 0.0  ;;  %v1862_v53 = vmax.f32 %v1850_v28, 0.0  ;;  %v1846_v54 = vpop.permute.xlu1 %1845  ;;  %v1841_v40 = vpop.permute.xlu0 %1840 }
 0x344   : > { %1876 = vst [vmem:[%s2455_s8 + $0x18] sm:$0xff] %v1863_v44  ;;  %1877 = vst [vmem:[%s2455_s8 + $0x20] sm:$0xff] %v1864_v42  ;;  %v1857_v43 = vadd.f32 %v1846_v54, %v1821_v37  ;;  %v1858_v55 = vadd.f32 %v1846_v54, %v1822_v30  ;;  %v1859_v56 = vadd.f32 %v1846_v54, %v1823_v32 }
 0x345   : > { %1878 = vst.msk [vmem:[%s2455_s8 + $0x28] sm:$0xff] %vm1874_vm14, %v1865_v49  ;;  %1872 = vst [vmem:[%s2455_s8] sm:$0xff] %v1860_v38  ;;  %v1854_v36 = vadd.f32 %v1841_v40, %v1818_v31  ;;  %v1855_v41 = vadd.f32 %v1841_v40, %v1819_v50  ;;  %v1856_v57 = vadd.f32 %v1841_v40, %v1820_v51 }
 0x346   : > { %1873 = vst [vmem:[%s2455_s8 + $0x8] sm:$0xff] %v1861_v52  ;;  %1875 = vst.msk [vmem:[%s2455_s8 + $0x10] sm:$0xff] %vm1874_vm14, %v1862_v53  ;;  %v1869_v58 = vmax.f32 %v1857_v43, 0.0  ;;  %v1870_v59 = vmax.f32 %v1858_v55, 0.0  ;;  %v1871_v60 = vmax.f32 %v1859_v56, 0.0 }
 0x347   : > { %v1866_v61 = vmax.f32 %v1854_v36, 0.0  ;;  %v1867_v62 = vmax.f32 %v1855_v41, 0.0  ;;  %v1868_v63 = vmax.f32 %v1856_v57, 0.0 }
 0x348   : > { %1882 = vst [vmem:[%s2455_s8 + $0x48] sm:$0xff] %v1869_v58  ;;  %1883 = vst [vmem:[%s2455_s8 + $0x50] sm:$0xff] %v1870_v59 }
 0x349   : > { %1884 = vst.msk [vmem:[%s2455_s8 + $0x58] sm:$0xff] %vm1874_vm14, %v1871_v60  ;;  %1879 = vst [vmem:[%s2455_s8 + $0x30] sm:$0xff] %v1866_v61 }
 0x34a   : > { %1880 = vst [vmem:[%s2455_s8 + $0x38] sm:$0xff] %v1867_v62  ;;  %1881 = vst.msk [vmem:[%s2455_s8 + $0x40] sm:$0xff] %vm1874_vm14, %v1868_v63 }
 0x34b PF: > { %s15_s22 = sadd.s32 1, %s2368_s22   ;;  %s2827_s18 = smov %s2360_s20 }
 0x34c   : > { %p12_p13 = scmp.ge.s32.totalorder %s15_s22, 6   ;;  %s2828_s19 = smov %s2364_s21 }
 0x34d   : > { %s2829_s20 = smov %s2832_s23  ;;  %s2830_s21 = smov %s2836_s24 }
 0x34e   :  { %14 = sbr.rel (!%p12_p13) target bundleno = 3 (0x3), region = 94 }

// kernel: forward.11
= control target key start
LH: loop header
LB: loop body
LE: loop exit
PB: predicated region body
PF: predicated region fallthrough
CT: control target
= control target key end

     0   :  { %s589_s18 = smov 0   ;;  %s591_s19 = smov 0   ;;  %s670_s0 = inlined_call_operand.vmem [shape: bf16[1,8,32], index: 0, kind: input, shape index: {}]   ;;  %s671_s1 = inlined_call_operand.vmem [shape: bf16[2,32,64], index: 1, kind: input, shape index: {}]   ;;  %s672_s2 = inlined_call_operand.vmem [shape: f32[8,1], index: 2, kind: input, shape index: {}]   ;;  %s673_s3 = inlined_call_operand.vmem [shape: f32[8,1], index: 3, kind: input, shape index: {}]   ;;  %s674_s4 = inlined_call_operand.vmem [shape: f32[1,64], index: 4, kind: input, shape index: {}]   ;;  %s675_s5 = inlined_call_operand.vmem [shape: f32[2,8,64], index: 5, kind: output, shape index: {}]  }
   0x1   :  { %s593_s20 = smov 0   ;;  %s595_s21 = smov 0  }
   0x2   :  { %s597_s22 = smov 0  }
   0x3 LB: > { %s24_s23 = sadd.s32 1, %s545_s20  ;;  %s27_s24 = sadd.s32 1, %s549_s21  ;;  %s553_s22 = sphi %s597_s22, %s15_s22   ;;  %s549_s21 = sphi %s595_s21, %s679_s21   ;;  %s545_s20 = sphi %s593_s20, %s678_s20   ;;  %s541_s19 = sphi %s591_s19, %s677_s19   ;;  %s537_s18 = sphi %s589_s18, %s676_s18  }
   0x4   : > { %p25_p0 = scmp.ge.s32.totalorder %s24_s23, 2  ;;  %p442_p1 = scmp.ge.s32.totalorder %s553_s22, 1 }
   0x5   : > { %p199_p2 = scmp.lt.s32.totalorder %s553_s22, 5 }
   0x6   : > { %s681_s23 = smov (%p25_p0, %s24_s23), 0  ;;  %s683_s24 = smov (!%p25_p0, %s27_s24), %s549_s21 }
   0x7   : > { %p200_p3 = pnand %p442_p1, %p199_p2  ;;  %p29_p4 = scmp.ge.s32.totalorder %s683_s24, 2 }
   0x8   : > { %p226_p5 = scmp.lt.s32.totalorder (!%p200_p3), %s537_s18, 1  ;;  %v555_v0 = vmov (!%p200_p3), 0.0   ;;  %vm556_vm0 = vmmov (!%p200_p3), 0   ;;  %v240_v3 = vld [vmem:[%s670_s0] sm:$0xf] (!%p200_p3)  ;;  %vm253_vm1 = vcmask (!%p200_p3), 261120  }
   0x9   : > { %s685_s24 = smov (%p29_p4, %s683_s24), 0  ;;  %203 = sbr.rel (%p200_p3) target bundleno = 568 (0x238), region = 40 }
   0xa   : > { %458 = vmatprep.subr.bf16.mxu0 (!%p200_p3), %v555_v0  ;;  %462 = vmatprep.mubr.msk.bf16.mxu0 (!%p200_p3), %vm556_vm0, %v555_v0  ;;  %p297_p6 = scmp.eq.s32.totalorder (!%p200_p3), %s541_s19, 0  ;;  %p298_p7 = scmp.eq.s32.totalorder (!%p200_p3), %s537_s18, 0 }
   0xc   : > { %p299_p8 = pnand (!%p200_p3), %p298_p7, %p297_p6 }
  0x10   : > { %s227_s25 = scalar_select %p226_p5, %s537_s18, 1 }
  0x11   : > { %vm303_vm2 = vcmask (!%p299_p8), 7168   ;;  %v557_v8 = vmov (!%p299_p8), 0.0  }
  0x12   : > { %s454_s26 = sshll.u32 %s227_s25, 4  ;;  %s445_s27 = sshll.u32 %s227_s25, 3  ;;  %304 = vst.msk [vmem:[#allocation2] sm:$0xff] (!%p299_p8), %vm303_vm2, %v557_v8  ;;  %305 = vst.msk [vmem:[#allocation3] sm:$0xff] (!%p299_p8), %vm303_vm2, %v557_v8 }
  0x13   : > { %s230_s30 = scalar_lea.vmem %s671_s1, %s454_s26  ;;  %s631_s8 = scalar_lea.vmem %s675_s5, %s445_s27 }
  0x14   : > { %v510_v1 = vld [vmem:[%s230_s30] sm:$0xff]   ;;  %v511_v2 = vld [vmem:[%s230_s30 + $0x8] sm:$0xff]  }
  0x15   : > { %459 = vmatpush3.bf16.msra.mxu0 %v510_v1 }
  0x16   : > { %460 = vmatprep.subr.bf16.mxu0 %v555_v0 }
  0x19   : > { %461 = vmatpush3.bf16.msra.mxu0 %v511_v2 }
  0x1c   : > { %463 = vmatmul.mubr.msk.bf16.vlgmr.msra.gmra.mrb[0].mxu0 %vm253_vm1, %v240_v3 }
  0xec   : > { %302 = sbr.rel (%p299_p8) target bundleno = 243 (0xf3), region = 44 }
  0xef   : > { %v291_v4 = vpop.f32.mrb[0].mxu0 }
  0xf0   : > { %v464_v5 = vpop.f32.mrb[1].mxu0 }
  0xf1   : > { %v294_v6 = vpop.f32.mrb[2].mxu0 }
  0xf2   : > { %v465_v7 = vpop.f32.mrb[3].mxu0 }
  0xf3 PF: > { %p449_p9 = scmp.ne.s32.totalorder %s541_s19, 0 }
  0xf4   : > { %v450_v9 = vld [vmem:[%s674_s4] ss:$0 sm:$0xff] (!%p449_p9)  ;;  %vm318_vm3 = vcmask (!%p449_p9), 523264   ;;  %vm323_vm4 = vcmask (!%p449_p9), 7168   ;;  %v325_v17 = vld [vmem:[#allocation3] sm:$0xff] (!%p449_p9) }
  0xf5   : > { %308 = sbr.rel (%p449_p9) target bundleno = 397 (0x18d), region = 48  ;;  %v316_v10 = vmul.f32 (!%p449_p9), %v450_v9, %v291_v4  ;;  %v317_v14 = vld [vmem:[#allocation2] sm:$0xff] (!%p449_p9) }
  0xf7   : > { %v319_v11 = vsel (!%p449_p9), %vm318_vm3, %v316_v10, 0.0  ;;  %v326_v12 = vmul.f32 (!%p449_p9), %v316_v10, %v291_v4 }
  0xf8   : > { %320 = vadd.xlane.f32.xlu0 (!%p449_p9), %v319_v11 }
  0xf9   : > { %v327_v13 = vsel (!%p449_p9), %vm318_vm3, %v326_v12, 0.0 }
  0xfc   : > { %328 = vadd.xlane.f32.xlu0 %v327_v13 }
 0x185   : > { %v321_v15 = vpop.xlane.xlu0 %320 }
 0x186   : > { %v322_v16 = vadd.f32 %v321_v15, %v317_v14 }
 0x188   : > { %324 = vst.msk [vmem:[#allocation2] sm:$0xff] %vm323_vm4, %v322_v16 }
 0x189   : > { %v329_v18 = vpop.xlane.xlu0 %328 }
 0x18a   : > { %v330_v19 = vadd.f32 %v329_v18, %v325_v17 }
 0x18c   : > { %331 = vst.msk [vmem:[#allocation3] sm:$0xff] %vm323_vm4, %v330_v19 }
 0x18d PF: > { %p332_p10 = scmp.eq.s32.totalorder %s537_s18, 1 }
 0x18f   : > { %p333_p11 = pnand %p332_p10, %p297_p6 }
 0x190   : > { %v337_v20 = vld [vmem:[#allocation2] sm:$0xff] (!%p333_p11)  ;;  %vm347_vm5 = vcmask (!%p333_p11), 7168  }
 0x191   : > { %336 = sbr.rel (%p333_p11) target bundleno = 428 (0x1ac), region = 52  ;;  %v338_v22 = vmul.f32 (!%p333_p11), 0.0078125, %v337_v20  ;;  %v343_v27 = vld [vmem:[%s672_s2] sm:$0xff] (!%p333_p11) }
 0x192   : > { %v349_v30 = vld [vmem:[%s673_s3] sm:$0xff] (!%p333_p11) }
 0x193   : > { %v339_v21 = vld [vmem:[#allocation3] sm:$0xff] (!%p333_p11)  ;;  %v341_v24 = vmul.f32 (!%p333_p11), %v338_v22, %v338_v22 }
 0x194   : > { %v340_v23 = vmul.f32 (!%p333_p11), 0.0078125, %v339_v21 }
 0x196   : > { %v342_v25 = vsub.f32 (!%p333_p11), %v340_v23, %v341_v24 }
 0x198   : > { %v344_v26 = vadd.f32 1e-05, %v342_v25 }
 0x19a   : > { %512 = vrsqrt.f32 %v344_v26 }
 0x1a4   : > { %v513_v28 = vpop.eup %512 }
 0x1a5   : > { %v346_v29 = vmul.f32 %v513_v28, %v343_v27 }
 0x1a7   : > { %348 = vst.msk [vmem:[#allocation4] sm:$0xff] %vm347_vm5, %v346_v29  ;;  %v350_v31 = vmul.f32 %v346_v29, %v338_v22 }
 0x1a9   : > { %v351_v32 = vsub.f32 %v349_v30, %v350_v31 }
 0x1ab   : > { %352 = vst.msk [vmem:[#allocation5] sm:$0xff] %vm347_vm5, %v351_v32 }
 0x1ac PF: > { %p451_p12 = scmp.ne.s32.totalorder %s541_s19, 1 }
 0x1ad   : > { %v558_v34 = vmov (!%p451_p12), 0   ;;  %vm372_vm6 = vcmask (!%p451_p12), 523264  }
 0x1ae   : > { %356 = sbr.rel (%p451_p12) target bundleno = 568 (0x238), region = 56  ;;  %v357_v33 = vld [vmem:[#allocation4] sm:$0xff] (!%p451_p12)  ;;  %514 = vset.pattern.permute.xlu0 (!%p451_p12), %v558_v34 }
 0x1af   : > { %360 = vperm.xlu0 (!%p451_p12), %514, %v357_v33  }
 0x1b2   : > { %v364_v35 = vld [vmem:[#allocation5] sm:$0xff] (!%p451_p12) }
 0x1b3   : > { %367 = vperm.xlu0 (!%p451_p12), %514, %v364_v35  }
 0x22e   : > { %v361_v36 = vpop.permute.xlu0 %360 }
 0x22f   : > { %v363_v37 = vmul.f32 %v361_v36, %v291_v4 }
 0x232   : > { %v368_v38 = vpop.permute.xlu0 %367 }
 0x233   : > { %v370_v39 = vadd.f32 %v368_v38, %v363_v37 }
 0x235   : > { %v371_v40 = vmax.f32 %v370_v39, 0.0 }
 0x237   : > { %373 = vst.msk [vmem:[%s631_s8] sm:$0xff] %vm372_vm6, %v371_v40 }
 0x238 PF: > { %s15_s22 = sadd.s32 1, %s553_s22   ;;  %s676_s18 = smov %s545_s20 }
 0x239   : > { %p12_p13 = scmp.ge.s32.totalorder %s15_s22, 6   ;;  %s677_s19 = smov %s549_s21 }
 0x23a   : > { %s678_s20 = smov %s681_s23  ;;  %s679_s21 = smov %s685_s24 }
 0x23b   :  { %14 = sbr.rel (!%p12_p13) target bundleno = 3 (0x3), region = 86 }

// kernel: forward.12
= control target key start
LH: loop header
LB: loop body
LE: loop exit
PB: predicated region body
PF: predicated region fallthrough
CT: control target
= control target key end

     0   :  { %s1103_s18 = smov 0   ;;  %s1105_s19 = smov 0   ;;  %s1253_s0 = inlined_call_operand.vmem [shape: bf16[9,8,8], index: 0, kind: input, shape index: {}]   ;;  %s1254_s1 = inlined_call_operand.vmem [shape: bf16[2,8,122], index: 1, kind: input, shape index: {}]   ;;  %s1255_s2 = inlined_call_operand.vmem [shape: f32[8,1], index: 2, kind: input, shape index: {}]   ;;  %s1256_s3 = inlined_call_operand.vmem [shape: f32[8,1], index: 3, kind: input, shape index: {}]   ;;  %s1257_s4 = inlined_call_operand.vmem [shape: f32[1,100], index: 4, kind: input, shape index: {}]   ;;  %s1258_s5 = inlined_call_operand.vmem [shape: f32[2,8,100], index: 5, kind: output, shape index: {}]  }
   0x1   :  { %s1107_s20 = smov 0   ;;  %s1109_s21 = smov 0  }
   0x2   :  { %s1111_s22 = smov 0  }
   0x3 LB: > { %s24_s23 = sadd.s32 1, %s1051_s20  ;;  %s27_s24 = sadd.s32 1, %s1055_s21  ;;  %s1059_s22 = sphi %s1111_s22, %s15_s22   ;;  %s1055_s21 = sphi %s1109_s21, %s1262_s21   ;;  %s1051_s20 = sphi %s1107_s20, %s1261_s20   ;;  %s1047_s19 = sphi %s1105_s19, %s1260_s19   ;;  %s1043_s18 = sphi %s1103_s18, %s1259_s18  }
   0x4   : > { %p25_p0 = scmp.ge.s32.totalorder %s24_s23, 2  ;;  %p838_p1 = scmp.ge.s32.totalorder %s1059_s22, 1 }
   0x5   : > { %p198_p2 = scmp.lt.s32.totalorder %s1059_s22, 5 }
   0x6   : > { %s1264_s23 = smov (%p25_p0, %s24_s23), 0  ;;  %s1266_s24 = smov (!%p25_p0, %s27_s24), %s1055_s21 }
   0x7   : > { %p199_p3 = pnand %p838_p1, %p198_p2  ;;  %p29_p4 = scmp.ge.s32.totalorder %s1266_s24, 2 }
   0x8   : > { %p224_p5 = scmp.lt.s32.totalorder (!%p199_p3), %s1043_s18, 1  ;;  %v1061_v0 = vmov (!%p199_p3), 0.0   ;;  %vm1062_vm0 = vmmov (!%p199_p3), 0   ;;  %s1063_s9 = smov (!%p199_p3), 117   ;;  %vm246_vm1 = vcmask (!%p199_p3), 1043456   ;;  %vm242_vm2 = vcmask (!%p199_p3), 64512  }
   0x9   : > { %s1268_s24 = smov (%p29_p4, %s1266_s24), 0  ;;  %202 = sbr.rel (%p199_p3) target bundleno = 730 (0x2da), region = 40 }
   0xa   : > { %906 = vmatprep.subr.bf16.mxu0 (!%p199_p3), %v1061_v0  ;;  %908 = vmatprep.mubr.msk.bf16.mxu0 (!%p199_p3), %vm1062_vm0, %v1061_v0  ;;  %s1064_s10 = smov (!%p199_p3), 116   ;;  %s1065_s11 = smov (!%p199_p3), 127   ;;  %v849_v6 = vld [vmem:[%s1253_s0 + $0x10] sm:$0xf] (!%p199_p3)  ;;  %v841_v10 = vld [vmem:[%s1253_s0 + $0x4] sm:$0xf] (!%p199_p3) }
   0xb   : > { %882 = vmatprep.subr.bf16.mxu1 (!%p199_p3), %v1061_v0  ;;  %884 = vmatprep.mubr.msk.bf16.mxu1 (!%p199_p3), %vm1062_vm0, %v1061_v0  ;;  %s1066_s12 = smov (!%p199_p3), 108   ;;  %s1067_s13 = smov (!%p199_p3), 107   ;;  %v851_v13 = vld [vmem:[%s1253_s0 + $0x14] sm:$0xf] (!%p199_p3)  ;;  %v234_v16 = vld [vmem:[%s1253_s0] sm:$0xf] (!%p199_p3) }
   0xc   : > { %s1068_s14 = smov (!%p199_p3), 126   ;;  %s1069_s15 = smov (!%p199_p3), 106   ;;  %v853_v19 = vld [vmem:[%s1253_s0 + $0x18] sm:$0xf] (!%p199_p3)  ;;  %v845_v22 = vld [vmem:[%s1253_s0 + $0x8] sm:$0xf] (!%p199_p3) }
   0xd   : > { %s1070_s16 = smov (!%p199_p3), 118   ;;  %v855_v25 = vld [vmem:[%s1253_s0 + $0x1c] sm:$0xf] (!%p199_p3)  ;;  %v847_v27 = vld [vmem:[%s1253_s0 + $0xc] sm:$0xf] (!%p199_p3)  ;;  %p693_p6 = scmp.eq.s32.totalorder (!%p199_p3), %s1047_s19, 0 }
   0xe   : > { %v857_v28 = vld [vmem:[%s1253_s0 + $0x20] sm:$0xf] (!%p199_p3)  ;;  %p694_p7 = scmp.eq.s32.totalorder (!%p199_p3), %s1043_s18, 0 }
  0x10   : > { %s225_s25 = scalar_select %p224_p5, %s1043_s18, 1 }
  0x11   : > { %p695_p8 = pnand %p694_p7, %p693_p6 }
  0x12   : > { %s839_s26 = sshll.u32 %s225_s25, 2  ;;  %s840_s27 = sshll.u32 %s225_s25, 3  ;;  %vm699_vm3 = vcmask (!%p695_p8), 7168   ;;  %v1071_v38 = vmov (!%p695_p8), 0.0  }
  0x13   : > { %s227_s30 = scalar_lea.vmem %s1254_s1, %s839_s26  ;;  %s1151_s8 = scalar_lea.vmem %s1258_s5, %s840_s27  ;;  %700 = vst.msk [vmem:[#allocation2] sm:$0xff] (!%p695_p8), %vm699_vm3, %v1071_v38  ;;  %701 = vst.msk [vmem:[#allocation3] sm:$0xff] (!%p695_p8), %vm699_vm3, %v1071_v38 }
  0x14   : > { %v233_v1 = vld [vmem:[%s227_s30] sm:$0xf] }
  0x15   : > { %v842_v2 = vcombine.low %v233_v1, %v233_v1  ;;  %v294_v11 = vsel %vm246_vm1, %v233_v1, 0 }
  0x17   : > { %440 = vrot.lane.b32.xlu0 %v842_v2, %s1063_s9  ;;  %491 = vrot.lane.b32.xlu1 %v842_v2, %s1064_s10 }
  0x1b   : > { %240 = vrot.lane.b32.xlu0 %v842_v2, %s1065_s11  ;;  %542 = vrot.lane.b32.xlu1 %v842_v2, %s1066_s12 }
  0x1f   : > { %593 = vrot.lane.b32.xlu1 %v842_v2, %s1067_s13  ;;  %338 = vrot.lane.b32.xlu0 %v842_v2, %s1068_s14 }
  0x23   : > { %644 = vrot.lane.b32.xlu1 %v842_v2, %s1069_s15  ;;  %389 = vrot.lane.b32.xlu0 %v842_v2, %s1070_s16 }
  0x89   : > { %v441_v3 = vpop.permute.xlu0 %440  ;;  %v492_v4 = vpop.permute.xlu1 %491 }
  0x8a   : > { %v446_v5 = vsel %vm246_vm1, %v441_v3, 0  ;;  %v497_v7 = vsel %vm246_vm1, %v492_v4, 0 }
  0x8b   : > { %907 = vmatpush3.bf16.msra.mxu0 %v446_v5 }
  0x8c   : > { %912 = vmatprep.subr.bf16.mxu0 %v1061_v0 }
  0x8d   : > { %v241_v8 = vpop.permute.xlu0 %240  ;;  %v543_v12 = vpop.permute.xlu1 %542 }
  0x8e   : > { %909 = vmatmul.mubr.msk.bf16.vlgmr.msra.gmra.mrb[0].mxu0 %vm242_vm2, %v849_v6  ;;  %v248_v9 = vsel %vm246_vm1, %v241_v8, 0  ;;  %v548_v14 = vsel %vm246_vm1, %v543_v12, 0 }
  0x8f   : > { %883 = vmatpush3.bf16.msra.mxu1 %v248_v9  ;;  %913 = vmatpush3.bf16.msra.mxu0 %v497_v7 }
  0x90   : > { %914 = vmatprep.mubr.msk.bf16.mxu0 %vm1062_vm0, %v1061_v0  ;;  %888 = vmatprep.subr.bf16.mxu1 %v1061_v0 }
  0x91   : > { %918 = vmatprep.subr.bf16.mxu0 %v1061_v0  ;;  %v339_v15 = vpop.permute.xlu0 %338  ;;  %v594_v18 = vpop.permute.xlu1 %593 }
  0x92   : > { %885 = vmatmul.mubr.msk.bf16.vlgmr.msra.gmra.mrb[0].mxu1 %vm242_vm2, %v841_v10  ;;  %v344_v17 = vsel %vm246_vm1, %v339_v15, 0  ;;  %v599_v20 = vsel %vm246_vm1, %v594_v18, 0 }
  0x93   : > { %889 = vmatpush3.bf16.msra.mxu1 %v294_v11  ;;  %890 = vmatprep.mubr.msk.bf16.mxu1 %vm1062_vm0, %v1061_v0 }
  0x94   : > { %894 = vmatprep.subr.bf16.mxu1 %v1061_v0 }
  0x95   : > { %v390_v21 = vpop.permute.xlu0 %389  ;;  %v645_v24 = vpop.permute.xlu1 %644 }
  0x96   : > { %v395_v23 = vsel %vm246_vm1, %v390_v21, 0  ;;  %v650_v26 = vsel %vm246_vm1, %v645_v24, 0 }
  0x9a   : > { %915 = vmatmul.mubr.msk.bf16.vlgmr.msra.gmra.mrb[0].mxu0 %vm242_vm2, %v851_v13 }
  0x9b   : > { %919 = vmatpush3.bf16.msra.mxu0 %v548_v14  ;;  %920 = vmatprep.mubr.msk.bf16.mxu0 %vm1062_vm0, %v1061_v0 }
  0x9c   : > { %924 = vmatprep.subr.bf16.mxu0 %v1061_v0 }
  0x9e   : > { %891 = vmatmul.mubr.msk.bf16.vlgmr.msra.gmra.mrb[0].mxu1 %vm242_vm2, %v234_v16 }
  0x9f   : > { %895 = vmatpush3.bf16.msra.mxu1 %v344_v17  ;;  %896 = vmatprep.mubr.msk.bf16.mxu1 %vm1062_vm0, %v1061_v0 }
  0xa0   : > { %900 = vmatprep.subr.bf16.mxu1 %v1061_v0 }
  0xa6   : > { %921 = vmatmul.mubr.msk.bf16.vlgmr.msra.gmra.mrb[0].mxu0 %vm242_vm2, %v853_v19 }
  0xa7   : > { %925 = vmatpush3.bf16.msra.mxu0 %v599_v20  ;;  %926 = vmatprep.mubr.msk.bf16.mxu0 %vm1062_vm0, %v1061_v0 }
  0xa8   : > { %930 = vmatprep.subr.bf16.mxu0 %v1061_v0 }
  0xaa   : > { %897 = vmatmul.mubr.msk.bf16.vlgmr.msra.gmra.mrb[0].mxu1 %vm242_vm2, %v845_v22 }
  0xab   : > { %901 = vmatpush3.bf16.msra.mxu1 %v395_v23  ;;  %902 = vmatprep.mubr.msk.bf16.mxu1 %vm1062_vm0, %v1061_v0 }
  0xb2   : > { %927 = vmatmul.mubr.msk.bf16.vlgmr.msra.gmra.mrb[0].mxu0 %vm242_vm2, %v855_v25 }
  0xb3   : > { %931 = vmatpush3.bf16.msra.mxu0 %v650_v26  ;;  %932 = vmatprep.mubr.msk.bf16.mxu0 %vm1062_vm0, %v1061_v0 }
  0xb6   : > { %903 = vmatmul.mubr.msk.bf16.vlgmr.msra.gmra.mrb[0].mxu1 %vm242_vm2, %v847_v27 }
  0xbe   : > { %933 = vmatmul.mubr.msk.bf16.vlgmr.msra.gmra.mrb[0].mxu0 %vm242_vm2, %v857_v28 }
 0x189   : > { %v431_v29 = vpop.f32.mrb[0].mxu1 }
 0x18a   : > { %v904_v30 = vpop.f32.mrb[1].mxu1 }
 0x18b   : > { %v434_v31 = vpop.f32.mrb[2].mxu1 }
 0x18c   : > { %v905_v32 = vpop.f32.mrb[3].mxu1 }
 0x18e   : > { %698 = sbr.rel (%p695_p8) target bundleno = 405 (0x195), region = 44 }
 0x191   : > { %v686_v33 = vpop.f32.mrb[0].mxu0 }
 0x192   : > { %v936_v34 = vadd.f32 %v686_v33, %v431_v29  ;;  %v934_v35 = vpop.f32.mrb[1].mxu0 }
 0x193   : > { %v689_v36 = vpop.f32.mrb[2].mxu0 }
 0x194   : > { %v935_v37 = vpop.f32.mrb[3].mxu0 }
 0x195 PF: > { %p859_p9 = scmp.ne.s32.totalorder %s1047_s19, 0 }
 0x196   : > { %v860_v39 = vld [vmem:[%s1257_s4] ss:$0 sm:$0xff] (!%p859_p9)  ;;  %vm714_vm4 = vcmask (!%p859_p9), 818176   ;;  %vm719_vm5 = vcmask (!%p859_p9), 7168   ;;  %v721_v47 = vld [vmem:[#allocation3] sm:$0xff] (!%p859_p9) }
 0x197   : > { %704 = sbr.rel (%p859_p9) target bundleno = 559 (0x22f), region = 48  ;;  %v712_v40 = vmul.f32 (!%p859_p9), %v936_v34, %v860_v39  ;;  %v713_v44 = vld [vmem:[#allocation2] sm:$0xff] (!%p859_p9) }
 0x199   : > { %v715_v41 = vsel (!%p859_p9), %vm714_vm4, %v712_v40, 0.0  ;;  %v722_v42 = vmul.f32 (!%p859_p9), %v936_v34, %v712_v40 }
 0x19a   : > { %716 = vadd.xlane.f32.xlu0 (!%p859_p9), %v715_v41 }
 0x19b   : > { %v723_v43 = vsel (!%p859_p9), %vm714_vm4, %v722_v42, 0.0 }
 0x19e   : > { %724 = vadd.xlane.f32.xlu0 %v723_v43 }
 0x227   : > { %v717_v45 = vpop.xlane.xlu0 %716 }
 0x228   : > { %v718_v46 = vadd.f32 %v717_v45, %v713_v44 }
 0x22a   : > { %720 = vst.msk [vmem:[#allocation2] sm:$0xff] %vm719_vm5, %v718_v46 }
 0x22b   : > { %v725_v48 = vpop.xlane.xlu0 %724 }
 0x22c   : > { %v726_v49 = vadd.f32 %v725_v48, %v721_v47 }
 0x22e   : > { %727 = vst.msk [vmem:[#allocation3] sm:$0xff] %vm719_vm5, %v726_v49 }
 0x22f PF: > { %p728_p10 = scmp.eq.s32.totalorder %s1043_s18, 1 }
 0x231   : > { %p729_p11 = pnand %p728_p10, %p693_p6 }
 0x232   : > { %v733_v50 = vld [vmem:[#allocation2] sm:$0xff] (!%p729_p11)  ;;  %vm743_vm6 = vcmask (!%p729_p11), 7168  }
 0x233   : > { %732 = sbr.rel (%p729_p11) target bundleno = 590 (0x24e), region = 52  ;;  %v734_v52 = vmul.f32 (!%p729_p11), 0.0078125, %v733_v50  ;;  %v739_v57 = vld [vmem:[%s1255_s2] sm:$0xff] (!%p729_p11) }
 0x234   : > { %v745_v60 = vld [vmem:[%s1256_s3] sm:$0xff] (!%p729_p11) }
 0x235   : > { %v735_v51 = vld [vmem:[#allocation3] sm:$0xff] (!%p729_p11)  ;;  %v737_v54 = vmul.f32 (!%p729_p11), %v734_v52, %v734_v52 }
 0x236   : > { %v736_v53 = vmul.f32 (!%p729_p11), 0.0078125, %v735_v51 }
 0x238   : > { %v738_v55 = vsub.f32 (!%p729_p11), %v736_v53, %v737_v54 }
 0x23a   : > { %v740_v56 = vadd.f32 1e-05, %v738_v55 }
 0x23c   : > { %1018 = vrsqrt.f32 %v740_v56 }
 0x246   : > { %v1019_v58 = vpop.eup %1018 }
 0x247   : > { %v742_v59 = vmul.f32 %v1019_v58, %v739_v57 }
 0x249   : > { %744 = vst.msk [vmem:[#allocation4] sm:$0xff] %vm743_vm6, %v742_v59  ;;  %v746_v61 = vmul.f32 %v742_v59, %v734_v52 }
 0x24b   : > { %v747_v62 = vsub.f32 %v745_v60, %v746_v61 }
 0x24d   : > { %748 = vst.msk [vmem:[#allocation5] sm:$0xff] %vm743_vm6, %v747_v62 }
 0x24e PF: > { %p861_p12 = scmp.ne.s32.totalorder %s1047_s19, 1 }
 0x24f   : > { %v1072_v0 = vmov (!%p861_p12), 0   ;;  %vm768_vm7 = vcmask (!%p861_p12), 818176  }
 0x250   : > { %752 = sbr.rel (%p861_p12) target bundleno = 730 (0x2da), region = 56  ;;  %v753_v63 = vld [vmem:[#allocation4] sm:$0xff] (!%p861_p12)  ;;  %1020 = vset.pattern.permute.xlu0 (!%p861_p12), %v1072_v0 }
 0x251   : > { %756 = vperm.xlu0 (!%p861_p12), %1020, %v753_v63  }
 0x254   : > { %v760_v1 = vld [vmem:[#allocation5] sm:$0xff] (!%p861_p12) }
 0x255   : > { %763 = vperm.xlu0 (!%p861_p12), %1020, %v760_v1  }
 0x2d0   : > { %v757_v2 = vpop.permute.xlu0 %756 }
 0x2d1   : > { %v759_v3 = vmul.f32 %v936_v34, %v757_v2 }
 0x2d4   : > { %v764_v4 = vpop.permute.xlu0 %763 }
 0x2d5   : > { %v766_v5 = vadd.f32 %v764_v4, %v759_v3 }
 0x2d7   : > { %v767_v6 = vmax.f32 %v766_v5, 0.0 }
 0x2d9   : > { %769 = vst.msk [vmem:[%s1151_s8] sm:$0xff] %vm768_vm7, %v767_v6 }
 0x2da PF: > { %s15_s22 = sadd.s32 1, %s1059_s22   ;;  %s1259_s18 = smov %s1051_s20 }
 0x2db   : > { %p12_p13 = scmp.ge.s32.totalorder %s15_s22, 6   ;;  %s1260_s19 = smov %s1055_s21 }
 0x2dc   : > { %s1261_s20 = smov %s1264_s23  ;;  %s1262_s21 = smov %s1268_s24 }
 0x2dd   :  { %14 = sbr.rel (!%p12_p13) target bundleno = 3 (0x3), region = 94 }

</bundles_post_ra>
